<compile_context>
chip_gen: v5e
topology: v5e:2x2
jax: 0.10.0
libtpu: 0.0.40
codegen_flags: <defaults>
</compile_context>

<pallas_src>
import functools

import jax
import jax.numpy as jnp
from jax import lax
from jax.experimental import pallas as pl
from jax.experimental.pallas import tpu as pltpu


def _encoder_layer_kernel(x_ref, pos_ref,
                          wqk_ref, bqk_ref, wv_ref, wo_ref,
                          w1_ref, b1_ref, w2_ref, vec_ref,
                          o_ref, *, nhead, eps):
    f32 = jnp.float32
    bf16 = jnp.bfloat16
    Bt, S, D = x_ref.shape
    hd = D // nhead
    T = Bt * S
    G = Bt * nhead

    # flat token matrices (leading-dim merge, no relayout)
    x = x_ref[...].reshape(T, D)        # (T, D) f32
    pos = pos_ref[...].reshape(T, D)    # (T, D) f32

    vec = vec_ref[...]                  # (8, D) packed f32 vectors
    b_v, b_o, b2 = vec[0:1], vec[1:2], vec[2:3]
    g1, be1, g2, be2 = vec[3:4], vec[4:5], vec[5:6], vec[6:7]

    # ---- fused Q/K projection (q = k = src + pos), V projection (value = src) ----
    # 1/sqrt(hd) is pre-folded into the Q half of wqk/bqk by the wrapper.
    qk_in = (x + pos).astype(bf16)
    qk = jnp.dot(qk_in, wqk_ref[...], preferred_element_type=f32) + bqk_ref[...]      # (T, 2D)
    v = jnp.dot(x.astype(bf16), wv_ref[...], preferred_element_type=f32) + b_v        # (T, D)
    q = qk[:, :D]
    k = qk[:, D:]

    def to_heads(t):  # (T, D) -> (G, S, hd)
        return jnp.transpose(t.reshape(Bt, S, nhead, hd), (0, 2, 1, 3)).reshape(G, S, hd)

    qh = to_heads(q).astype(bf16)
    kh = to_heads(k).astype(bf16)
    vh = to_heads(v).astype(bf16)

    # ---- attention (whole-sequence scores; f32 softmax statistics) ----
    s = jnp.einsum('gqd,gkd->gqk', qh, kh, preferred_element_type=f32)                # (G, S, S)
    s = s - jnp.max(s, axis=-1, keepdims=True)
    p = jnp.exp(s)
    p = p * pl.reciprocal(jnp.sum(p, axis=-1, keepdims=True), approx=False)
    o = jnp.einsum('gqk,gkd->gqd', p.astype(bf16), vh, preferred_element_type=f32)    # (G, S, hd)

    # ---- output projection: per-head accumulation, no transpose-back of heads ----
    o4 = o.reshape(Bt, nhead, S, hd).astype(bf16)                                     # (Bt,H,S,hd)
    attn = jnp.dot(o4[:, 0].reshape(T, hd), wo_ref[0], preferred_element_type=f32)
    for h in range(1, nhead):
        attn = attn + jnp.dot(o4[:, h].reshape(T, hd), wo_ref[h],
                              preferred_element_type=f32)
    attn = attn + b_o                                                                  # (T, D)

    # ---- residual + LayerNorm1 (dropout1 = identity) ----
    h1 = x + attn
    mu = jnp.mean(h1, axis=-1, keepdims=True)
    var = jnp.mean((h1 - mu) ** 2, axis=-1, keepdims=True)
    h1 = (h1 - mu) * lax.rsqrt(var + eps) * g1 + be1

    # ---- FFN: linear2(relu(linear1(x))) (dropout = identity) ----
    f = jnp.dot(h1.astype(bf16), w1_ref[...], preferred_element_type=f32) + b1_ref[...]
    f = jnp.maximum(f, 0.0)
    f = jnp.dot(f.astype(bf16), w2_ref[...], preferred_element_type=f32) + b2

    # ---- residual + LayerNorm2 (dropout2 = identity) ----
    h2 = h1 + f
    mu2 = jnp.mean(h2, axis=-1, keepdims=True)
    var2 = jnp.mean((h2 - mu2) ** 2, axis=-1, keepdims=True)
    out = (h2 - mu2) * lax.rsqrt(var2 + eps) * g2 + be2
    o_ref[...] = out.reshape(Bt, S, D)


def _pick_btile(B, S, H, D, F):
    """Largest divisor of B whose per-step working set fits a conservative VMEM
    budget; raising tokens/step fills the MXU M dim (>=128 v5e, >=256 v6e/v7x)
    and amortizes the ~0.35us/step grid overhead."""
    budget = 24 * 1024 * 1024
    best = 1
    for cand in range(1, B + 1):
        if B % cand:
            continue
        t = cand * S
        need = (cand * H * S * S * 4        # f32 score tensor
                + 3 * 2 * t * D * 4         # double-buffered in/out activation blocks
                + t * F * 4                 # FFN intermediate
                + 4 * t * D * 4)            # q/k/v/attn temporaries (rough)
        if need > budget:
            break
        best = cand
        if t >= 256:
            break
    return best


def prepare_params(params, nhead):
    """One-time weight preprocessing: fuse Q|K, fold the softmax scale into Q,
    pre-transpose all matmul weights, reshape Wo per-head, pack small vectors."""
    D = params["out_w"].shape[0]
    F = params["w1"].shape[0]
    hd = D // nhead
    scale = 1.0 / float(hd) ** 0.5
    bf16 = jnp.bfloat16

    ipw, ipb = params["in_proj_w"], params["in_proj_b"]   # (3D, D), (3D,)
    wq = ipw[:D] * scale                                   # fold 1/sqrt(hd) into Q
    bq = ipb[:D] * scale
    wk, bk = ipw[D:2 * D], ipb[D:2 * D]
    wv, bv = ipw[2 * D:], ipb[2 * D:]

    w_qk = jnp.concatenate([wq.T, wk.T], axis=1).astype(bf16)          # (D, 2D)
    b_qk = jnp.concatenate([bq, bk]).reshape(1, 2 * D).astype(jnp.float32)
    w_v = wv.T.astype(bf16)                                            # (D, D)
    # out-proj: attn @ out_w.T  ->  per-head (H, hd, D) blocks of out_w.T
    w_o = jnp.transpose(params["out_w"]).reshape(nhead, hd, D).astype(bf16)
    w1t = jnp.transpose(params["w1"]).astype(bf16)                     # (D, F)
    b1 = params["b1"].reshape(1, F).astype(jnp.float32)
    w2t = jnp.transpose(params["w2"]).astype(bf16)                     # (F, D)

    vec = jnp.zeros((8, D), jnp.float32)
    vec = vec.at[0].set(bv).at[1].set(params["out_b"]).at[2].set(params["b2"])
    vec = vec.at[3].set(params["g1"]).at[4].set(params["be1"])
    vec = vec.at[5].set(params["g2"]).at[6].set(params["be2"])

    return dict(w_qk=w_qk, b_qk=b_qk, w_v=w_v, w_o=w_o, w1=w1t, b1=b1, w2=w2t, vec=vec)


def _build_call(B, S, D, F, nhead, eps, btile, single_buffer_weights):
    hd = D // nhead

    def act_spec():
        return pl.BlockSpec((btile, S, D), lambda b: (b, 0, 0))

    def wt_spec(shape):
        ndim = len(shape)
        idx = lambda b, _n=ndim: (0,) * _n
        if single_buffer_weights:
            # grid-invariant operands: never re-fetched, no need to double-buffer.
            return pl.BlockSpec(shape, idx, pipeline_mode=pl.Buffered(1))
        return pl.BlockSpec(shape, idx)

    kernel = functools.partial(_encoder_layer_kernel, nhead=nhead, eps=eps)

    flops = int(2 * B * S * (D * 2 * D + D * D + D * D + 2 * D * F)
                + 4 * B * nhead * S * S * hd)
    transcendentals = int(B * nhead * S * S + 2 * B * S)
    bytes_accessed = int(3 * B * S * D * 4
                         + (2 * D * D + D * D + D * D + 2 * D * F) * 2
                         + (8 * D + 2 * D + F) * 4)

    return pl.pallas_call(
        kernel,
        out_shape=jax.ShapeDtypeStruct((B, S, D), jnp.float32),
        grid=(B // btile,),
        in_specs=[
            act_spec(), act_spec(),                      # src, pos
            wt_spec((D, 2 * D)), wt_spec((1, 2 * D)),    # fused Wq|Wk (pre-T, Q scaled), bias
            wt_spec((D, D)),                             # Wv (pre-T)
            wt_spec((nhead, hd, D)),                     # Wo reshaped per-head
            wt_spec((D, F)), wt_spec((1, F)),            # linear1 (pre-T), bias
            wt_spec((F, D)),                             # linear2 (pre-T)
            wt_spec((8, D)),                             # packed b_v,b_o,b2,g1,be1,g2,be2
        ],
        out_specs=pl.BlockSpec((btile, S, D), lambda b: (b, 0, 0)),
        compiler_params=pltpu.CompilerParams(
            dimension_semantics=("parallel",),
            vmem_limit_bytes=64 * 1024 * 1024),
        cost_estimate=pl.CostEstimate(flops=flops, transcendentals=transcendentals,
                                      bytes_accessed=bytes_accessed),
    )


def make_encoder_layer(params, *, nhead, batch, seq, eps=1e-5):
    """Build once (weights preprocessed, config chosen, wrapper jitted); call many times."""
    D = params["out_w"].shape[0]
    F = params["w1"].shape[0]
    prep = prepare_params(params, nhead)
    btile = _pick_btile(batch, seq, nhead, D, F)

    def run(src, pos, prep, *, single_buffer):
        call = _build_call(batch, seq, D, F, nhead, eps, btile, single_buffer)
        return call(src, pos, prep["w_qk"], prep["b_qk"], prep["w_v"], prep["w_o"],
                    prep["w1"], prep["b1"], prep["w2"], prep["vec"])

    # One-time feature detection at init: does this Pallas build accept Buffered(1)?
    # Only lowering is attempted here; genuine runtime errors are never swallowed.
    dummy = jax.ShapeDtypeStruct((batch, seq, D), jnp.float32)
    single_buffer = True
    try:
        jax.jit(functools.partial(run, single_buffer=True)).lower(dummy, dummy, prep)
    except Exception:  # noqa: BLE001 - lowering-capability probe only
        single_buffer = False

    fn = jax.jit(functools.partial(run, single_buffer=single_buffer))
    return lambda src, pos: fn(src, pos, prep)


# ---------------- pure-JAX reference (correctness check) ----------------
def _layer_norm(x, g, b, eps=1e-5):
    mu = jnp.mean(x, axis=-1, keepdims=True)
    var = jnp.mean((x - mu) ** 2, axis=-1, keepdims=True)
    return (x - mu) * lax.rsqrt(var + eps) * g + b


def reference(src, pos, params, nhead, eps=1e-5):
    B, S, D = src.shape
    hd = D // nhead
    ipw, ipb = params["in_proj_w"], params["in_proj_b"]
    qk = src + pos
    q = qk @ ipw[:D].T + ipb[:D]
    k = qk @ ipw[D:2 * D].T + ipb[D:2 * D]
    v = src @ ipw[2 * D:].T + ipb[2 * D:]

    def split(t):  # (B,S,D) -> (B,H,S,hd)
        return t.reshape(B, S, nhead, hd).transpose(0, 2, 1, 3)

    qh, kh, vh = split(q), split(k), split(v)
    s = jnp.einsum("bhqd,bhkd->bhqk", qh, kh) / jnp.sqrt(jnp.float32(hd))
    p = jax.nn.softmax(s, axis=-1)
    o = jnp.einsum("bhqk,bhkd->bhqd", p, vh)
    o = o.transpose(0, 2, 1, 3).reshape(B, S, D)
    o = o @ params["out_w"].T + params["out_b"]

    x = _layer_norm(src + o, params["g1"], params["be1"], eps)
    f = jnp.maximum(x @ params["w1"].T + params["b1"], 0.0)
    f = f @ params["w2"].T + params["b2"]
    return _layer_norm(x + f, params["g2"], params["be2"], eps)


if __name__ == "__main__":
    B, S, D, H, F_ff = 2, 16, 128, 4, 256
    key = jax.random.PRNGKey(0)
    ks = jax.random.split(key, 10)

    def init(k, shape, scale=0.05):   # ~ Xavier scale for these fan-ins
        return scale * jax.random.normal(k, shape, jnp.float32)

    params = dict(
        in_proj_w=init(ks[0], (3 * D, D)),
        in_proj_b=init(ks[1], (3 * D,)),
        out_w=init(ks[2], (D, D)),
        out_b=init(ks[3], (D,)),
        w1=init(ks[4], (F_ff, D)),
        b1=init(ks[5], (F_ff,)),
        w2=init(ks[6], (D, F_ff)),
        b2=init(ks[7], (D,)),
        g1=jnp.ones((D,), jnp.float32),
        be1=jnp.zeros((D,), jnp.float32),
        g2=jnp.ones((D,), jnp.float32),
        be2=jnp.zeros((D,), jnp.float32),
    )

    src = jax.random.normal(ks[8], (B, S, D), jnp.float32)
    pos = jax.random.normal(ks[9], (B, S, D), jnp.float32)

    layer = make_encoder_layer(params, nhead=H, batch=B, seq=S)
    out = jax.block_until_ready(layer(src, pos))

    with jax.default_matmul_precision("float32"):
        ref = reference(src, pos, params, H)
    err = float(jnp.max(jnp.abs(out - ref)))
    # bf16 MXU operands (f32 accumulation) => compare against the true-f32 reference
    # with a bf16-appropriate tolerance.
    assert err < 5e-2, f"max abs err {err}"
    print("KERNEL_OK")
</pallas_src>

<mosaic_0001>
module attributes {stable_mosaic.version = 11 : i64} {
  func.func @_encoder_layer_kernel(%arg0: i32, %arg1: memref<2x16x128xf32, #tpu.memory_space<vmem>>, %arg2: memref<2x16x128xf32, #tpu.memory_space<vmem>>, %arg3: memref<128x256xbf16, #tpu.memory_space<vmem>>, %arg4: memref<1x256xf32, #tpu.memory_space<vmem>>, %arg5: memref<128x128xbf16, #tpu.memory_space<vmem>>, %arg6: memref<4x32x128xbf16, #tpu.memory_space<vmem>>, %arg7: memref<128x256xbf16, #tpu.memory_space<vmem>>, %arg8: memref<1x256xf32, #tpu.memory_space<vmem>>, %arg9: memref<256x128xbf16, #tpu.memory_space<vmem>>, %arg10: memref<8x128xf32, #tpu.memory_space<vmem>>, %arg11: memref<2x16x128xf32, #tpu.memory_space<vmem>>) attributes {dimension_semantics = [#tpu.dimension_semantics<parallel>], iteration_bounds = array<i64: 1>, scalar_prefetch = 0 : i64, scratch_operands = 0 : i64, tpu.core_type = #tpu.core_type<tc>, window_params = [{transform_indices = @transform_0, window_bounds = array<i64: 2, 16, 128>}, {transform_indices = @transform_1, window_bounds = array<i64: 2, 16, 128>}, {pipeline_mode = #tpu.pipeline_mode<synchronous>, transform_indices = @transform_2, window_bounds = array<i64: 128, 256>}, {pipeline_mode = #tpu.pipeline_mode<synchronous>, transform_indices = @transform_3, window_bounds = array<i64: 1, 256>}, {pipeline_mode = #tpu.pipeline_mode<synchronous>, transform_indices = @transform_4, window_bounds = array<i64: 128, 128>}, {pipeline_mode = #tpu.pipeline_mode<synchronous>, transform_indices = @transform_5, window_bounds = array<i64: 4, 32, 128>}, {pipeline_mode = #tpu.pipeline_mode<synchronous>, transform_indices = @transform_6, window_bounds = array<i64: 128, 256>}, {pipeline_mode = #tpu.pipeline_mode<synchronous>, transform_indices = @transform_7, window_bounds = array<i64: 1, 256>}, {pipeline_mode = #tpu.pipeline_mode<synchronous>, transform_indices = @transform_8, window_bounds = array<i64: 256, 128>}, {pipeline_mode = #tpu.pipeline_mode<synchronous>, transform_indices = @transform_9, window_bounds = array<i64: 8, 128>}, {transform_indices = @transform_10, window_bounds = array<i64: 2, 16, 128>}]} {
    %c0 = arith.constant 0 : index
    %c0_0 = arith.constant 0 : index
    %c0_1 = arith.constant 0 : index
    %0 = vector.load %arg1[%c0, %c0_0, %c0_1] : memref<2x16x128xf32, #tpu.memory_space<vmem>>, vector<2x16x128xf32>
    %1 = vector.shape_cast %0 : vector<2x16x128xf32> to vector<32x128xf32>
    %c0_2 = arith.constant 0 : index
    %c0_3 = arith.constant 0 : index
    %c0_4 = arith.constant 0 : index
    %2 = vector.load %arg2[%c0_2, %c0_3, %c0_4] : memref<2x16x128xf32, #tpu.memory_space<vmem>>, vector<2x16x128xf32>
    %3 = vector.shape_cast %2 : vector<2x16x128xf32> to vector<32x128xf32>
    %c0_5 = arith.constant 0 : index
    %c0_6 = arith.constant 0 : index
    %4 = vector.load %arg10[%c0_5, %c0_6] : memref<8x128xf32, #tpu.memory_space<vmem>>, vector<8x128xf32>
    %5 = vector.extract_strided_slice %4 {offsets = [0, 0], sizes = [1, 128], strides = [1, 1]} : vector<8x128xf32> to vector<1x128xf32>
    %6 = vector.extract_strided_slice %4 {offsets = [1, 0], sizes = [1, 128], strides = [1, 1]} : vector<8x128xf32> to vector<1x128xf32>
    %7 = vector.extract_strided_slice %4 {offsets = [2, 0], sizes = [1, 128], strides = [1, 1]} : vector<8x128xf32> to vector<1x128xf32>
    %8 = vector.extract_strided_slice %4 {offsets = [3, 0], sizes = [1, 128], strides = [1, 1]} : vector<8x128xf32> to vector<1x128xf32>
    %9 = vector.extract_strided_slice %4 {offsets = [4, 0], sizes = [1, 128], strides = [1, 1]} : vector<8x128xf32> to vector<1x128xf32>
    %10 = vector.extract_strided_slice %4 {offsets = [5, 0], sizes = [1, 128], strides = [1, 1]} : vector<8x128xf32> to vector<1x128xf32>
    %11 = vector.extract_strided_slice %4 {offsets = [6, 0], sizes = [1, 128], strides = [1, 1]} : vector<8x128xf32> to vector<1x128xf32>
    %12 = arith.addf %1, %3 : vector<32x128xf32>
    %13 = arith.truncf %12 : vector<32x128xf32> to vector<32x128xbf16>
    %c0_7 = arith.constant 0 : index
    %c0_8 = arith.constant 0 : index
    %14 = vector.load %arg3[%c0_7, %c0_8] : memref<128x256xbf16, #tpu.memory_space<vmem>>, vector<128x256xbf16>
    %cst = arith.constant dense<0.000000e+00> : vector<32x256xf32>
    %15 = tpu.matmul %13, %14, %cst {dimension_numbers = #tpu.dot_dimension_numbers<[1], [0], [0], [1], [0, 0, 1, 1], [], []>} : vector<32x128xbf16>, vector<128x256xbf16>, vector<32x256xf32> -> vector<32x256xf32>
    %c0_9 = arith.constant 0 : index
    %c0_10 = arith.constant 0 : index
    %16 = vector.load %arg4[%c0_9, %c0_10] : memref<1x256xf32, #tpu.memory_space<vmem>>, vector<1x256xf32>
    %17 = vector.broadcast %16 : vector<1x256xf32> to vector<32x256xf32>
    %18 = arith.addf %15, %17 : vector<32x256xf32>
    %19 = arith.truncf %1 : vector<32x128xf32> to vector<32x128xbf16>
    %c0_11 = arith.constant 0 : index
    %c0_12 = arith.constant 0 : index
    %20 = vector.load %arg5[%c0_11, %c0_12] : memref<128x128xbf16, #tpu.memory_space<vmem>>, vector<128x128xbf16>
    %cst_13 = arith.constant dense<0.000000e+00> : vector<32x128xf32>
    %21 = tpu.matmul %19, %20, %cst_13 {dimension_numbers = #tpu.dot_dimension_numbers<[1], [0], [0], [1], [0, 0, 1, 1], [], []>} : vector<32x128xbf16>, vector<128x128xbf16>, vector<32x128xf32> -> vector<32x128xf32>
    %22 = vector.broadcast %5 : vector<1x128xf32> to vector<32x128xf32>
    %23 = arith.addf %21, %22 : vector<32x128xf32>
    %24 = vector.extract_strided_slice %18 {offsets = [0, 0], sizes = [32, 128], strides = [1, 1]} : vector<32x256xf32> to vector<32x128xf32>
    %25 = vector.extract_strided_slice %18 {offsets = [0, 128], sizes = [32, 128], strides = [1, 1]} : vector<32x256xf32> to vector<32x128xf32>
    %26 = vector.shape_cast %24 : vector<32x128xf32> to vector<2x16x4x32xf32>
    %27 = tpu.transpose %26, [0, 2, 1, 3] : vector<2x16x4x32xf32> -> vector<2x4x16x32xf32>
    %28 = vector.shape_cast %27 : vector<2x4x16x32xf32> to vector<8x16x32xf32>
    %29 = arith.truncf %28 : vector<8x16x32xf32> to vector<8x16x32xbf16>
    %30 = vector.shape_cast %25 : vector<32x128xf32> to vector<2x16x4x32xf32>
    %31 = tpu.transpose %30, [0, 2, 1, 3] : vector<2x16x4x32xf32> -> vector<2x4x16x32xf32>
    %32 = vector.shape_cast %31 : vector<2x4x16x32xf32> to vector<8x16x32xf32>
    %33 = arith.truncf %32 : vector<8x16x32xf32> to vector<8x16x32xbf16>
    %34 = vector.shape_cast %23 : vector<32x128xf32> to vector<2x16x4x32xf32>
    %35 = tpu.transpose %34, [0, 2, 1, 3] : vector<2x16x4x32xf32> -> vector<2x4x16x32xf32>
    %36 = vector.shape_cast %35 : vector<2x4x16x32xf32> to vector<8x16x32xf32>
    %37 = arith.truncf %36 : vector<8x16x32xf32> to vector<8x16x32xbf16>
    "tpu.trace_start"() <{level = 10 : i32, message = "gqd,gkd->gqk"}> : () -> ()
    %cst_14 = arith.constant dense<0.000000e+00> : vector<8x16x16xf32>
    %38 = tpu.matmul %29, %33, %cst_14 {dimension_numbers = #tpu.dot_dimension_numbers<[2], [2], [1], [1], [0, 0, 0, 1, 1, 1], [0], [0]>} : vector<8x16x32xbf16>, vector<8x16x32xbf16>, vector<8x16x16xf32> -> vector<8x16x16xf32>
    "tpu.trace_stop"() : () -> ()
    %cst_15 = arith.constant dense<0xFF800000> : vector<8x16xf32>
    %39 = vector.multi_reduction <maximumf>, %38, %cst_15 [2] : vector<8x16x16xf32> to vector<8x16xf32>
    %40 = vector.shape_cast %39 : vector<8x16xf32> to vector<8x16x1xf32>
    %41 = vector.broadcast %40 : vector<8x16x1xf32> to vector<8x16x16xf32>
    %42 = arith.subf %38, %41 : vector<8x16x16xf32>
    %43 = math.exp %42 : vector<8x16x16xf32>
    %cst_16 = arith.constant dense<0.000000e+00> : vector<8x16xf32>
    %44 = vector.multi_reduction <add>, %43, %cst_16 [2] : vector<8x16x16xf32> to vector<8x16xf32>
    %45 = vector.shape_cast %44 : vector<8x16xf32> to vector<8x16x1xf32>
    %46 = tpu.reciprocal %45 : vector<8x16x1xf32> -> vector<8x16x1xf32>
    %47 = vector.broadcast %46 : vector<8x16x1xf32> to vector<8x16x16xf32>
    %48 = arith.mulf %43, %47 : vector<8x16x16xf32>
    %49 = arith.truncf %48 : vector<8x16x16xf32> to vector<8x16x16xbf16>
    "tpu.trace_start"() <{level = 10 : i32, message = "gqk,gkd->gqd"}> : () -> ()
    %cst_17 = arith.constant dense<0.000000e+00> : vector<8x16x32xf32>
    %50 = tpu.matmul %49, %37, %cst_17 {dimension_numbers = #tpu.dot_dimension_numbers<[2], [1], [1], [2], [0, 0, 0, 1, 1, 2], [0], [0]>} : vector<8x16x16xbf16>, vector<8x16x32xbf16>, vector<8x16x32xf32> -> vector<8x16x32xf32>
    "tpu.trace_stop"() : () -> ()
    %51 = vector.shape_cast %50 : vector<8x16x32xf32> to vector<2x4x16x32xf32>
    %52 = arith.truncf %51 : vector<2x4x16x32xf32> to vector<2x4x16x32xbf16>
    %53 = vector.extract_strided_slice %52 {offsets = [0, 0, 0, 0], sizes = [2, 1, 16, 32], strides = [1, 1, 1, 1]} : vector<2x4x16x32xbf16> to vector<2x1x16x32xbf16>
    %54 = vector.shape_cast %53 : vector<2x1x16x32xbf16> to vector<2x16x32xbf16>
    %55 = vector.shape_cast %54 : vector<2x16x32xbf16> to vector<32x32xbf16>
    %c0_18 = arith.constant 0 : index
    %c0_19 = arith.constant 0 : index
    %c0_20 = arith.constant 0 : index
    %56 = vector.load %arg6[%c0_18, %c0_19, %c0_20] : memref<4x32x128xbf16, #tpu.memory_space<vmem>>, vector<1x32x128xbf16>
    %57 = vector.shape_cast %56 : vector<1x32x128xbf16> to vector<32x128xbf16>
    %cst_21 = arith.constant dense<0.000000e+00> : vector<32x128xf32>
    %58 = tpu.matmul %55, %57, %cst_21 {dimension_numbers = #tpu.dot_dimension_numbers<[1], [0], [0], [1], [0, 0, 1, 1], [], []>} : vector<32x32xbf16>, vector<32x128xbf16>, vector<32x128xf32> -> vector<32x128xf32>
    %59 = vector.extract_strided_slice %52 {offsets = [0, 1, 0, 0], sizes = [2, 1, 16, 32], strides = [1, 1, 1, 1]} : vector<2x4x16x32xbf16> to vector<2x1x16x32xbf16>
    %60 = vector.shape_cast %59 : vector<2x1x16x32xbf16> to vector<2x16x32xbf16>
    %61 = vector.shape_cast %60 : vector<2x16x32xbf16> to vector<32x32xbf16>
    %c1 = arith.constant 1 : index
    %c0_22 = arith.constant 0 : index
    %c0_23 = arith.constant 0 : index
    %62 = vector.load %arg6[%c1, %c0_22, %c0_23] : memref<4x32x128xbf16, #tpu.memory_space<vmem>>, vector<1x32x128xbf16>
    %63 = vector.shape_cast %62 : vector<1x32x128xbf16> to vector<32x128xbf16>
    %cst_24 = arith.constant dense<0.000000e+00> : vector<32x128xf32>
    %64 = tpu.matmul %61, %63, %cst_24 {dimension_numbers = #tpu.dot_dimension_numbers<[1], [0], [0], [1], [0, 0, 1, 1], [], []>} : vector<32x32xbf16>, vector<32x128xbf16>, vector<32x128xf32> -> vector<32x128xf32>
    %65 = arith.addf %58, %64 : vector<32x128xf32>
    %66 = vector.extract_strided_slice %52 {offsets = [0, 2, 0, 0], sizes = [2, 1, 16, 32], strides = [1, 1, 1, 1]} : vector<2x4x16x32xbf16> to vector<2x1x16x32xbf16>
    %67 = vector.shape_cast %66 : vector<2x1x16x32xbf16> to vector<2x16x32xbf16>
    %68 = vector.shape_cast %67 : vector<2x16x32xbf16> to vector<32x32xbf16>
    %c2 = arith.constant 2 : index
    %c0_25 = arith.constant 0 : index
    %c0_26 = arith.constant 0 : index
    %69 = vector.load %arg6[%c2, %c0_25, %c0_26] : memref<4x32x128xbf16, #tpu.memory_space<vmem>>, vector<1x32x128xbf16>
    %70 = vector.shape_cast %69 : vector<1x32x128xbf16> to vector<32x128xbf16>
    %cst_27 = arith.constant dense<0.000000e+00> : vector<32x128xf32>
    %71 = tpu.matmul %68, %70, %cst_27 {dimension_numbers = #tpu.dot_dimension_numbers<[1], [0], [0], [1], [0, 0, 1, 1], [], []>} : vector<32x32xbf16>, vector<32x128xbf16>, vector<32x128xf32> -> vector<32x128xf32>
    %72 = arith.addf %65, %71 : vector<32x128xf32>
    %73 = vector.extract_strided_slice %52 {offsets = [0, 3, 0, 0], sizes = [2, 1, 16, 32], strides = [1, 1, 1, 1]} : vector<2x4x16x32xbf16> to vector<2x1x16x32xbf16>
    %74 = vector.shape_cast %73 : vector<2x1x16x32xbf16> to vector<2x16x32xbf16>
    %75 = vector.shape_cast %74 : vector<2x16x32xbf16> to vector<32x32xbf16>
    %c3 = arith.constant 3 : index
    %c0_28 = arith.constant 0 : index
    %c0_29 = arith.constant 0 : index
    %76 = vector.load %arg6[%c3, %c0_28, %c0_29] : memref<4x32x128xbf16, #tpu.memory_space<vmem>>, vector<1x32x128xbf16>
    %77 = vector.shape_cast %76 : vector<1x32x128xbf16> to vector<32x128xbf16>
    %cst_30 = arith.constant dense<0.000000e+00> : vector<32x128xf32>
    %78 = tpu.matmul %75, %77, %cst_30 {dimension_numbers = #tpu.dot_dimension_numbers<[1], [0], [0], [1], [0, 0, 1, 1], [], []>} : vector<32x32xbf16>, vector<32x128xbf16>, vector<32x128xf32> -> vector<32x128xf32>
    %79 = arith.addf %72, %78 : vector<32x128xf32>
    %80 = vector.broadcast %6 : vector<1x128xf32> to vector<32x128xf32>
    %81 = arith.addf %79, %80 : vector<32x128xf32>
    %82 = arith.addf %1, %81 : vector<32x128xf32>
    %cst_31 = arith.constant dense<0.000000e+00> : vector<32xf32>
    %83 = vector.multi_reduction <add>, %82, %cst_31 [1] : vector<32x128xf32> to vector<32xf32>
    %84 = vector.shape_cast %83 : vector<32xf32> to vector<32x1xf32>
    %cst_32 = arith.constant 1.280000e+02 : f32
    %85 = vector.broadcast %cst_32 : f32 to vector<32x1xf32>
    %86 = arith.divf %84, %85 : vector<32x1xf32>
    %87 = vector.broadcast %86 : vector<32x1xf32> to vector<32x128xf32>
    %88 = arith.subf %82, %87 : vector<32x128xf32>
    %89 = arith.mulf %88, %88 : vector<32x128xf32>
    %cst_33 = arith.constant dense<0.000000e+00> : vector<32xf32>
    %90 = vector.multi_reduction <add>, %89, %cst_33 [1] : vector<32x128xf32> to vector<32xf32>
    %91 = vector.shape_cast %90 : vector<32xf32> to vector<32x1xf32>
    %cst_34 = arith.constant 1.280000e+02 : f32
    %92 = vector.broadcast %cst_34 : f32 to vector<32x1xf32>
    %93 = arith.divf %91, %92 : vector<32x1xf32>
    %94 = vector.broadcast %86 : vector<32x1xf32> to vector<32x128xf32>
    %95 = arith.subf %82, %94 : vector<32x128xf32>
    %cst_35 = arith.constant 9.99999974E-6 : f32
    %96 = vector.broadcast %cst_35 : f32 to vector<32x1xf32>
    %97 = arith.addf %93, %96 : vector<32x1xf32>
    %98 = math.rsqrt %97 : vector<32x1xf32>
    %99 = vector.broadcast %98 : vector<32x1xf32> to vector<32x128xf32>
    %100 = arith.mulf %95, %99 : vector<32x128xf32>
    %101 = vector.broadcast %8 : vector<1x128xf32> to vector<32x128xf32>
    %102 = arith.mulf %100, %101 : vector<32x128xf32>
    %103 = vector.broadcast %9 : vector<1x128xf32> to vector<32x128xf32>
    %104 = arith.addf %102, %103 : vector<32x128xf32>
    %105 = arith.truncf %104 : vector<32x128xf32> to vector<32x128xbf16>
    %c0_36 = arith.constant 0 : index
    %c0_37 = arith.constant 0 : index
    %106 = vector.load %arg7[%c0_36, %c0_37] : memref<128x256xbf16, #tpu.memory_space<vmem>>, vector<128x256xbf16>
    %cst_38 = arith.constant dense<0.000000e+00> : vector<32x256xf32>
    %107 = tpu.matmul %105, %106, %cst_38 {dimension_numbers = #tpu.dot_dimension_numbers<[1], [0], [0], [1], [0, 0, 1, 1], [], []>} : vector<32x128xbf16>, vector<128x256xbf16>, vector<32x256xf32> -> vector<32x256xf32>
    %c0_39 = arith.constant 0 : index
    %c0_40 = arith.constant 0 : index
    %108 = vector.load %arg8[%c0_39, %c0_40] : memref<1x256xf32, #tpu.memory_space<vmem>>, vector<1x256xf32>
    %109 = vector.broadcast %108 : vector<1x256xf32> to vector<32x256xf32>
    %110 = arith.addf %107, %109 : vector<32x256xf32>
    %cst_41 = arith.constant 0.000000e+00 : f32
    %111 = vector.broadcast %cst_41 : f32 to vector<32x256xf32>
    %112 = arith.maximumf %110, %111 : vector<32x256xf32>
    %113 = arith.truncf %112 : vector<32x256xf32> to vector<32x256xbf16>
    %c0_42 = arith.constant 0 : index
    %c0_43 = arith.constant 0 : index
    %114 = vector.load %arg9[%c0_42, %c0_43] : memref<256x128xbf16, #tpu.memory_space<vmem>>, vector<256x128xbf16>
    %cst_44 = arith.constant dense<0.000000e+00> : vector<32x128xf32>
    %115 = tpu.matmul %113, %114, %cst_44 {dimension_numbers = #tpu.dot_dimension_numbers<[1], [0], [0], [1], [0, 0, 1, 1], [], []>} : vector<32x256xbf16>, vector<256x128xbf16>, vector<32x128xf32> -> vector<32x128xf32>
    %116 = vector.broadcast %7 : vector<1x128xf32> to vector<32x128xf32>
    %117 = arith.addf %115, %116 : vector<32x128xf32>
    %118 = arith.addf %104, %117 : vector<32x128xf32>
    %cst_45 = arith.constant dense<0.000000e+00> : vector<32xf32>
    %119 = vector.multi_reduction <add>, %118, %cst_45 [1] : vector<32x128xf32> to vector<32xf32>
    %120 = vector.shape_cast %119 : vector<32xf32> to vector<32x1xf32>
    %cst_46 = arith.constant 1.280000e+02 : f32
    %121 = vector.broadcast %cst_46 : f32 to vector<32x1xf32>
    %122 = arith.divf %120, %121 : vector<32x1xf32>
    %123 = vector.broadcast %122 : vector<32x1xf32> to vector<32x128xf32>
    %124 = arith.subf %118, %123 : vector<32x128xf32>
    %125 = arith.mulf %124, %124 : vector<32x128xf32>
    %cst_47 = arith.constant dense<0.000000e+00> : vector<32xf32>
    %126 = vector.multi_reduction <add>, %125, %cst_47 [1] : vector<32x128xf32> to vector<32xf32>
    %127 = vector.shape_cast %126 : vector<32xf32> to vector<32x1xf32>
    %cst_48 = arith.constant 1.280000e+02 : f32
    %128 = vector.broadcast %cst_48 : f32 to vector<32x1xf32>
    %129 = arith.divf %127, %128 : vector<32x1xf32>
    %130 = vector.broadcast %122 : vector<32x1xf32> to vector<32x128xf32>
    %131 = arith.subf %118, %130 : vector<32x128xf32>
    %cst_49 = arith.constant 9.99999974E-6 : f32
    %132 = vector.broadcast %cst_49 : f32 to vector<32x1xf32>
    %133 = arith.addf %129, %132 : vector<32x1xf32>
    %134 = math.rsqrt %133 : vector<32x1xf32>
    %135 = vector.broadcast %134 : vector<32x1xf32> to vector<32x128xf32>
    %136 = arith.mulf %131, %135 : vector<32x128xf32>
    %137 = vector.broadcast %10 : vector<1x128xf32> to vector<32x128xf32>
    %138 = arith.mulf %136, %137 : vector<32x128xf32>
    %139 = vector.broadcast %11 : vector<1x128xf32> to vector<32x128xf32>
    %140 = arith.addf %138, %139 : vector<32x128xf32>
    %141 = vector.shape_cast %140 : vector<32x128xf32> to vector<2x16x128xf32>
    %c0_50 = arith.constant 0 : index
    %c0_51 = arith.constant 0 : index
    %c0_52 = arith.constant 0 : index
    %142 = vector.load %arg11[%c0_50, %c0_51, %c0_52] : memref<2x16x128xf32, #tpu.memory_space<vmem>>, vector<2x16x128xf32>
    tpu.vector_store %arg11[%c0_50, %c0_51, %c0_52], %141 {strides = array<i32>} : memref<2x16x128xf32, #tpu.memory_space<vmem>>, vector<2x16x128xf32>,
    return
  }
  func.func @transform_0(%arg0: i32) -> (i32, i32, i32) {
    %c0_i32 = arith.constant 0 : i32
    %c0_i32_0 = arith.constant 0 : i32
    %c0_i32_1 = arith.constant 0 : i32
    return %arg0, %c0_i32, %c0_i32_0 : i32, i32, i32
  }
  func.func @transform_1(%arg0: i32) -> (i32, i32, i32) {
    %c0_i32 = arith.constant 0 : i32
    %c0_i32_0 = arith.constant 0 : i32
    %c0_i32_1 = arith.constant 0 : i32
    return %arg0, %c0_i32, %c0_i32_0 : i32, i32, i32
  }
  func.func @transform_2(%arg0: i32) -> (i32, i32) {
    %c0_i32 = arith.constant 0 : i32
    %c0_i32_0 = arith.constant 0 : i32
    %c0_i32_1 = arith.constant 0 : i32
    return %c0_i32, %c0_i32_0 : i32, i32
  }
  func.func @transform_3(%arg0: i32) -> (i32, i32) {
    %c0_i32 = arith.constant 0 : i32
    %c0_i32_0 = arith.constant 0 : i32
    %c0_i32_1 = arith.constant 0 : i32
    return %c0_i32, %c0_i32_0 : i32, i32
  }
  func.func @transform_4(%arg0: i32) -> (i32, i32) {
    %c0_i32 = arith.constant 0 : i32
    %c0_i32_0 = arith.constant 0 : i32
    %c0_i32_1 = arith.constant 0 : i32
    return %c0_i32, %c0_i32_0 : i32, i32
  }
  func.func @transform_5(%arg0: i32) -> (i32, i32, i32) {
    %c0_i32 = arith.constant 0 : i32
    %c0_i32_0 = arith.constant 0 : i32
    %c0_i32_1 = arith.constant 0 : i32
    %c0_i32_2 = arith.constant 0 : i32
    return %c0_i32, %c0_i32_0, %c0_i32_1 : i32, i32, i32
  }
  func.func @transform_6(%arg0: i32) -> (i32, i32) {
    %c0_i32 = arith.constant 0 : i32
    %c0_i32_0 = arith.constant 0 : i32
    %c0_i32_1 = arith.constant 0 : i32
    return %c0_i32, %c0_i32_0 : i32, i32
  }
  func.func @transform_7(%arg0: i32) -> (i32, i32) {
    %c0_i32 = arith.constant 0 : i32
    %c0_i32_0 = arith.constant 0 : i32
    %c0_i32_1 = arith.constant 0 : i32
    return %c0_i32, %c0_i32_0 : i32, i32
  }
  func.func @transform_8(%arg0: i32) -> (i32, i32) {
    %c0_i32 = arith.constant 0 : i32
    %c0_i32_0 = arith.constant 0 : i32
    %c0_i32_1 = arith.constant 0 : i32
    return %c0_i32, %c0_i32_0 : i32, i32
  }
  func.func @transform_9(%arg0: i32) -> (i32, i32) {
    %c0_i32 = arith.constant 0 : i32
    %c0_i32_0 = arith.constant 0 : i32
    %c0_i32_1 = arith.constant 0 : i32
    return %c0_i32, %c0_i32_0 : i32, i32
  }
  func.func @transform_10(%arg0: i32) -> (i32, i32, i32) {
    %c0_i32 = arith.constant 0 : i32
    %c0_i32_0 = arith.constant 0 : i32
    %c0_i32_1 = arith.constant 0 : i32
    return %arg0, %c0_i32, %c0_i32_0 : i32, i32, i32
  }
}

</mosaic_0001>

<bundles_post_ra>
// kernel: run.1
= control target key start
LH: loop header
LB: loop body
LE: loop exit
PB: predicated region body
PF: predicated region fallthrough
CT: control target
= control target key end

     0   :  { %15 = vsyncpa [#allocation3], 0  ;;  %s6048_s0 = inlined_call_operand.hbm [shape: f32[2,16,128], index: 0, kind: input, shape index: {}]   ;;  %s6049_s1 = inlined_call_operand.hbm [shape: f32[2,16,128], index: 1, kind: input, shape index: {}]   ;;  %s6050_s2 = inlined_call_operand.hbm [shape: bf16[128,256], index: 2, kind: input, shape index: {}]   ;;  %s6051_s3 = inlined_call_operand.vmem [shape: f32[1,256], index: 3, kind: input, shape index: {}]   ;;  %s6052_s4 = inlined_call_operand.hbm [shape: bf16[128,128], index: 4, kind: input, shape index: {}]   ;;  %s6053_s5 = inlined_call_operand.hbm [shape: bf16[4,32,128], index: 5, kind: input, shape index: {}]   ;;  %s6054_s6 = inlined_call_operand.hbm [shape: bf16[128,256], index: 6, kind: input, shape index: {}]   ;;  %s6055_s7 = inlined_call_operand.hbm [shape: f32[1,256], index: 7, kind: input, shape index: {}]   ;;  %s6056_s8 = inlined_call_operand.hbm [shape: bf16[256,128], index: 8, kind: input, shape index: {}]   ;;  %s6057_s9 = inlined_call_operand.hbm [shape: f32[8,128], index: 9, kind: input, shape index: {}]   ;;  %s6058_s10 = inlined_call_operand.hbm [shape: f32[2,16,128], index: 10, kind: output, shape index: {}]  }
   0x1   :  { %16 = vsyncpa [#allocation6], 0 }
   0x2   :  { %17 = vsyncpa [#allocation9], 0 }
   0x3   :  { %18 = vsyncpa [#allocation12], 0 }
   0x4   :  { %19 = vsyncpa [#allocation15], 0 }
   0x5   :  { %20 = vsyncpa [#allocation4], 0  ;;  %s38_s15 = sshll.u32 %s6049_s1, 4  ;;  %s4340_s16 = smov [#allocation5]   ;;  %s39_s15 = int_to_ptr.hbm [resolvable:$true] %s38_s15 }
   0x6   :  { %s40_s17 = sshll.u32 %s4340_s16, 4  ;;  %s66_s20 = sshll.u32 %s6052_s4, 4  ;;  %s41_s17 = int_to_ptr.vmem [resolvable:$true] %s40_s17  ;;  %s67_s20 = int_to_ptr.hbm [resolvable:$true] %s66_s20 }
   0x7   :  { %s4341_s21 = smov 128   ;;  %s4342_s22 = smov 8  }
   0x8   :  { %46 = dma.hbm_to_vmem [thread:$0]  %s39_s15, 512, %s41_s17, [#allocation6], %s4341_s21, %s4341_s21, %s4342_s22  }
   0x9   :  { %s4343_s23 = smov [#allocation8]   ;;  %s4344_s25 = smov 64  }
   0xa   :  { %s68_s24 = sshll.u32 %s4343_s23, 4  ;;  %s4345_s1 = smov 4   ;;  %s69_s24 = int_to_ptr.vmem [resolvable:$true] %s68_s24 }
   0xb   :  { %74 = dma.hbm_to_vmem [thread:$0]  %s67_s20, 1024, %s69_s24, [#allocation9], %s4344_s25, %s4344_s25, %s4345_s1  }
   0xc   :  { %s92_s4 = sshll.u32 %s6054_s6, 4  ;;  %s4346_s28 = smov [#allocation11]   ;;  %s93_s4 = int_to_ptr.hbm [resolvable:$true] %s92_s4 }
   0xd   :  { %s94_s29 = sshll.u32 %s4346_s28, 4  ;;  %s116_s12 = sshll.u32 %s6056_s8, 4  ;;  %s95_s29 = int_to_ptr.vmem [resolvable:$true] %s94_s29  ;;  %s117_s12 = int_to_ptr.hbm [resolvable:$true] %s116_s12 }
   0xe   :  { %100 = dma.hbm_to_vmem [thread:$0]  %s93_s4, 2048, %s95_s29, [#allocation12], %s4341_s21, %s4341_s21, %s4342_s22  }
   0xf   :  { %s4347_s13 = smov [#allocation14]   ;;  %s25_s17 = sshll.u32 %s6048_s0, 4  ;;  %s26_s17 = int_to_ptr.hbm [resolvable:$true] %s25_s17 }
  0x10   :  { %s118_s14 = sshll.u32 %s4347_s13, 4  ;;  %s51_s8 = sshll.u32 %s6050_s2, 4  ;;  %s119_s14 = int_to_ptr.vmem [resolvable:$true] %s118_s14  ;;  %s52_s8 = int_to_ptr.hbm [resolvable:$true] %s51_s8 }
  0x11   :  { %124 = dma.hbm_to_vmem [thread:$0]  %s117_s12, 2048, %s119_s14, [#allocation15], %s4344_s25, %s4344_s25, %s4345_s1  }
  0x12   :  { %s4348_s19 = smov [#allocation2]   ;;  %s4349_s23 = smov [#allocation7]  }
  0x13   :  { %s27_s20 = sshll.u32 %s4348_s19, 4  ;;  %s53_s0 = sshll.u32 %s4349_s23, 4  ;;  %s28_s20 = int_to_ptr.vmem [resolvable:$true] %s27_s20  ;;  %s54_s0 = int_to_ptr.vmem [resolvable:$true] %s53_s0 }
  0x14   :  { %33 = dma.hbm_to_vmem [thread:$0]  %s26_s17, 512, %s28_s20, [#allocation3], %s4341_s21, %s4341_s21, %s4342_s22  }
  0x15   :  { %s79_s27 = sshll.u32 %s6053_s5, 4  ;;  %s106_s28 = sshll.u32 %s6055_s7, 4  ;;  %s80_s27 = int_to_ptr.hbm [resolvable:$true] %s79_s27  ;;  %s107_s28 = int_to_ptr.hbm [resolvable:$true] %s106_s28 }
  0x16   :  { %59 = dma.hbm_to_vmem [thread:$0]  %s52_s8, 2048, %s54_s0, [#allocation6], %s4341_s21, %s4341_s21, %s4342_s22  }
  0x17   :  { %s4350_s29 = smov [#allocation10]   ;;  %s4351_s11 = smov [#allocation13]  }
  0x18   :  { %s81_s30 = sshll.u32 %s4350_s29, 4  ;;  %s108_s5 = sshll.u32 %s4351_s11, 4  ;;  %s82_s30 = int_to_ptr.vmem [resolvable:$true] %s81_s30  ;;  %s109_s5 = int_to_ptr.vmem [resolvable:$true] %s108_s5 }
  0x19   :  { %87 = dma.hbm_to_vmem [thread:$0]  %s80_s27, 1024, %s82_s30, [#allocation9], %s4344_s25, %s4344_s25, %s4345_s1  }
  0x1a   :  { %s130_s14 = sshll.u32 %s6057_s9, 4  ;;  %s4352_s15 = smov [#allocation16]   ;;  %s131_s14 = int_to_ptr.hbm [resolvable:$true] %s130_s14 }
  0x1b   :  { %111 = dma.hbm_to_vmem [thread:$0]  %s107_s28, 32, %s109_s5, [#allocation12]  }
  0x1c   :  { %s132_s16 = sshll.u32 %s4352_s15, 4  ;;  %s133_s16 = int_to_ptr.vmem [resolvable:$true] %s132_s16 }
  0x1d   :  { %135 = dma.hbm_to_vmem [thread:$0]  %s131_s14, 128, %s133_s16, [#allocation15]  }
  0x1e   :  { %4328 = dma.done.wait [#allocation3], 512  }
  0x1f   :  { %4329 = vsyncadd [#allocation3], 4294966784 }
  0x20   :  { %4330 = dma.done.wait [#allocation6], 2560  }
  0x21   :  { %4331 = vsyncadd [#allocation6], 4294964736 }
  0x22   :  { %4332 = dma.done.wait [#allocation9], 2048  }
  0x23   :  { %4333 = vsyncadd [#allocation9], 4294965248 }
  0x24   :  { %4334 = dma.done.wait [#allocation12], 2080  }
  0x25   :  { %4335 = vsyncadd [#allocation12], 4294965216 }
  0x26   :  { %4336 = dma.done.wait [#allocation15], 2176  }
  0x27   :  { %4337 = vsyncadd [#allocation15], 4294965120  ;;  %v3606_v0 = vld [vmem:[#allocation7 + $0x70] sm:$0xf]  ;;  %v3843_v1 = vld [vmem:[#allocation7 + $0x74] sm:$0xf0] }
  0x28   :  { %v3842_v2 = vld [vmem:[#allocation7 + $0x74] sm:$0xf]  ;;  %v3607_v3 = vor.u32 %v3843_v1, %v3606_v0  ;;  %v3608_v4 = vld [vmem:[#allocation7 + $0x78] sm:$0xf0]  ;;  %v3598_v5 = vld [vmem:[#allocation7 + $0x60] sm:$0xf] }
  0x29   :  { %v3841_v6 = vld [vmem:[#allocation7 + $0x64] sm:$0xf0]  ;;  %v3611_v7 = vor.u32 %v3842_v2, %v3608_v4  ;;  %v3840_v8 = vld [vmem:[#allocation7 + $0x64] sm:$0xf]  ;;  %v3600_v9 = vld [vmem:[#allocation7 + $0x68] sm:$0xf0] }
  0x2a   :  { %290 = vmatpush.bf16.msra.mxu0 %v3607_v3  ;;  %v3599_v10 = vor.u32 %v3841_v6, %v3598_v5  ;;  %v3603_v11 = vor.u32 %v3840_v8, %v3600_v9  ;;  %v3590_v12 = vld [vmem:[#allocation7 + $0x50] sm:$0xf]  ;;  %v3839_v13 = vld [vmem:[#allocation7 + $0x54] sm:$0xf0]  ;;  %v3838_v14 = vld [vmem:[#allocation7 + $0x54] sm:$0xf] }
  0x2b   :  { %309 = vmatpush.bf16.msra.mxu1 %v3611_v7  ;;  %v3592_v15 = vld [vmem:[#allocation7 + $0x58] sm:$0xf0]  ;;  %v3591_v16 = vor.u32 %v3839_v13, %v3590_v12  ;;  %v3582_v18 = vld [vmem:[#allocation7 + $0x40] sm:$0xf]  ;;  %v3837_v19 = vld [vmem:[#allocation7 + $0x44] sm:$0xf0] }
  0x2c   :  { %v3595_v17 = vor.u32 %v3838_v14, %v3592_v15  ;;  %v3836_v20 = vld [vmem:[#allocation7 + $0x44] sm:$0xf]  ;;  %v3584_v21 = vld [vmem:[#allocation7 + $0x48] sm:$0xf0]  ;;  %v3583_v22 = vor.u32 %v3837_v19, %v3582_v18  ;;  %v3574_v24 = vld [vmem:[#allocation7 + $0x30] sm:$0xf] }
  0x2d   :  { %v3587_v23 = vor.u32 %v3836_v20, %v3584_v21  ;;  %v3835_v25 = vld [vmem:[#allocation7 + $0x34] sm:$0xf0]  ;;  %v3834_v26 = vld [vmem:[#allocation7 + $0x34] sm:$0xf]  ;;  %v3576_v27 = vld [vmem:[#allocation7 + $0x38] sm:$0xf0] }
  0x2e   :  { %291 = vmatpush.bf16.msra.mxu0 %v3599_v10  ;;  %v3575_v28 = vor.u32 %v3835_v25, %v3574_v24  ;;  %v3579_v29 = vor.u32 %v3834_v26, %v3576_v27  ;;  %v3566_v30 = vld [vmem:[#allocation7 + $0x20] sm:$0xf]  ;;  %v3833_v31 = vld [vmem:[#allocation7 + $0x24] sm:$0xf0]  ;;  %v3832_v32 = vld [vmem:[#allocation7 + $0x24] sm:$0xf] }
  0x2f   :  { %310 = vmatpush.bf16.msra.mxu1 %v3603_v11  ;;  %v3568_v33 = vld [vmem:[#allocation7 + $0x28] sm:$0xf0]  ;;  %v3567_v34 = vor.u32 %v3833_v31, %v3566_v30  ;;  %v3851_v35 = vld [vmem:[#allocation8 + $0x38] sm:$0xff]  ;;  %v3558_v37 = vld [vmem:[#allocation7 + $0x10] sm:$0xf]  ;;  %s4353_s1 = smov 32  }
  0x30   :  { %v3571_v36 = vor.u32 %v3832_v32, %v3568_v33  ;;  %v3831_v38 = vld [vmem:[#allocation7 + $0x14] sm:$0xf0]  ;;  %v3830_v39 = vld [vmem:[#allocation7 + $0x14] sm:$0xf]  ;;  %v3560_v40 = vld [vmem:[#allocation7 + $0x18] sm:$0xf0]  ;;  %395 = vmatpush.bf16.msra.mxu2 %v3851_v35 }
  0x31   :  { %v3850_v41 = vld [vmem:[#allocation8 + $0x30] sm:$0xff]  ;;  %v173_v42 = vld [vmem:[#allocation2] sm:$0xff]  ;;  %v3559_v43 = vor.u32 %v3831_v38, %v3558_v37  ;;  %v174_v44 = vld [vmem:[#allocation2 + $0x8] sm:$0xff]  ;;  %v3563_v47 = vor.u32 %v3830_v39, %v3560_v40  ;;  %v4355_v32 = vmov 1983009808   ;;  %vm455_vm0 = vcmask 1047556  }
  0x32   :  { %292 = vmatpush.bf16.msra.mxu0 %v3591_v16  ;;  %v177_v45 = vld [vmem:[#allocation5] sm:$0xff]  ;;  %v178_v46 = vld [vmem:[#allocation5 + $0x8] sm:$0xff]  ;;  %v3847_v59 = vld [vmem:[#allocation8 + $0x18] sm:$0xff]  ;;  %v328_v6 = vpack.c.bf16 %v174_v44, %v173_v42  ;;  %v460_v33 = vunpack.c.l.s4 %v4355_v32  ;;  %vm1913_vm1 = vcmask 261120   ;;  %vm2144_vm2 = vcmask 130048   ;;  %s3531_s8 = sshll.u32 %s6058_s10, 4  ;;  %s3532_s8 = int_to_ptr.hbm [resolvable:$true] %s3531_s8 }
  0x33   :  { %311 = vmatpush.bf16.msra.mxu1 %v3595_v17  ;;  %v3550_v48 = vld [vmem:[#allocation7] sm:$0xf]  ;;  %v3829_v49 = vld [vmem:[#allocation7 + $0x4] sm:$0xf0]  ;;  %v3828_v50 = vld [vmem:[#allocation7 + $0x4] sm:$0xf]  ;;  %v182_v53 = vadd.f32 %v177_v45, %v173_v42  ;;  %v183_v54 = vadd.f32 %v178_v46, %v174_v44 }
  0x34   :  { %v3552_v51 = vld [vmem:[#allocation7 + $0x8] sm:$0xf0]  ;;  %396 = vmatpush.bf16.msra.mxu2 %v3850_v41  ;;  %v3551_v55 = vor.u32 %v3829_v49, %v3550_v48  ;;  %v3848_v57 = vld [vmem:[#allocation8 + $0x20] sm:$0xff]  ;;  %v4462_v60 = vld [vmem:[#allocation2 + $0x10] sm:$0xff]  ;;  %v4503_v37 = vunpack.c.0.s8 %v460_v33  ;;  %v4356_v45 = vmov 1934713408  }
  0x35   :  { %v3849_v52 = vld [vmem:[#allocation8 + $0x28] sm:$0xff]  ;;  %v3555_v56 = vor.u32 %v3828_v50, %v3552_v51  ;;  %v186_v58 = vpack.c.bf16 %v183_v54, %v182_v53  ;;  %v4464_v61 = vld [vmem:[#allocation2 + $0x18] sm:$0xff]  ;;  %v179_v62 = vld [vmem:[#allocation5 + $0x10] sm:$0xff]  ;;  %v484_v46 = vunpack.c.l.s4 %v4356_v45 }
  0x36   :  { %293 = vmatpush.bf16.msra.mxu0 %v3583_v22  ;;  %v180_v63 = vld [vmem:[#allocation5 + $0x18] sm:$0xff]  ;;  %v184_v0 = vadd.f32 %v179_v62, %v4462_v60  ;;  %v3846_v3 = vld [vmem:[#allocation8 + $0x10] sm:$0xff]  ;;  %v3845_v4 = vld [vmem:[#allocation8 + $0x8] sm:$0xff] }
  0x37   :  { %312 = vmatpush.bf16.msra.mxu1 %v3587_v23  ;;  %v185_v1 = vadd.f32 %v180_v63, %v4464_v61  ;;  %v3844_v5 = vld [vmem:[#allocation8] sm:$0xff]  ;;  %v4526_v62 = vunpack.c.0.s8 %v484_v46 }
  0x38   :  { %397 = vmatpush.bf16.msra.mxu2 %v3849_v52  ;;  %v204_v9 = vld [vmem:[%s6051_s3] sm:$0x3]  ;;  %s4354_s3 = smov 96  }
  0x39   :  { %v187_v2 = vpack.c.bf16 %v185_v1, %v184_v0  ;;  %v206_v10 = vperm.slane %v204_v9, 0  ;;  %v207_v11 = vperm.slane %v204_v9, 1 }
  0x3a   :  { %294 = vmatpush.bf16.msra.mxu0 %v3575_v28 }
  0x3b   :  { %313 = vmatpush.bf16.msra.mxu1 %v3579_v29 }
  0x3c   :  { %398 = vmatpush.bf16.msra.mxu2 %v3848_v57 }
  0x3e   :  { %295 = vmatpush.bf16.msra.mxu0 %v3567_v34 }
  0x3f   :  { %314 = vmatpush.bf16.msra.mxu1 %v3571_v36 }
  0x40   :  { %399 = vmatpush.bf16.msra.mxu2 %v3847_v59 }
  0x42   :  { %296 = vmatpush.bf16.msra.mxu0 %v3559_v43 }
  0x43   :  { %315 = vmatpush.bf16.msra.mxu1 %v3563_v47 }
  0x44   :  { %400 = vmatpush.bf16.msra.mxu2 %v3846_v3 }
  0x46   :  { %297 = vmatpush.bf16.msra.mxu0 %v3551_v55 }
  0x47   :  { %316 = vmatpush.bf16.msra.mxu1 %v3555_v56 }
  0x48   :  { %401 = vmatpush.bf16.msra.mxu2 %v3845_v4  ;;  %v181_v4 = vld [vmem:[#allocation16] sm:$0xff] }
  0x49   :  { %298 = vmatmul.bf16.vlgmr.msra.gmra.mxu0 %v186_v58 }
  0x4a   :  { %317 = vmatmul.bf16.vlgmr.msra.gmra.mxu1 %v186_v58 }
  0x4c   :  { %402 = vmatpush.bf16.msra.mxu2 %v3844_v5 }
  0x4f   :  { %403 = vmatmul.bf16.vlgmr.msra.gmra.mxu2 %v328_v6 }
  0x59   :  { %303 = vmatmul.bf16.gmra.mxu0 %v187_v2 }
  0x5a   :  { %322 = vmatmul.bf16.gmra.mxu1 %v187_v2 }
  0xc6   :  { %v299_v7 = vpop.f32.mrf.mxu0 }
  0xc7   :  { %v318_v8 = vpop.f32.mrf.mxu1  ;;  %v300_v12 = vadd.f32 %v299_v7, %v206_v10 }
  0xc8   :  { %v4471_v16 = vadd.f32 %v318_v8, %v207_v11 }
  0xc9   :  { %v457_v41 = vrot.slane %v300_v12, 4 }
  0xca   :  { %v953_v50 = vrot.slane %v4471_v16, 4 }
  0xce   :  { %v301_v13 = vpop.f32.mrf.mxu0 }
  0xcf   :  { %v302_v14 = vadd.f32 %v301_v13, %v206_v10  ;;  %v320_v15 = vpop.f32.mrf.mxu1 }
  0xd0   :  { %v4473_v17 = vadd.f32 %v320_v15, %v207_v11 }
  0xd1   :  { %v3931_v18 = vpack.i.bf16 %v302_v14, %v300_v12  ;;  %v513_v35 = vrot.slane %v302_v14, 4 }
  0xd2   :  { %v3921_v19 = vpack.i.bf16 %v4473_v17, %v4471_v16  ;;  %v1009_v49 = vrot.slane %v4473_v17, 4  ;;  %v404_v52 = vpop.f32.mrf.mxu2 }
  0xd3   :  { %3932 = vrot.lane.b32.xlu2 %v3931_v18, %s4344_s25 }
  0xd4   :  { %3922 = vrot.lane.b32.xlu1 %v3921_v19, %s4353_s1  ;;  %3912 = vrot.lane.b32.xlu0 %v3921_v19, %s4354_s3 }
  0xd6   :  { %v304_v21 = vpop.f32.mrf.mxu0 }
  0xd7   :  { %v323_v20 = vpop.f32.mrf.mxu1  ;;  %v4489_v27 = vadd.f32 %v304_v21, %v206_v10 }
  0xd8   :  { %v4483_v22 = vadd.f32 %v323_v20, %v207_v11 }
  0xda   :  { %v1065_v53 = vrot.slane %v4483_v22, 4 }
  0xdb   :  { %3937 = vrot.lane.b32.xlu2 %v3931_v18, %s4353_s1 }
  0xdc   :  { %3917 = vrot.lane.b32.xlu0 %v3921_v19, %s4344_s25  ;;  %3927 = vrot.lane.b32.xlu1 %v3931_v18, %s4354_s3  ;;  %v4539_v18 = vperm.slane %v181_v4, 0 }
  0xde   :  { %v306_v25 = vpop.f32.mrf.mxu0  ;;  %6070 = vst [vmem:[#allocation24_spill] sm:$0xff] %v4539_v18  ;;  %v4568_v45 = vadd.f32 %v404_v52, %v4539_v18 }
  0xdf   :  { %v325_v23 = vpop.f32.mrf.mxu1  ;;  %v4493_v28 = vadd.f32 %v306_v25, %v206_v10 }
  0xe0   :  { %v4485_v24 = vadd.f32 %v325_v23, %v207_v11  ;;  %6071 = vst [vmem:[#allocation25_spill] sm:$0xff] %v4568_v45 }
  0xe1   :  { %v3956_v29 = vpack.i.bf16 %v4493_v28, %v4489_v27 }
  0xe2   :  { %v3941_v26 = vpack.i.bf16 %v4485_v24, %v4483_v22  ;;  %v1121_v54 = vrot.slane %v4485_v24, 4 }
  0xe4   :  { %3942 = vrot.lane.b32.xlu0 %v3941_v26, %s4354_s3  ;;  %3952 = vrot.lane.b32.xlu2 %v3941_v26, %s4353_s1 }
  0xe5   :  { %3947 = vrot.lane.b32.xlu1 %v3941_v26, %s4344_s25 }
  0xec   :  { %3957 = vrot.lane.b32.xlu0 %v3956_v29, %s4354_s3  ;;  %3967 = vrot.lane.b32.xlu2 %v3956_v29, %s4353_s1 }
  0xed   :  { %3962 = vrot.lane.b32.xlu1 %v3956_v29, %s4344_s25 }
 0x12d   :  { %v3933_v30 = vpop.permute.xlu2 %3932 }
 0x12e   :  { %v3935_v34 = vunpack.i.h.bf16 %v3933_v30  ;;  %v3934_v36 = vunpack.i.l.bf16 %v3933_v30 }
 0x130   :  { %v511_v39 = vrot.slane %v3935_v34, 4  ;;  %v514_v40 = vsel %vm455_vm0, %v3935_v34, %v513_v35  ;;  %v454_v42 = vrot.slane %v3934_v36, 4  ;;  %v458_v43 = vsel %vm455_vm0, %v3934_v36, %v457_v41 }
 0x131   :  { %v4510_v44 = vperm.slane %v514_v40, %v4503_v37  ;;  %v4514_v48 = vperm.slane %v458_v43, %v4503_v37 }
 0x132   :  { %v512_v47 = vsel %vm455_vm0, %v511_v39, %v302_v14  ;;  %v456_v51 = vsel %vm455_vm0, %v454_v42, %v300_v12 }
 0x133   :  { %v4523_v56 = vperm.slane %v512_v47, %v4503_v37  ;;  %v549_v57 = vrot.slane %v4510_v44, 4  ;;  %v4532_v6 = vperm.slane %v456_v51, %v4503_v37  ;;  %v493_v7 = vrot.slane %v4514_v48, 4 }
 0x135   :  { %v4501_v31 = vpop.permute.xlu2 %3937  ;;  %v537_v33 = vrot.slane %v4523_v56, 4  ;;  %v481_v34 = vrot.slane %v4532_v6, 4 }
 0x136   :  { %v3940_v8 = vunpack.i.h.bf16 %v4501_v31  ;;  %v3939_v9 = vunpack.i.l.bf16 %v4501_v31 }
 0x138   :  { %v523_v35 = vrot.slane %v3940_v8, 4  ;;  %v467_v36 = vrot.slane %v3939_v9, 4 }
 0x13e   :  { %v4505_v38 = vpop.permute.xlu2 %3952 }
 0x13f   :  { %v3955_v14 = vunpack.i.h.bf16 %v4505_v38  ;;  %v3954_v15 = vunpack.i.l.bf16 %v4505_v38 }
 0x141   :  { %v4558_v39 = vrot.slane %v3955_v14, 4  ;;  %v4562_v40 = vrot.slane %v3954_v15, 4 }
 0x146   :  { %v3923_v58 = vpop.permute.xlu1 %3922  ;;  %v3913_v59 = vpop.permute.xlu0 %3912 }
 0x147   :  { %v3925_v0 = vunpack.i.h.bf16 %v3923_v58  ;;  %v3924_v1 = vunpack.i.l.bf16 %v3923_v58  ;;  %v3915_v2 = vunpack.i.h.bf16 %v3913_v59  ;;  %v3914_v3 = vunpack.i.l.bf16 %v3913_v59  ;;  %v4529_v5 = vpop.permute.xlu2 %3967 }
 0x148   :  { %v6060_v19 = vunpack.i.h.bf16 %v4529_v5  ;;  %v6059_v32 = vunpack.i.l.bf16 %v4529_v5 }
 0x149   :  { %v1019_v10 = vrot.slane %v3925_v0, 4  ;;  %v963_v11 = vrot.slane %v3924_v1, 4  ;;  %v1021_v12 = vrot.slane %v3915_v2, 4  ;;  %v965_v13 = vrot.slane %v3914_v3, 4 }
 0x14a   :  { %v4573_v58 = vrot.slane %v6060_v19, 4 }
 0x14b   :  { %v1020_v20 = vsel %vm455_vm0, %v1019_v10, %v3915_v2  ;;  %v1022_v21 = vsel %vm455_vm0, %v3925_v0, %v1021_v12  ;;  %v964_v23 = vsel %vm455_vm0, %v963_v11, %v3914_v3  ;;  %v966_v25 = vsel %vm455_vm0, %v3924_v1, %v965_v13  ;;  %v406_v3 = vpop.f32.mrf.mxu2 }
 0x14c   :  { %v1026_v26 = vperm.slane %v1020_v20, %v4503_v37  ;;  %v1030_v29 = vperm.slane %v1022_v21, %v4503_v37  ;;  %v970_v30 = vperm.slane %v964_v23, %v4503_v37  ;;  %v974_v41 = vperm.slane %v966_v25, %v4503_v37 }
 0x14d   :  { %v4577_v2 = vrot.slane %v6059_v32, 4  ;;  %v4589_v55 = vadd.f32 %v406_v3, %v4539_v18 }
 0x14e   :  { %v3918_v42 = vpop.permute.xlu0 %3917  ;;  %v4565_v43 = vpop.permute.xlu1 %3927  ;;  %v1031_v59 = vrot.slane %v1026_v26, 4  ;;  %v1043_v0 = vrot.slane %v1030_v29, 4  ;;  %v975_v1 = vrot.slane %v970_v30, 4  ;;  %v987_v12 = vrot.slane %v974_v41, 4 }
 0x14f   :  { %v3920_v46 = vunpack.i.h.bf16 %v3918_v42  ;;  %v3919_v47 = vunpack.i.l.bf16 %v3918_v42  ;;  %v3930_v51 = vunpack.i.h.bf16 %v4565_v43  ;;  %v3929_v21 = vunpack.i.l.bf16 %v4565_v43  ;;  %6072 = vst [vmem:[#allocation26_spill] sm:$0xff] %v4589_v55 }
 0x151   :  { %v1007_v4 = vrot.slane %v3920_v46, 4  ;;  %v1010_v52 = vsel %vm455_vm0, %v3920_v46, %v1009_v49  ;;  %v951_v10 = vrot.slane %v3919_v47, 4  ;;  %v954_v11 = vsel %vm455_vm0, %v3919_v47, %v953_v50 }
 0x152   :  { %v1018_v13 = vperm.slane %v1010_v52, %v4503_v37  ;;  %v962_v20 = vperm.slane %v954_v11, %v4503_v37  ;;  %v525_v42 = vrot.slane %v3930_v51, 4 }
 0x153   :  { %v1008_v23 = vsel %vm455_vm0, %v1007_v4, %v4473_v17  ;;  %v952_v25 = vsel %vm455_vm0, %v951_v10, %v4471_v16  ;;  %v524_v17 = vsel %vm455_vm0, %v523_v35, %v3930_v51 }
 0x154   :  { %v1014_v49 = vperm.slane %v1008_v23, %v4503_v37  ;;  %v1045_v50 = vrot.slane %v1018_v13, 4  ;;  %v958_v46 = vperm.slane %v952_v25, %v4503_v37  ;;  %v988_v47 = vsel %vm455_vm0, %v987_v12, %v962_v20 }
 0x155   :  { %v989_v52 = vrot.slane %v962_v20, 4  ;;  %v994_v43 = vperm.slane %v988_v47, %v4526_v62  ;;  %v1044_v11 = vsel %vm455_vm0, %v1043_v0, %v1018_v13  ;;  %v526_v0 = vsel %vm455_vm0, %v3940_v8, %v525_v42 }
 0x156   :  { %v1033_v4 = vrot.slane %v1014_v49, 4  ;;  %v976_v16 = vsel %vm455_vm0, %v975_v1, %v958_v46  ;;  %v977_v10 = vrot.slane %v958_v46, 4  ;;  %v1032_v3 = vsel %vm455_vm0, %v1031_v59, %v1014_v49 }
 0x157   :  { %v4600_v23 = vperm.slane %v976_v16, %v4526_v62  ;;  %v990_v25 = vsel %vm455_vm0, %v974_v41, %v989_v52  ;;  %v4604_v12 = vperm.slane %v1032_v3, %v4526_v62  ;;  %v1046_v59 = vsel %vm455_vm0, %v1030_v29, %v1045_v50 }
 0x158   :  { %v978_v35 = vsel %vm455_vm0, %v970_v30, %v977_v10  ;;  %v998_v51 = vperm.slane %v990_v25, %v4526_v62  ;;  %v1034_v1 = vsel %vm455_vm0, %v1026_v26, %v1033_v4  ;;  %v1003_v41 = vrot.slane %v994_v43, 4 }
 0x159   :  { %v986_v13 = vperm.slane %v978_v35, %v4526_v62  ;;  %v999_v20 = vrot.slane %v4600_v23, 4  ;;  %v1042_v49 = vperm.slane %v1034_v1, %v4526_v62  ;;  %v1050_v47 = vperm.slane %v1044_v11, %v4526_v62 }
 0x15a   :  { %v1005_v46 = vrot.slane %v998_v51, 4  ;;  %v1054_v8 = vperm.slane %v1046_v59, %v4526_v62  ;;  %v1055_v30 = vrot.slane %v4604_v12, 4  ;;  %v530_v26 = vperm.slane %v524_v17, %v4503_v37 }
 0x15b   :  { %v4619_v42 = vrot.slane %v986_v13, 4  ;;  %v4621_v52 = vrot.slane %v1042_v49, 4  ;;  %v468_v29 = vsel %vm455_vm0, %v467_v36, %v3929_v21  ;;  %v1059_v4 = vrot.slane %v1050_v47, 4  ;;  %v3943_v13 = vpop.permute.xlu0 %3942 }
 0x15c   :  { %v1006_v50 = vsel %vm455_vm0, 0.0, %v1005_v46  ;;  %v1061_v16 = vrot.slane %v1054_v8, 4  ;;  %v534_v10 = vperm.slane %v526_v0, %v4503_v37  ;;  %v4628_v11 = vsel %vm455_vm0, 0.0, %v999_v20 }
 0x15d   :  { %v4632_v3 = vsel %vm455_vm0, 0.0, %v4619_v42  ;;  %v1004_v25 = vsel %vm455_vm0, 0.0, %v1003_v41  ;;  %v4637_v17 = vsel %vm455_vm0, 0.0, %v4621_v52  ;;  %v4640_v36 = vsel %vm455_vm0, 0.0, %v1055_v30 }
 0x15e   :  { %v1062_v35 = vsel %vm455_vm0, 0.0, %v1061_v16  ;;  %v4644_v0 = vsel %vm455_vm0, %v1005_v46, %v994_v43  ;;  %v1191_v51 = vrot.slane %v1006_v50, 4  ;;  %v1060_v1 = vsel %vm455_vm0, 0.0, %v1059_v4 }
 0x15f   :  { %v535_v20 = vrot.slane %v530_v26, 4  ;;  %v538_v41 = vsel %vm455_vm0, %v530_v26, %v537_v33  ;;  %v547_v49 = vrot.slane %v534_v10, 4  ;;  %v550_v8 = vsel %vm455_vm0, %v534_v10, %v549_v57 }
 0x160   :  { %v469_v30 = vrot.slane %v3929_v21, 4  ;;  %v1245_v43 = vrot.slane %v1062_v35, 4  ;;  %v546_v50 = vperm.slane %v538_v41, %v4526_v62  ;;  %v558_v4 = vperm.slane %v550_v8, %v4526_v62 }
 0x161   :  { %v536_v46 = vsel %vm455_vm0, %v535_v20, %v4523_v56  ;;  %v548_v33 = vsel %vm455_vm0, %v547_v49, %v4510_v44  ;;  %v474_v21 = vperm.slane %v468_v29, %v4503_v37  ;;  %v3945_v44 = vunpack.i.h.bf16 %v3943_v13 }
 0x162   :  { %v4660_v59 = vperm.slane %v536_v46, %v4526_v62  ;;  %v470_v57 = vsel %vm455_vm0, %v3939_v9, %v469_v30  ;;  %v4669_v26 = vperm.slane %v548_v33, %v4526_v62  ;;  %v4671_v56 = vrot.slane %v546_v50, 4 }
 0x163   :  { %v4673_v10 = vrot.slane %v558_v4, 4  ;;  %v478_v35 = vperm.slane %v470_v57, %v4503_v37  ;;  %v479_v41 = vrot.slane %v474_v21, 4  ;;  %v482_v31 = vsel %vm455_vm0, %v474_v21, %v481_v34  ;;  %v3958_v32 = vpop.permute.xlu0 %3957 }
 0x164   :  { %v559_v20 = vrot.slane %v4660_v59, 4  ;;  %v4681_v9 = vsel %vm455_vm0, %v1191_v51, %v1004_v25  ;;  %v4684_v29 = vsel %vm455_vm0, %v1061_v16, %v1050_v47  ;;  %v4687_v49 = vsel %vm455_vm0, %v1245_v43, %v1060_v1  ;;  %v3948_v43 = vpop.permute.xlu1 %3947 }
 0x165   :  { %6073 = vst [vmem:[#allocation27_spill] sm:$0xff] %v4673_v10  ;;  %v490_v8 = vperm.slane %v482_v31, %v4526_v62  ;;  %v4692_v30 = vsel %vm455_vm0, 0.0, %v4671_v56  ;;  %v563_v46 = vrot.slane %v4669_v26, 4  ;;  %v4697_v34 = vsel %vm455_vm0, 0.0, %v4673_v10 }
 0x166   :  { %6074 = vst [vmem:[#allocation28_spill] sm:$0xff] %v4697_v34  ;;  %v480_v25 = vsel %vm455_vm0, %v479_v41, %v4532_v6  ;;  %v4702_v47 = vsel %vm455_vm0, 0.0, %v559_v20  ;;  %v491_v51 = vrot.slane %v478_v35, 4  ;;  %v494_v1 = vsel %vm455_vm0, %v478_v35, %v493_v7 }
 0x167   :  { %v4705_v16 = vperm.slane %v480_v25, %v4526_v62  ;;  %v502_v50 = vperm.slane %v494_v1, %v4526_v62  ;;  %v4711_v4 = vrot.slane %v490_v8, 4  ;;  %v1133_v33 = vrot.slane %v3945_v44, 4 }
 0x168   :  { %v3944_v57 = vunpack.i.l.bf16 %v3943_v13  ;;  %v492_v21 = vsel %vm455_vm0, %v491_v51, %v4514_v48  ;;  %v1132_v41 = vsel %vm455_vm0, %v4558_v39, %v3945_v44  ;;  %v3950_v8 = vunpack.i.h.bf16 %v3948_v43 }
 0x169   :  { %v503_v20 = vrot.slane %v4705_v16, 4  ;;  %v4720_v31 = vperm.slane %v492_v21, %v4526_v62  ;;  %v4722_v7 = vrot.slane %v502_v50, 4  ;;  %v4729_v25 = vsel %vm455_vm0, 0.0, %v4711_v4 }
 0x16a   :  { %v1076_v35 = vsel %vm455_vm0, %v4562_v40, %v3944_v57  ;;  %v1077_v48 = vrot.slane %v3944_v57, 4  ;;  %v1134_v40 = vsel %vm455_vm0, %v3955_v14, %v1133_v33  ;;  %v1138_v1 = vperm.slane %v1132_v41, %v4503_v37 }
 0x16b   :  { %v1082_v51 = vperm.slane %v1076_v35, %v4503_v37  ;;  %v507_v39 = vrot.slane %v4720_v31, 4  ;;  %v4735_v44 = vsel %vm455_vm0, 0.0, %v4722_v7  ;;  %v4742_v50 = vsel %vm455_vm0, 0.0, %v563_v46 }
 0x16c   :  { %6075 = vst [vmem:[#allocation29_spill] sm:$0xff] %v4742_v50  ;;  %v4745_v21 = vsel %vm455_vm0, 0.0, %v503_v20  ;;  %v1078_v57 = vsel %vm455_vm0, %v3954_v15, %v1077_v48  ;;  %v1142_v35 = vperm.slane %v1134_v40, %v4503_v37  ;;  %v1119_v33 = vrot.slane %v3950_v8, 4 }
 0x16d   :  { %v1086_v14 = vperm.slane %v1078_v57, %v4503_v37  ;;  %v1143_v41 = vrot.slane %v1138_v1, 4  ;;  %v1122_v46 = vsel %vm455_vm0, %v3950_v8, %v1121_v54  ;;  %v3949_v20 = vunpack.i.l.bf16 %v3948_v43 }
 0x16e   :  { %v1155_v63 = vrot.slane %v1142_v35, 4  ;;  %v4758_v38 = vsel %vm455_vm0, 0.0, %v507_v39  ;;  %v1087_v15 = vrot.slane %v1082_v51, 4  ;;  %v1120_v48 = vsel %vm455_vm0, %v1119_v33, %v4485_v24 }
 0x16f   :  { %v1130_v40 = vperm.slane %v1122_v46, %v4503_v37  ;;  %v1099_v6 = vrot.slane %v1086_v14, 4  ;;  %v1126_v57 = vperm.slane %v1120_v48, %v4503_v37  ;;  %v1063_v13 = vrot.slane %v3949_v20, 4 }
 0x170   :  { %v1066_v19 = vsel %vm455_vm0, %v3949_v20, %v1065_v53  ;;  %v3960_v39 = vunpack.i.h.bf16 %v3958_v32 }
 0x171   :  { %v1156_v54 = vsel %vm455_vm0, %v1155_v63, %v1130_v40  ;;  %v1157_v43 = vrot.slane %v1130_v40, 4  ;;  %v1074_v8 = vperm.slane %v1066_v19, %v4503_v37  ;;  %v1144_v18 = vsel %vm455_vm0, %v1143_v41, %v1126_v57 }
 0x172   :  { %v1145_v34 = vrot.slane %v1126_v57, 4  ;;  %v1162_v24 = vperm.slane %v1156_v54, %v4526_v62  ;;  %v1064_v33 = vsel %vm455_vm0, %v1063_v13, %v4483_v22  ;;  %v4774_v46 = vperm.slane %v1144_v18, %v4526_v62 }
 0x173   :  { %v1158_v48 = vsel %vm455_vm0, %v1142_v35, %v1157_v43  ;;  %v1070_v53 = vperm.slane %v1064_v33, %v4503_v37  ;;  %v3959_v63 = vunpack.i.l.bf16 %v3958_v32  ;;  %v1100_v41 = vsel %vm455_vm0, %v1099_v6, %v1074_v8 }
 0x174   :  { %v1146_v20 = vsel %vm455_vm0, %v1138_v1, %v1145_v34  ;;  %v1166_v19 = vperm.slane %v1158_v48, %v4526_v62  ;;  %v1101_v40 = vrot.slane %v1074_v8, 4  ;;  %v1171_v54 = vrot.slane %v1162_v24, 4 }
 0x175   :  { %v1154_v57 = vperm.slane %v1146_v20, %v4526_v62  ;;  %v1088_v22 = vsel %vm455_vm0, %v1087_v15, %v1070_v53  ;;  %v1089_v13 = vrot.slane %v1070_v53, 4  ;;  %v637_v32 = vrot.slane %v3960_v39, 4 }
 0x176   :  { %v1173_v18 = vrot.slane %v1166_v19, 4  ;;  %v4784_v50 = vperm.slane %v1088_v22, %v4526_v62  ;;  %v1102_v35 = vsel %vm455_vm0, %v1086_v14, %v1101_v40  ;;  %v1106_v6 = vperm.slane %v1100_v41, %v4526_v62 }
 0x177   :  { %v4787_v43 = vrot.slane %v1154_v57, 4  ;;  %v1090_v34 = vsel %vm455_vm0, %v1082_v51, %v1089_v13  ;;  %v1110_v1 = vperm.slane %v1102_v35, %v4526_v62  ;;  %v580_v48 = vsel %vm455_vm0, %v4577_v2, %v3959_v63 }
 0x178   :  { %v4793_v8 = vsel %vm455_vm0, 0.0, %v1173_v18  ;;  %v1348_v15 = vsel %vm455_vm0, %v1173_v18, %v1162_v24  ;;  %v1098_v33 = vperm.slane %v1090_v34, %v4526_v62  ;;  %v4805_v51 = vsel %vm455_vm0, 0.0, %v1171_v54  ;;  %v3963_v18 = vpop.permute.xlu1 %3962 }
 0x179   :  { %v4802_v53 = vsel %vm455_vm0, 0.0, %v4787_v43  ;;  %v1115_v20 = vrot.slane %v1106_v6, 4  ;;  %v1117_v24 = vrot.slane %v1110_v1, 4  ;;  %v581_v40 = vrot.slane %v3959_v63, 4 }
 0x17a   :  { %v4808_v41 = vrot.slane %v1098_v33, 4  ;;  %v4811_v57 = vperm.slane %v1348_v15, %v4503_v37  ;;  %v636_v22 = vsel %vm455_vm0, %v4573_v58, %v3960_v39  ;;  %v6076_v13 = vunpack.i.h.bf16 %v4529_v5 }
 0x17b   :  { %v4825_v63 = vsel %vm455_vm0, 0.0, %v1115_v20  ;;  %v6077_v1 = vunpack.i.l.bf16 %v4529_v5  ;;  %v4831_v58 = vsel %vm455_vm0, 0.0, %v1117_v24  ;;  %v1294_v39 = vsel %vm455_vm0, %v1117_v24, %v1106_v6 }
 0x17c   :  { %v638_v54 = vsel %vm455_vm0, %v6076_v13, %v637_v32  ;;  %v4822_v34 = vsel %vm455_vm0, 0.0, %v4808_v41  ;;  %v586_v32 = vperm.slane %v580_v48, %v4503_v37  ;;  %v642_v2 = vperm.slane %v636_v22, %v4503_v37 }
 0x17d   :  { %v582_v15 = vsel %vm455_vm0, %v6077_v1, %v581_v40  ;;  %v646_v20 = vperm.slane %v638_v54, %v4503_v37  ;;  %v3965_v35 = vunpack.i.h.bf16 %v3963_v18  ;;  %v3964_v5 = vunpack.i.l.bf16 %v3963_v18 }
 0x17e   :  { %v590_v33 = vperm.slane %v582_v15, %v4503_v37  ;;  %v4841_v40 = vpack.i.bf16 %v4589_v55, %v4568_v45  ;;  %v647_v1 = vrot.slane %v642_v2, 4  ;;  %v6079_v48 = vrot.slane %v4493_v28, 4 }
 0x17f   :  { %v659_v19 = vrot.slane %v646_v20, 4  ;;  %v623_v6 = vrot.slane %v3965_v35, 4  ;;  %v567_v13 = vrot.slane %v3964_v5, 4  ;;  %v6080_v22 = vrot.slane %v4489_v27, 4 }
 0x180   :  { %v603_v14 = vrot.slane %v590_v33, 4  ;;  %6078 = vst [vmem:[#allocation30_spill] sm:$0xff] %v4841_v40  ;;  %v626_v24 = vsel %vm455_vm0, %v3965_v35, %v6079_v48  ;;  %3972 = vrot.lane.b32.xlu0 %v4841_v40, %s4354_s3  ;;  %3977 = vrot.lane.b32.xlu1 %v4841_v40, %s4344_s25  ;;  %v329_v18 = vpack.c.bf16 %v4464_v61, %v4462_v60  ;;  %v591_v35 = vrot.slane %v586_v32, 4 }
 0x181   :  { %v634_v15 = vperm.slane %v626_v24, %v4503_v37  ;;  %v570_v54 = vsel %vm455_vm0, %v3964_v5, %v6080_v22  ;;  %v4857_v55 = vperm.slane %v1294_v39, %v4503_v37  ;;  %v624_v48 = vsel %vm455_vm0, %v623_v6, %v4493_v28 }
 0x182   :  { %v578_v24 = vperm.slane %v570_v54, %v4503_v37  ;;  %v630_v5 = vperm.slane %v624_v48, %v4503_v37  ;;  %v568_v40 = vsel %vm455_vm0, %v567_v13, %v4489_v27  ;;  %408 = vmatmul.bf16.gmra.mxu2 %v329_v18 }
 0x183   :  { %v660_v22 = vsel %vm455_vm0, %v659_v19, %v634_v15  ;;  %v661_v45 = vrot.slane %v634_v15, 4  ;;  %v574_v61 = vperm.slane %v568_v40, %v4503_v37 }
 0x184   :  { %v666_v60 = vperm.slane %v660_v22, %v4526_v62  ;;  %v604_v39 = vsel %vm455_vm0, %v603_v14, %v578_v24  ;;  %v605_v10 = vrot.slane %v578_v24, 4  ;;  %v648_v28 = vsel %vm455_vm0, %v647_v1, %v630_v5 }
 0x185   :  { %v649_v6 = vrot.slane %v630_v5, 4  ;;  %v662_v54 = vsel %vm455_vm0, %v646_v20, %v661_v45  ;;  %v610_v48 = vperm.slane %v604_v39, %v4526_v62  ;;  %v654_v19 = vperm.slane %v648_v28, %v4526_v62 }
 0x186   :  { %v670_v15 = vperm.slane %v662_v54, %v4526_v62  ;;  %v675_v27 = vrot.slane %v666_v60, 4  ;;  %v592_v13 = vsel %vm455_vm0, %v591_v35, %v574_v61  ;;  %v593_v40 = vrot.slane %v574_v61, 4 }
 0x187   :  { %v650_v18 = vsel %vm455_vm0, %v642_v2, %v649_v6  ;;  %v598_v14 = vperm.slane %v592_v13, %v4526_v62  ;;  %v606_v24 = vsel %vm455_vm0, %v590_v33, %v605_v10  ;;  %v1299_v1 = vrot.slane %v4831_v58, 4 }
 0x188   :  { %v658_v45 = vperm.slane %v650_v18, %v4526_v62  ;;  %v671_v20 = vrot.slane %v654_v19, 4  ;;  %v677_v5 = vrot.slane %v670_v15, 4  ;;  %v676_v22 = vsel %vm455_vm0, 0.0, %v675_v27 }
 0x189   :  { %v594_v39 = vsel %vm455_vm0, %v586_v32, %v593_v40  ;;  %v614_v28 = vperm.slane %v606_v24, %v4526_v62  ;;  %v615_v35 = vrot.slane %v598_v14, 4  ;;  %v619_v6 = vrot.slane %v610_v48, 4 }
 0x18a   :  { %v673_v54 = vrot.slane %v658_v45, 4  ;;  %v678_v2 = vsel %vm455_vm0, 0.0, %v677_v5  ;;  %v852_v61 = vsel %vm455_vm0, %v677_v5, %v666_v60  ;;  %v602_v13 = vperm.slane %v594_v39, %v4526_v62 }
 0x18b   :  { %v4886_v10 = vperm.slane %v852_v61, %v4503_v37  ;;  %v857_v33 = vrot.slane %v678_v2, 4  ;;  %v1175_v15 = vsel %vm455_vm0, %v4619_v42, %v4600_v23  ;;  %v621_v18 = vrot.slane %v614_v28, 4 }
 0x18c   :  { %v674_v32 = vsel %vm455_vm0, 0.0, %v673_v54  ;;  %v841_v27 = vsel %vm455_vm0, %v673_v54, %v654_v19  ;;  %v6081_v40 = vrot.slane %v4632_v3, 4  ;;  %v672_v24 = vsel %vm455_vm0, 0.0, %v671_v20 }
 0x18d   :  { %v846_v45 = vrot.slane %v674_v32, 4  ;;  %v858_v5 = vsel %vm455_vm0, %v857_v33, %v676_v22  ;;  %v616_v39 = vsel %vm455_vm0, 0.0, %v615_v35  ;;  %v617_v2 = vrot.slane %v602_v13, 4 }
 0x18e   :  { %v1181_v60 = vsel %vm455_vm0, %v6081_v40, %v4628_v11  ;;  %v620_v23 = vsel %vm455_vm0, 0.0, %v619_v6  ;;  %v622_v42 = vsel %vm455_vm0, 0.0, %v621_v18  ;;  %v798_v19 = vsel %vm455_vm0, %v621_v18, %v610_v48 }
 0x18f   :  { %v4905_v28 = vperm.slane %v841_v27, %v4503_v37  ;;  %v4908_v3 = vperm.slane %v858_v5, %v4503_v37  ;;  %v877_v11 = vrot.slane %v4886_v10, 4  ;;  %v803_v20 = vrot.slane %v622_v42, 4 }
 0x190   :  { %v618_v22 = vsel %vm455_vm0, 0.0, %v617_v2  ;;  %v787_v35 = vsel %vm455_vm0, %v617_v2, %v598_v14  ;;  %v4914_v54 = vperm.slane %v798_v19, %v4503_v37  ;;  %v4917_v61 = vperm.slane %v1181_v60, %v4503_v37 }
 0x191   :  { %v4920_v48 = vsel %vm455_vm0, %v846_v45, %v672_v24  ;;  %v792_v6 = vrot.slane %v618_v22, 4  ;;  %v804_v33 = vsel %vm455_vm0, %v803_v20, %v620_v23  ;;  %v4924_v13 = vperm.slane %v1175_v15, %v4503_v37 }
 0x192   :  { %v4927_v32 = vperm.slane %v804_v33, %v4503_v37  ;;  %v4931_v14 = vperm.slane %v4644_v0, %v4503_v37  ;;  %v4935_v27 = vperm.slane %v4681_v9, %v4503_v37  ;;  %v1197_v18 = vrot.slane %v4917_v61, 4 }
 0x193   :  { %v4940_v60 = vperm.slane %v787_v35, %v4503_v37  ;;  %v1229_v15 = vsel %vm455_vm0, %v4621_v52, %v4604_v12  ;;  %v6082_v24 = vrot.slane %v4637_v17, 4  ;;  %v4950_v45 = vsel %vm455_vm0, %v792_v6, %v616_v39 }
 0x194   :  { %v823_v9 = vrot.slane %v4914_v54, 4  ;;  %v1198_v5 = vsel %vm455_vm0, %v1197_v18, %v4924_v13  ;;  %v1209_v2 = vrot.slane %v4935_v27, 4  ;;  %v1199_v42 = vrot.slane %v4924_v13, 4 }
 0x195   :  { %v1235_v0 = vsel %vm455_vm0, %v6082_v24, %v4640_v36  ;;  %v1204_v12 = vperm.slane %v1198_v5, %v4526_v62  ;;  %v1211_v36 = vrot.slane %v4931_v14, 4  ;;  %v4966_v39 = vperm.slane %v1229_v15, %v4503_v37 }
 0x196   :  { %v4960_v52 = vperm.slane %v1235_v0, %v4503_v37  ;;  %v1210_v17 = vsel %vm455_vm0, %v1209_v2, %v4931_v14  ;;  %v4970_v19 = vperm.slane %v4687_v49, %v4503_v37  ;;  %v4975_v22 = vperm.slane %v4684_v29, %v4503_v37 }
 0x197   :  { %v1216_v20 = vperm.slane %v1210_v17, %v4526_v62  ;;  %v6083_v6 = vrot.slane %v4784_v50, 4  ;;  %v1223_v15 = vrot.slane %v1204_v12, 4  ;;  %v6084_v24 = vrot.slane %v4774_v46, 4 }
 0x198   :  { %v1251_v35 = vrot.slane %v4960_v52, 4  ;;  %v1263_v18 = vrot.slane %v4970_v19, 4  ;;  %v1283_v0 = vsel %vm455_vm0, %v4808_v41, %v4784_v50  ;;  %v6085_v17 = vrot.slane %v4822_v34, 4 }
 0x199   :  { %v1112_v33 = vsel %vm455_vm0, 0.0, %v6083_v6  ;;  %v1168_v49 = vsel %vm455_vm0, 0.0, %v6084_v24  ;;  %v1221_v5 = vrot.slane %v1216_v20, 4  ;;  %v4991_v2 = vperm.slane %v1283_v0, %v4503_v37 }
 0x19a   :  { %v1252_v29 = vsel %vm455_vm0, %v1251_v35, %v4966_v39  ;;  %v1289_v6 = vsel %vm455_vm0, %v6085_v17, %v1112_v33  ;;  %v1264_v24 = vsel %vm455_vm0, %v1263_v18, %v4975_v22  ;;  %v1224_v23 = vsel %vm455_vm0, %v1216_v20, %v1223_v15 }
 0x19b   :  { %v1258_v40 = vperm.slane %v1252_v29, %v4526_v62  ;;  %v5001_v50 = vperm.slane %v1289_v6, %v4503_v37  ;;  %v1222_v41 = vsel %vm455_vm0, %v1221_v5, %v1204_v12  ;;  %v1270_v35 = vperm.slane %v1264_v24, %v4526_v62 }
 0x19c   :  { %v1393_v0 = vpack.c.bf16 %v1224_v23, %v1224_v23  ;;  %v1300_v34 = vsel %vm455_vm0, %v1299_v1, %v4825_v63  ;;  %v1391_v33 = vpack.c.bf16 %v1222_v41, %v1222_v41  ;;  %v1307_v20 = vrot.slane %v4991_v2, 4 }
 0x19d   :  { %v1277_v29 = vrot.slane %v1258_v40, 4  ;;  %v5010_v17 = vperm.slane %v1300_v34, %v4503_v37  ;;  %v1275_v18 = vrot.slane %v1270_v35, 4  ;;  %v1319_v6 = vrot.slane %v4857_v55, 4 }
 0x19e   :  { %v1941_v15 = vunpack.c.l.b16 %v1393_v0  ;;  %v1337_v23 = vsel %vm455_vm0, %v4787_v43, %v4774_v46  ;;  %v1910_v12 = vunpack.c.l.b16 %v1391_v33  ;;  %v1308_v63 = vsel %vm455_vm0, %v5001_v50, %v1307_v20 }
 0x19f   :  { %v1278_v58 = vsel %vm455_vm0, %v1270_v35, %v1277_v29  ;;  %v5021_v1 = vperm.slane %v1337_v23, %v4503_v37  ;;  %v1276_v5 = vsel %vm455_vm0, %v1275_v18, %v1258_v40  ;;  %v5025_v41 = vperm.slane %v1308_v63, %v4526_v62 }
 0x1a0   :  { %v1394_v24 = vpack.c.bf16 %v1278_v58, %v1278_v58  ;;  %v1320_v0 = vsel %vm455_vm0, %v5010_v17, %v1319_v6  ;;  %v1392_v34 = vpack.c.bf16 %v1276_v5, %v1276_v5  ;;  %v6086_v43 = vrot.slane %v4802_v53, 4 }
 0x1a1   :  { %v5030_v46 = vperm.slane %v1320_v0, %v4526_v62  ;;  %v6087_v33 = vrot.slane %v4793_v8, 4  ;;  %v1361_v53 = vrot.slane %v5021_v1, 4  ;;  %v679_v8 = vsel %vm455_vm0, %v4711_v4, %v4705_v16 }
 0x1a2   :  { %v1343_v35 = vsel %vm455_vm0, %v6086_v43, %v1168_v49  ;;  %v1942_v29 = vunpack.c.l.b16 %v1394_v24  ;;  %v1911_v6 = vunpack.c.l.b16 %v1392_v34  ;;  %v1373_v49 = vrot.slane %v4811_v57, 4 }
 0x1a3   :  { %v1354_v40 = vsel %vm455_vm0, %v6087_v33, %v4805_v51  ;;  %v5040_v20 = vperm.slane %v1343_v35, %v4503_v37  ;;  %v1333_v23 = vrot.slane %v5030_v46, 4  ;;  %v6088_v51 = vrot.slane %v4729_v25, 4 }
 0x1a4   :  { %v5043_v18 = vperm.slane %v1354_v40, %v4503_v37  ;;  %v1943_v58 = vpack.c.b16 %v1942_v29, %v1941_v15  ;;  %v690_v5 = vsel %vm455_vm0, %v4722_v7, %v4720_v31  ;;  %v1912_v24 = vpack.c.b16 %v1911_v6, %v1910_v12 }
 0x1a5   :  { %v685_v63 = vsel %vm455_vm0, %v6088_v51, %v4745_v21  ;;  %v1334_v0 = vsel %vm455_vm0, %v1333_v23, %v5025_v41  ;;  %v1362_v15 = vsel %vm455_vm0, %v5040_v20, %v1361_v53  ;;  %v1253_v31 = vrot.slane %v4966_v39, 4 }
 0x1a6   :  { %v1374_v34 = vsel %vm455_vm0, %v5043_v18, %v1373_v49  ;;  %v1948_v16 = vsel %vm1913_vm1, %v1943_v58, 0  ;;  %v5066_v4 = vperm.slane %v1362_v15, %v4526_v62  ;;  %v1403_v21 = vpack.c.bf16 %v1334_v0, %v1334_v0  ;;  %v6093_v15 = vld [vmem:[#allocation28_spill] sm:$0xff] }
 0x1a7   :  { %v5069_v25 = vperm.slane %v1374_v34, %v4526_v62  ;;  %v1265_v7 = vrot.slane %v4975_v22, 4  ;;  %v1918_v12 = vsel %vm1913_vm1, %v1912_v24, 0  ;;  %v5075_v43 = vperm.slane %v685_v63, %v4503_v37 }
 0x1a8   :  { %1927 = vmatpush.bf16.xpose.msra.mxu3 %v1918_v12  ;;  %v5079_v33 = vperm.slane %v679_v8, %v4503_v37  ;;  %v5082_v40 = vperm.slane %v690_v5, %v4503_v37  ;;  %v6089_v29 = vrot.slane %v4735_v44, 4  ;;  %v1335_v22 = vrot.slane %v5025_v41, 4  ;;  %v6091_v8 = vld [vmem:[#allocation27_spill] sm:$0xff] }
 0x1a9   :  { %v1387_v35 = vrot.slane %v5069_v25, 4  ;;  %v2091_v6 = vunpack.c.l.b16 %v1403_v21  ;;  %v701_v53 = vrot.slane %v5075_v43, 4  ;;  %v733_v58 = vsel %vm455_vm0, %v4671_v56, %v4660_v59 }
 0x1aa   :  { %v696_v39 = vsel %vm455_vm0, %v6089_v29, %v4758_v38  ;;  %v6090_v44 = vrot.slane %v4692_v30, 4  ;;  %v744_v51 = vsel %vm455_vm0, %v6091_v8, %v4669_v26  ;;  %v5109_v0 = vperm.slane %v733_v58, %v4503_v37 }
 0x1ab   :  { %v5090_v23 = vperm.slane %v696_v39, %v4503_v37  ;;  %v1388_v49 = vsel %vm455_vm0, %v1387_v35, %v5066_v4  ;;  %v702_v5 = vsel %vm455_vm0, %v701_v53, %v5079_v33  ;;  %v703_v59 = vrot.slane %v5079_v33, 4 }
 0x1ac   :  { %v739_v38 = vsel %vm455_vm0, %v6090_v44, %v4702_v47  ;;  %v1404_v63 = vpack.c.bf16 %v1388_v49, %v1388_v49  ;;  %v715_v56 = vrot.slane %v5082_v40, 4  ;;  %v6092_v47 = vld [vmem:[#allocation29_spill] sm:$0xff]  ;;  %v6094_v34 = vrot.slane %v6093_v15, 4 }
 0x1ad   :  { %v713_v24 = vrot.slane %v5090_v23, 4  ;;  %v5114_v30 = vperm.slane %v739_v38, %v4503_v37  ;;  %v5121_v21 = vperm.slane %v702_v5, %v4526_v62  ;;  %v5132_v39 = vperm.slane %v744_v51, %v4503_v37 }
 0x1ae   :  { %v750_v26 = vsel %vm455_vm0, %v6094_v34, %v6092_v47  ;;  %v757_v49 = vrot.slane %v5109_v0, 4  ;;  %v1200_v38 = vsel %vm455_vm0, %v4917_v61, %v1199_v42  ;;  %v1212_v8 = vsel %vm455_vm0, %v4935_v27, %v1211_v36 }
 0x1af   :  { %v714_v12 = vsel %vm455_vm0, %v713_v24, %v5082_v40  ;;  %v5126_v35 = vperm.slane %v750_v26, %v4503_v37  ;;  %v755_v53 = vrot.slane %v5114_v30, 4  ;;  %v5149_v5 = vperm.slane %v1200_v38, %v4526_v62 }
 0x1b0   :  { %1957 = vmatpush.bf16.xpose.msrb.mxu3 %v1948_v16  ;;  %v2092_v16 = vunpack.c.l.b16 %v1404_v63  ;;  %v5129_v29 = vperm.slane %v714_v12, %v4526_v62  ;;  %v727_v61 = vrot.slane %v5121_v21, 4  ;;  %v1254_v27 = vsel %vm455_vm0, %v4960_v52, %v1253_v31 }
 0x1b1   :  { %v767_v44 = vrot.slane %v5126_v35, 4  ;;  %v756_v63 = vsel %vm455_vm0, %v755_v53, %v5109_v0  ;;  %v5170_v34 = vperm.slane %v1254_v27, %v4526_v62  ;;  %v1266_v26 = vsel %vm455_vm0, %v4970_v19, %v1265_v7 }
 0x1b2   :  { %v2093_v58 = vpack.c.b16 %v2092_v16, %v2091_v6  ;;  %v725_v51 = vrot.slane %v5129_v29, 4  ;;  %v5152_v6 = vperm.slane %v1212_v8, %v4526_v62  ;;  %v5163_v36 = vperm.slane %v756_v63, %v4526_v62 }
 0x1b3   :  { %v768_v14 = vsel %vm455_vm0, %v767_v44, %v5132_v39  ;;  %v1305_v52 = vrot.slane %v5001_v50, 4  ;;  %v5179_v12 = vperm.slane %v1266_v26, %v4526_v62  ;;  %v1317_v53 = vrot.slane %v5010_v17, 4 }
 0x1b4   :  { %v2098_v13 = vsel %vm1913_vm1, %v2093_v58, 0  ;;  %v726_v42 = vsel %vm455_vm0, %v725_v51, %v5121_v21  ;;  %v5166_v24 = vperm.slane %v768_v14, %v4526_v62  ;;  %v1225_v47 = vrot.slane %v5152_v6, 4 }
 0x1b5   :  { %2107 = vmatpush.bf16.xpose.msrb.mxu2 %v2098_v13  ;;  %v895_v15 = vpack.c.bf16 %v726_v42, %v726_v42  ;;  %v1306_v38 = vsel %vm455_vm0, %v1305_v52, %v4991_v2  ;;  %v1359_v8 = vrot.slane %v5040_v20, 4  ;;  %v1279_v50 = vrot.slane %v5179_v12, 4 }
 0x1b6   :  { %v779_v31 = vrot.slane %v5166_v24, 4  ;;  %v1226_v16 = vsel %vm455_vm0, %v1225_v47, %v5149_v5  ;;  %v1312_v7 = vperm.slane %v1306_v38, %v4526_v62  ;;  %v1318_v51 = vsel %vm455_vm0, %v1317_v53, %v4857_v55 }
 0x1b7   :  { %v1905_v58 = vunpack.c.l.b16 %v895_v15  ;;  %v1395_v44 = vpack.c.bf16 %v1226_v16, %v1226_v16  ;;  %v1324_v17 = vperm.slane %v1318_v51, %v4526_v62  ;;  %v1360_v14 = vsel %vm455_vm0, %v1359_v8, %v5021_v1 }
 0x1b8   :  { %v780_v19 = vsel %vm455_vm0, %v779_v31, %v5163_v36  ;;  %v1280_v2 = vsel %vm455_vm0, %v1279_v50, %v5170_v34  ;;  %v1366_v20 = vperm.slane %v1360_v14, %v4526_v62  ;;  %v1371_v27 = vrot.slane %v5043_v18, 4  ;;  %v6095_v18 = vld [vmem:[#allocation30_spill] sm:$0xff] }
 0x1b9   :  { %v896_v63 = vpack.c.bf16 %v780_v19, %v780_v19  ;;  %v1971_v13 = vunpack.c.l.b16 %v1395_v44  ;;  %v1331_v42 = vrot.slane %v1312_v7, 4  ;;  %v1396_v15 = vpack.c.bf16 %v1280_v2, %v1280_v2  ;;  %3982 = vrot.lane.b32.xlu2 %v6095_v18, %s4353_s1 }
 0x1ba   :  { %v1329_v26 = vrot.slane %v1324_v17, 4  ;;  %v1372_v55 = vsel %vm455_vm0, %v1371_v27, %v4811_v57  ;;  %v1385_v31 = vrot.slane %v1366_v20, 4  ;;  %v797_v1 = vperm.slane %v4950_v45, %v4503_v37 }
 0x1bb   :  { %v1906_v47 = vunpack.c.l.b16 %v896_v63  ;;  %v1332_v52 = vsel %vm455_vm0, %v1324_v17, %v1331_v42  ;;  %v1972_v53 = vunpack.c.l.b16 %v1396_v15  ;;  %v1378_v38 = vperm.slane %v1372_v55, %v4526_v62 }
 0x1bc   :  { %v1330_v44 = vsel %vm455_vm0, %v1329_v26, %v1312_v7  ;;  %v1401_v19 = vpack.c.bf16 %v1332_v52, %v1332_v52  ;;  %v811_v50 = vrot.slane %v4940_v60, 4  ;;  %v824_v57 = vsel %vm455_vm0, %v4927_v32, %v823_v9 }
 0x1bd   :  { %v1907_v16 = vpack.c.b16 %v1906_v47, %v1905_v58  ;;  %v1399_v8 = vpack.c.bf16 %v1330_v44, %v1330_v44  ;;  %v1973_v45 = vpack.c.b16 %v1972_v53, %v1971_v13  ;;  %v1383_v58 = vrot.slane %v1378_v38, 4 }
 0x1be   :  { %v1386_v7 = vsel %vm455_vm0, %v1378_v38, %v1385_v31  ;;  %v5215_v51 = vperm.slane %v824_v57, %v4526_v62  ;;  %v2061_v14 = vunpack.c.l.b16 %v1401_v19  ;;  %v812_v2 = vsel %vm455_vm0, %v797_v1, %v811_v50 }
 0x1bf   :  { %3644 = vmatmul.msk.bf16.vlgmr.msra.gmra.mxu3 %vm1913_vm1, %v1907_v16  ;;  %v2031_v63 = vunpack.c.l.b16 %v1399_v8  ;;  %v1402_v17 = vpack.c.bf16 %v1386_v7, %v1386_v7  ;;  %v1978_v27 = vsel %vm1913_vm1, %v1973_v45, 0  ;;  %v1384_v42 = vsel %vm455_vm0, %v1383_v58, %v1366_v20 }
 0x1c0   :  { %v5221_v9 = vperm.slane %v812_v2, %v4526_v62  ;;  %v837_v13 = vrot.slane %v5215_v51, 4  ;;  %1987 = vmatpush.bf16.xpose.msra.mxu3 %v1978_v27  ;;  %v1400_v47 = vpack.c.bf16 %v1384_v42, %v1384_v42  ;;  %v851_v26 = vperm.slane %v4920_v48, %v4503_v37 }
 0x1c1   :  { %v2062_v15 = vunpack.c.l.b16 %v1402_v17  ;;  %v865_v55 = vrot.slane %v4905_v28, 4  ;;  %v781_v52 = vrot.slane %v5163_v36, 4  ;;  %v878_v20 = vsel %vm455_vm0, %v4908_v3, %v877_v11 }
 0x1c2   :  { %v838_v31 = vsel %vm455_vm0, %v837_v13, %v5221_v9  ;;  %v809_v16 = vrot.slane %v797_v1, 4  ;;  %v2032_v53 = vunpack.c.l.b16 %v1400_v47  ;;  %v5236_v18 = vperm.slane %v878_v20, %v4526_v62 }
 0x1c3   :  { %v2063_v44 = vpack.c.b16 %v2062_v15, %v2061_v14  ;;  %v866_v38 = vsel %vm455_vm0, %v851_v26, %v865_v55  ;;  %v907_v36 = vpack.c.bf16 %v838_v31, %v838_v31  ;;  %v6096_v19 = vrot.slane %v4927_v32, 4 }
 0x1c4   :  { %v5239_v48 = vperm.slane %v866_v38, %v4526_v62  ;;  %v810_v8 = vsel %vm455_vm0, %v809_v16, %v4940_v60  ;;  %v2033_v1 = vpack.c.b16 %v2032_v53, %v2031_v63  ;;  %v891_v57 = vrot.slane %v5236_v18, 4 }
 0x1c5   :  { %v822_v11 = vsel %vm455_vm0, %v6096_v19, %v4914_v54  ;;  %v2068_v50 = vsel %vm1913_vm1, %v2063_v44, 0  ;;  %v816_v45 = vperm.slane %v810_v8, %v4526_v62  ;;  %v769_v58 = vrot.slane %v5132_v39, 4 }
 0x1c6   :  { %2077 = vmatpush.bf16.xpose.msrb.mxu1 %v2068_v50  ;;  %v2086_v7 = vunpack.c.l.b16 %v907_v36  ;;  %v828_v17 = vperm.slane %v822_v11, %v4526_v62  ;;  %v863_v14 = vrot.slane %v851_v26, 4  ;;  %v2038_v60 = vsel %vm1913_vm1, %v2033_v1, 0 }
 0x1c7   :  { %v892_v32 = vsel %vm455_vm0, %v891_v57, %v5239_v48  ;;  %v6097_v54 = vrot.slane %v4908_v3, 4  ;;  %v835_v2 = vrot.slane %v816_v45, 4  ;;  %2047 = vmatpush.bf16.xpose.msrb.mxu0 %v2038_v60  ;;  %v728_v3 = vsel %vm455_vm0, %v5129_v29, %v727_v61 }
 0x1c8   :  { %v908_v27 = vpack.c.bf16 %v892_v32, %v892_v32  ;;  %v833_v42 = vrot.slane %v828_v17, 4  ;;  %v864_v39 = vsel %vm455_vm0, %v863_v14, %v4905_v28  ;;  %v897_v53 = vpack.c.bf16 %v728_v3, %v728_v3 }
 0x1c9   :  { %v876_v63 = vsel %vm455_vm0, %v6097_v54, %v4886_v10  ;;  %v870_v47 = vperm.slane %v864_v39, %v4526_v62  ;;  %v836_v15 = vsel %vm455_vm0, %v828_v17, %v835_v2  ;;  %v782_v10 = vsel %vm455_vm0, %v5166_v24, %v781_v52 }
 0x1ca   :  { %v882_v13 = vperm.slane %v876_v63, %v4526_v62  ;;  %v2087_v26 = vunpack.c.l.b16 %v908_v27  ;;  %v834_v55 = vsel %vm455_vm0, %v833_v42, %v816_v45  ;;  %v905_v20 = vpack.c.bf16 %v836_v15, %v836_v15 }
 0x1cb   :  { %v903_v28 = vpack.c.bf16 %v834_v55, %v834_v55  ;;  %v889_v16 = vrot.slane %v870_v47, 4  ;;  %v898_v44 = vpack.c.bf16 %v782_v10, %v782_v10  ;;  %v1227_v21 = vrot.slane %v5149_v5, 4 }
 0x1cc   :  { %v887_v31 = vrot.slane %v882_v13, 4  ;;  %v2088_v38 = vpack.c.b16 %v2087_v26, %v2086_v7  ;;  %v2056_v8 = vunpack.c.l.b16 %v905_v20  ;;  %v1936_v24 = vunpack.c.l.b16 %v897_v53 }
 0x1cd   :  { %v2026_v29 = vunpack.c.l.b16 %v903_v28  ;;  %v890_v61 = vsel %vm455_vm0, %v882_v13, %v889_v16  ;;  %v1937_v11 = vunpack.c.l.b16 %v898_v44  ;;  %v1228_v1 = vsel %vm455_vm0, %v5152_v6, %v1227_v21 }
 0x1ce   :  { %v888_v36 = vsel %vm455_vm0, %v887_v31, %v870_v47  ;;  %3650 = vmatmul.msk.bf16.vlgmr.msrb.gmra.mxu2 %vm1913_vm1, %v2088_v38  ;;  %v906_v52 = vpack.c.bf16 %v890_v61, %v890_v61  ;;  %v1281_v50 = vrot.slane %v5170_v34, 4  ;;  %v1397_v45 = vpack.c.bf16 %v1228_v1, %v1228_v1 }
 0x1cf   :  { %v904_v19 = vpack.c.bf16 %v888_v36, %v888_v36  ;;  %v704_v5 = vsel %vm455_vm0, %v5075_v43, %v703_v59  ;;  %v716_v7 = vsel %vm455_vm0, %v5090_v23, %v715_v56  ;;  %v1389_v17 = vrot.slane %v5066_v4, 4 }
 0x1d0   :  { %v2057_v14 = vunpack.c.l.b16 %v906_v52  ;;  %v1938_v60 = vpack.c.b16 %v1937_v11, %v1936_v24  ;;  %v1282_v6 = vsel %vm455_vm0, %v5179_v12, %v1281_v50  ;;  %v2001_v54 = vunpack.c.l.b16 %v1397_v45  ;;  %v6099_v45 = vld [vmem:[#allocation26_spill] sm:$0xff] }
 0x1d1   :  { %v2027_v57 = vunpack.c.l.b16 %v904_v19  ;;  %v1398_v32 = vpack.c.bf16 %v1282_v6, %v1282_v6  ;;  %v724_v33 = vperm.slane %v716_v7, %v4526_v62  ;;  %v712_v43 = vperm.slane %v704_v5, %v4526_v62 }
 0x1d2   :  { %v2058_v63 = vpack.c.b16 %v2057_v14, %v2056_v8  ;;  %3645 = vmatmul.msk.bf16.vlgmr.msrb.gmra.mxu3 %vm1913_vm1, %v1938_v60  ;;  %v758_v4 = vsel %vm455_vm0, %v5114_v30, %v757_v49  ;;  %v770_v40 = vsel %vm455_vm0, %v5126_v35, %v769_v58  ;;  %v1336_v12 = vsel %vm455_vm0, %v5030_v46, %v1335_v22 }
 0x1d3   :  { %v2028_v34 = vpack.c.b16 %v2027_v57, %v2026_v29  ;;  %v2002_v23 = vunpack.c.l.b16 %v1398_v32  ;;  %v729_v59 = vrot.slane %v724_v33, 4  ;;  %v778_v56 = vperm.slane %v770_v40, %v4526_v62  ;;  %v6098_v57 = vld [vmem:[#allocation25_spill] sm:$0xff] }
 0x1d4   :  { %3649 = vmatmul.msk.bf16.vlgmr.msrb.gmra.mxu1 %vm1913_vm1, %v2058_v63  ;;  %v1390_v0 = vsel %vm455_vm0, %v5069_v25, %v1389_v17  ;;  %v766_v35 = vperm.slane %v758_v4, %v4526_v62  ;;  %v1405_v2 = vpack.c.bf16 %v1336_v12, %v1336_v12  ;;  %v731_v10 = vrot.slane %v712_v43, 4 }
 0x1d5   :  { %3648 = vmatmul.msk.bf16.vlgmr.msrb.gmra.mxu0 %vm1913_vm1, %v2028_v34  ;;  %v2003_v30 = vpack.c.b16 %v2002_v23, %v2001_v54  ;;  %v730_v49 = vsel %vm455_vm0, %v729_v59, %v712_v43  ;;  %v783_v58 = vrot.slane %v778_v56, 4  ;;  %v1406_v27 = vpack.c.bf16 %v1390_v0, %v1390_v0 }
 0x1d6   :  { %v899_v39 = vpack.c.bf16 %v730_v49, %v730_v49  ;;  %v2121_v22 = vunpack.c.l.b16 %v1405_v2  ;;  %v785_v26 = vrot.slane %v766_v35, 4  ;;  %v732_v31 = vsel %vm455_vm0, %v724_v33, %v731_v10 }
 0x1d7   :  { %v2008_v42 = vsel %vm1913_vm1, %v2003_v30, 0  ;;  %v784_v41 = vsel %vm455_vm0, %v783_v58, %v766_v35  ;;  %v2122_v13 = vunpack.c.l.b16 %v1406_v27  ;;  %v901_v28 = vpack.c.bf16 %v732_v31, %v732_v31 }
 0x1d8   :  { %2017 = vmatpush.bf16.xpose.msrb.mxu3 %v2008_v42  ;;  %v900_v46 = vpack.c.bf16 %v784_v41, %v784_v41  ;;  %v1966_v47 = vunpack.c.l.b16 %v899_v39  ;;  %v786_v20 = vsel %vm455_vm0, %v778_v56, %v785_v26  ;;  %v839_v36 = vrot.slane %v5221_v9, 4 }
 0x1d9   :  { %v2123_v25 = vpack.c.b16 %v2122_v13, %v2121_v22  ;;  %v902_v16 = vpack.c.bf16 %v786_v20, %v786_v20  ;;  %v1996_v53 = vunpack.c.l.b16 %v901_v28  ;;  %v893_v8 = vrot.slane %v5239_v48, 4 }
 0x1da   :  { %v1967_v15 = vunpack.c.l.b16 %v900_v46  ;;  %v840_v21 = vsel %vm455_vm0, %v5215_v51, %v839_v36  ;;  %v1449_v48 = vrot.slane %v6098_v57, 4  ;;  %v1505_v5 = vrot.slane %v6099_v45, 4 }
 0x1db   :  { %v2128_v55 = vsel %vm1913_vm1, %v2123_v25, 0  ;;  %v1997_v44 = vunpack.c.l.b16 %v902_v16  ;;  %v894_v19 = vsel %vm455_vm0, %v5236_v18, %v893_v8  ;;  %v909_v29 = vpack.c.bf16 %v840_v21, %v840_v21 }
 0x1dc   :  { %v1968_v3 = vpack.c.b16 %v1967_v15, %v1966_v47  ;;  %v910_v61 = vpack.c.bf16 %v894_v19, %v894_v19 }
 0x1dd   :  { %v1998_v38 = vpack.c.b16 %v1997_v44, %v1996_v53  ;;  %v2116_v24 = vunpack.c.l.b16 %v909_v29 }
 0x1de   :  { %v2117_v52 = vunpack.c.l.b16 %v910_v61 }
 0x1e0   :  { %v2118_v11 = vpack.c.b16 %v2117_v52, %v2116_v24 }
 0x1e2   :  { %3646 = vmatmul.msk.bf16.vlgmr.msra.gmra.mxu3 %vm1913_vm1, %v1968_v3 }
 0x1e3   :  { %2137 = vmatpush.bf16.xpose.msra.mxu3 %v2128_v55 }
 0x1f2   :  { %3647 = vmatmul.msk.bf16.vlgmr.msrb.gmra.mxu3 %vm1913_vm1, %v1998_v38  ;;  %v3978_v1 = vpop.permute.xlu1 %3977  ;;  %v3973_v7 = vpop.permute.xlu0 %3972 }
 0x1f3   :  { %v3979_v50 = vunpack.i.l.bf16 %v3978_v1  ;;  %v3980_v9 = vunpack.i.h.bf16 %v3978_v1  ;;  %v3975_v14 = vunpack.i.h.bf16 %v3973_v7  ;;  %v3974_v60 = vunpack.i.l.bf16 %v3973_v7 }
 0x1f5   :  { %v1447_v17 = vrot.slane %v3979_v50, 4  ;;  %v1503_v51 = vrot.slane %v3980_v9, 4  ;;  %v1506_v18 = vsel %vm455_vm0, %v3980_v9, %v1505_v5  ;;  %v1450_v6 = vsel %vm455_vm0, %v3979_v50, %v1449_v48 }
 0x1f6   :  { %v1514_v54 = vperm.slane %v1506_v18, %v4503_v37  ;;  %v1458_v33 = vperm.slane %v1450_v6, %v4503_v37  ;;  %v1517_v63 = vrot.slane %v3975_v14, 4  ;;  %v1461_v43 = vrot.slane %v3974_v60, 4 }
 0x1f7   :  { %v1448_v34 = vsel %vm455_vm0, %v1447_v17, %v6098_v57  ;;  %v1504_v32 = vsel %vm455_vm0, %v1503_v51, %v6099_v45 }
 0x1f8   :  { %v1454_v4 = vperm.slane %v1448_v34, %v4503_v37  ;;  %v1510_v23 = vperm.slane %v1504_v32, %v4503_v37  ;;  %v1541_v12 = vrot.slane %v1514_v54, 4  ;;  %v1485_v0 = vrot.slane %v1458_v33, 4 }
 0x1fa   :  { %v1473_v2 = vrot.slane %v1454_v4, 4  ;;  %v1529_v41 = vrot.slane %v1510_v23, 4 }
 0x202   :  { %3651 = vmatmul.msk.bf16.vlgmr.msra.gmra.mxu3 %vm1913_vm1, %v2118_v11 }
 0x213   :  { %v3983_v40 = vpop.permute.xlu2 %3982 }
 0x214   :  { %v3985_v59 = vunpack.i.h.bf16 %v3983_v40  ;;  %v3984_v56 = vunpack.i.l.bf16 %v3983_v40 }
 0x216   :  { %v1515_v30 = vrot.slane %v3985_v59, 4  ;;  %v1518_v49 = vsel %vm455_vm0, %v3985_v59, %v1517_v63  ;;  %v1459_v35 = vrot.slane %v3984_v56, 4  ;;  %v1462_v58 = vsel %vm455_vm0, %v3984_v56, %v1461_v43 }
 0x217   :  { %v1526_v27 = vperm.slane %v1518_v49, %v4503_v37  ;;  %v1470_v42 = vperm.slane %v1462_v58, %v4503_v37 }
 0x218   :  { %v1516_v39 = vsel %vm455_vm0, %v1515_v30, %v3975_v14  ;;  %v1460_v46 = vsel %vm455_vm0, %v1459_v35, %v3974_v60 }
 0x219   :  { %v1522_v22 = vperm.slane %v1516_v39, %v4503_v37  ;;  %v1539_v13 = vrot.slane %v1526_v27, 4  ;;  %v1466_v47 = vperm.slane %v1460_v46, %v4503_v37  ;;  %v1483_v15 = vrot.slane %v1470_v42, 4 }
 0x21a   :  { %v1486_v25 = vsel %vm455_vm0, %v1470_v42, %v1485_v0  ;;  %v1542_v3 = vsel %vm455_vm0, %v1526_v27, %v1541_v12 }
 0x21b   :  { %v1527_v10 = vrot.slane %v1522_v22, 4  ;;  %v1471_v26 = vrot.slane %v1466_v47, 4  ;;  %v1474_v55 = vsel %vm455_vm0, %v1466_v47, %v1473_v2  ;;  %v1484_v31 = vsel %vm455_vm0, %v1483_v15, %v1458_v33 }
 0x21c   :  { %v1482_v20 = vperm.slane %v1474_v55, %v4526_v62  ;;  %v1490_v28 = vperm.slane %v1484_v31, %v4526_v62  ;;  %v1494_v16 = vperm.slane %v1486_v25, %v4526_v62  ;;  %v1530_v53 = vsel %vm455_vm0, %v1522_v22, %v1529_v41 }
 0x21d   :  { %v1472_v44 = vsel %vm455_vm0, %v1471_v26, %v1454_v4  ;;  %v1528_v38 = vsel %vm455_vm0, %v1527_v10, %v1510_v23  ;;  %v1538_v36 = vperm.slane %v1530_v53, %v4526_v62  ;;  %v1540_v8 = vsel %vm455_vm0, %v1539_v13, %v1514_v54 }
 0x21e   :  { %v1478_v21 = vperm.slane %v1472_v44, %v4526_v62  ;;  %v1497_v19 = vrot.slane %v1482_v20, 4  ;;  %v1499_v29 = vrot.slane %v1490_v28, 4  ;;  %v1501_v61 = vrot.slane %v1494_v16, 4 }
 0x21f   :  { %v1534_v24 = vperm.slane %v1528_v38, %v4526_v62  ;;  %v1546_v52 = vperm.slane %v1540_v8, %v4526_v62  ;;  %v1550_v11 = vperm.slane %v1542_v3, %v4526_v62  ;;  %v1553_v1 = vrot.slane %v1538_v36, 4 }
 0x220   :  { %v1495_v50 = vrot.slane %v1478_v21, 4  ;;  %v1498_v9 = vsel %vm455_vm0, 0.0, %v1497_v19  ;;  %v1500_v57 = vsel %vm455_vm0, 0.0, %v1499_v29  ;;  %v1502_v48 = vsel %vm455_vm0, 0.0, %v1501_v61 }
 0x221   :  { %v1551_v45 = vrot.slane %v1534_v24, 4  ;;  %v1554_v5 = vsel %vm455_vm0, 0.0, %v1553_v1  ;;  %v1555_v7 = vrot.slane %v1546_v52, 4  ;;  %v1557_v17 = vrot.slane %v1550_v11, 4 }
 0x222   :  { %v1496_v51 = vsel %vm455_vm0, 0.0, %v1495_v50  ;;  %v1671_v14 = vsel %vm455_vm0, %v1497_v19, %v1478_v21  ;;  %v1676_v60 = vrot.slane %v1498_v9, 4  ;;  %v1682_v18 = vsel %vm455_vm0, %v1501_v61, %v1490_v28 }
 0x223   :  { %v1552_v6 = vsel %vm455_vm0, 0.0, %v1551_v45  ;;  %v1556_v34 = vsel %vm455_vm0, 0.0, %v1555_v7  ;;  %v1558_v32 = vsel %vm455_vm0, 0.0, %v1557_v17  ;;  %v1686_v54 = vperm.slane %v1682_v18, %v4503_v37 }
 0x224   :  { %v1677_v33 = vsel %vm455_vm0, %v1676_v60, %v1496_v51  ;;  %v1687_v63 = vrot.slane %v1502_v48, 4  ;;  %v1725_v43 = vsel %vm455_vm0, %v1553_v1, %v1534_v24  ;;  %v1730_v4 = vrot.slane %v1554_v5, 4 }
 0x225   :  { %v1707_v40 = vrot.slane %v1686_v54, 4  ;;  %v1736_v23 = vsel %vm455_vm0, %v1557_v17, %v1546_v52  ;;  %v1741_v59 = vrot.slane %v1558_v32, 4  ;;  %v1675_v56 = vperm.slane %v1671_v14, %v4503_v37 }
 0x226   :  { %v1688_v12 = vsel %vm455_vm0, %v1687_v63, %v1500_v57  ;;  %v1731_v0 = vsel %vm455_vm0, %v1730_v4, %v1552_v6  ;;  %v1740_v30 = vperm.slane %v1736_v23, %v4503_v37  ;;  %v1681_v49 = vperm.slane %v1677_v33, %v4503_v37 }
 0x227   :  { %v1692_v35 = vperm.slane %v1688_v12, %v4503_v37  ;;  %v1742_v58 = vsel %vm455_vm0, %v1741_v59, %v1556_v34  ;;  %v1729_v2 = vperm.slane %v1725_v43, %v4503_v37  ;;  %v1735_v27 = vperm.slane %v1731_v0, %v4503_v37 }
 0x228   :  { %v1746_v42 = vperm.slane %v1742_v58, %v4503_v37  ;;  %v1761_v41 = vrot.slane %v1740_v30, 4  ;;  %v1693_v39 = vrot.slane %v1681_v49, 4  ;;  %v1695_v46 = vrot.slane %v1675_v56, 4 }
 0x229   :  { %v1705_v22 = vrot.slane %v1692_v35, 4  ;;  %v1747_v13 = vrot.slane %v1735_v27, 4  ;;  %v1708_v47 = vsel %vm455_vm0, %v1692_v35, %v1707_v40  ;;  %v1749_v15 = vrot.slane %v1729_v2, 4 }
 0x22a   :  { %v1694_v25 = vsel %vm455_vm0, %v1693_v39, %v1675_v56  ;;  %v1759_v3 = vrot.slane %v1746_v42, 4  ;;  %v1696_v10 = vsel %vm455_vm0, %v1681_v49, %v1695_v46  ;;  %v1716_v26 = vperm.slane %v1708_v47, %v4526_v62 }
 0x22b   :  { %v1700_v55 = vperm.slane %v1694_v25, %v4526_v62  ;;  %v1706_v31 = vsel %vm455_vm0, %v1705_v22, %v1686_v54  ;;  %v1748_v20 = vsel %vm455_vm0, %v1747_v13, %v1729_v2  ;;  %v1704_v28 = vperm.slane %v1696_v10, %v4526_v62 }
 0x22c   :  { %v1712_v16 = vperm.slane %v1706_v31, %v4526_v62  ;;  %v1754_v53 = vperm.slane %v1748_v20, %v4526_v62  ;;  %v1760_v44 = vsel %vm455_vm0, %v1759_v3, %v1740_v30  ;;  %v1721_v38 = vrot.slane %v1716_v26, 4 }
 0x22d   :  { %v1766_v36 = vperm.slane %v1760_v44, %v4526_v62  ;;  %v1719_v8 = vrot.slane %v1700_v55, 4  ;;  %v1750_v21 = vsel %vm455_vm0, %v1735_v27, %v1749_v15  ;;  %v1762_v19 = vsel %vm455_vm0, %v1746_v42, %v1761_v41  ;;  %v409_v42 = vpop.f32.mrf.mxu2 }
 0x22e   :  { %v1717_v29 = vrot.slane %v1712_v16, 4  ;;  %v1773_v61 = vrot.slane %v1754_v53, 4  ;;  %v1722_v24 = vsel %vm455_vm0, %v1721_v38, %v1704_v28  ;;  %v1758_v52 = vperm.slane %v1750_v21, %v4526_v62 }
 0x22f   :  { %v1771_v11 = vrot.slane %v1766_v36, 4  ;;  %v1720_v1 = vsel %vm455_vm0, %v1712_v16, %v1719_v8  ;;  %v1770_v50 = vperm.slane %v1762_v19, %v4526_v62  ;;  %v1891_v9 = vpack.c.bf16 %v1722_v24, %v1722_v24 }
 0x230   :  { %v1718_v57 = vsel %vm455_vm0, %v1717_v29, %v1700_v55  ;;  %v1774_v48 = vsel %vm455_vm0, %v1766_v36, %v1773_v61  ;;  %v1889_v45 = vpack.c.bf16 %v1720_v1, %v1720_v1  ;;  %v1723_v5 = vrot.slane %v1704_v28, 4 }
 0x231   :  { %v1772_v7 = vsel %vm455_vm0, %v1771_v11, %v1754_v53  ;;  %v1887_v17 = vpack.c.bf16 %v1718_v57, %v1718_v57  ;;  %v1890_v51 = vpack.c.bf16 %v1774_v48, %v1774_v48  ;;  %v1775_v14 = vrot.slane %v1770_v50, 4  ;;  %v6100_v57 = vld [vmem:[#allocation24_spill] sm:$0xff] }
 0x232   :  { %v1888_v60 = vpack.c.bf16 %v1772_v7, %v1772_v7  ;;  %v2580_v18 = vunpack.c.l.b16 %v1889_v45  ;;  %v1724_v6 = vsel %vm455_vm0, %v1716_v26, %v1723_v5  ;;  %v1777_v33 = vrot.slane %v1758_v52, 4 }
 0x233   :  { %v2552_v34 = vunpack.c.l.b16 %v1887_v17  ;;  %v2581_v32 = vunpack.c.l.b16 %v1890_v51  ;;  %v1776_v54 = vsel %vm455_vm0, %v1775_v14, %v1758_v52  ;;  %v2608_v4 = vunpack.c.l.b16 %v1891_v9 }
 0x234   :  { %v2553_v63 = vunpack.c.l.b16 %v1888_v60  ;;  %v1892_v43 = vpack.c.bf16 %v1776_v54, %v1776_v54  ;;  %v1893_v40 = vpack.c.bf16 %v1724_v6, %v1724_v6  ;;  %v1778_v59 = vsel %vm455_vm0, %v1770_v50, %v1777_v33 }
 0x235   :  { %v2582_v23 = vpack.c.b16 %v2581_v32, %v2580_v18  ;;  %v1894_v0 = vpack.c.bf16 %v1778_v59, %v1778_v59  ;;  %v411_v46 = vpop.f32.mrf.mxu2  ;;  %v5454_v48 = vadd.f32 %v409_v42, %v6100_v57 }
 0x236   :  { %v2554_v56 = vpack.c.b16 %v2553_v63, %v2552_v34  ;;  %v2609_v12 = vunpack.c.l.b16 %v1892_v43  ;;  %v2636_v30 = vunpack.c.l.b16 %v1893_v40  ;;  %v5457_v45 = vadd.f32 %v411_v46, %v6100_v57 }
 0x237   :  { %2594 = vmatpush.bf16.msra.mxu1 %v2582_v23  ;;  %v2637_v35 = vunpack.c.l.b16 %v1894_v0 }
 0x238   :  { %2566 = vmatpush.bf16.msra.mxu0 %v2554_v56  ;;  %v2610_v49 = vpack.c.b16 %v2609_v12, %v2608_v4  ;;  %v5461_v5 = vpack.i.bf16 %v5457_v45, %v5454_v48 }
 0x239   :  { %v2638_v58 = vpack.c.b16 %v2637_v35, %v2636_v30 }
 0x23a   :  { %2622 = vmatpush.bf16.msra.mxu2 %v2610_v49 }
 0x23b   :  { %2650 = vmatpush.bf16.msrb.mxu3 %v2638_v58 }
 0x242   :  { %v1929_v2 = vpop.f32.mrf.mxu3 }
 0x243   :  { %v2145_v27 = vsel %vm2144_vm2, %v1929_v2, -inf }
 0x244   :  { %2146 = vmax.xlane.f32.xlu0 %v2145_v27 }
 0x24a   :  { %v1931_v41 = vpop.f32.mrf.mxu3 }
 0x24b   :  { %v2148_v39 = vsel %vm2144_vm2, %v1931_v41, -inf }
 0x24c   :  { %2149 = vmax.xlane.f32.xlu1 %v2148_v39 }
 0x251   :  { %v5411_v13 = vpop.f32.mrf.mxu1  ;;  %v5417_v3 = vpop.f32.mrf.mxu2 }
 0x252   :  { %v5409_v22 = vpop.f32.mrf.mxu0  ;;  %v2175_v15 = vsel %vm2144_vm2, %v5411_v13, -inf  ;;  %v2181_v31 = vsel %vm2144_vm2, %v5417_v3, -inf }
 0x253   :  { %v2169_v47 = vsel %vm2144_vm2, %v5409_v22, -inf }
 0x254   :  { %2170 = vmax.xlane.f32.xlu2 %v2169_v47  ;;  %2176 = vmax.xlane.f32.xlu1 %v2175_v15 }
 0x255   :  { %v1959_v25 = vpop.f32.mrf.mxu3 }
 0x256   :  { %v2151_v10 = vsel %vm2144_vm2, %v1959_v25, -inf }
 0x259   :  { %v5426_v28 = vpop.f32.mrf.mxu1  ;;  %v5431_v38 = vpop.f32.mrf.mxu2 }
 0x25a   :  { %v5420_v26 = vpop.f32.mrf.mxu0  ;;  %v2178_v53 = vsel %vm2144_vm2, %v5426_v28, -inf  ;;  %v2184_v8 = vsel %vm2144_vm2, %v5431_v38, -inf }
 0x25b   :  { %v2172_v55 = vsel %vm2144_vm2, %v5420_v26, -inf }
 0x25c   :  { %2173 = vmax.xlane.f32.xlu0 %v2172_v55  ;;  %2152 = vmax.xlane.f32.xlu2 %v2151_v10 }
 0x25d   :  { %2182 = vmax.xlane.f32.xlu1 %v2181_v31  ;;  %v1961_v20 = vpop.f32.mrf.mxu3 }
 0x25e   :  { %v2154_v16 = vsel %vm2144_vm2, %v1961_v20, -inf }
 0x264   :  { %2179 = vmax.xlane.f32.xlu2 %v2178_v53  ;;  %2155 = vmax.xlane.f32.xlu0 %v2154_v16 }
 0x265   :  { %v1989_v44 = vpop.f32.mrf.mxu3 }
 0x266   :  { %v2157_v36 = vsel %vm2144_vm2, %v1989_v44, -inf }
 0x26c   :  { %2185 = vmax.xlane.f32.xlu2 %v2184_v8  ;;  %2158 = vmax.xlane.f32.xlu0 %v2157_v36 }
 0x26d   :  { %v1991_v21 = vpop.f32.mrf.mxu3 }
 0x26e   :  { %v2160_v19 = vsel %vm2144_vm2, %v1991_v21, -inf }
 0x26f   :  { %2161 = vmax.xlane.f32.xlu1 %v2160_v19 }
 0x275   :  { %v5437_v29 = vpop.f32.mrf.mxu3 }
 0x276   :  { %v2163_v61 = vsel %vm2144_vm2, %v5437_v29, -inf }
 0x277   :  { %2164 = vmax.xlane.f32.xlu2 %v2163_v61 }
 0x27d   :  { %v5441_v24 = vpop.f32.mrf.mxu3 }
 0x27e   :  { %v2166_v52 = vsel %vm2144_vm2, %v5441_v24, -inf }
 0x27f   :  { %2167 = vmax.xlane.f32.xlu2 %v2166_v52 }
 0x285   :  { %v5445_v11 = vpop.f32.mrf.mxu3 }
 0x286   :  { %v2187_v1 = vsel %vm2144_vm2, %v5445_v11, -inf }
 0x287   :  { %2188 = vmax.xlane.f32.xlu0 %v2187_v1 }
 0x28d   :  { %v5449_v50 = vpop.f32.mrf.mxu3 }
 0x28e   :  { %v2190_v9 = vsel %vm2144_vm2, %v5449_v50, -inf }
 0x28f   :  { %2191 = vmax.xlane.f32.xlu1 %v2190_v9 }
 0x297   :  { %3992 = vrot.lane.b32.xlu2 %v5461_v5, %s4344_s25  ;;  %s4358_s25 = smov [#allocation17]  }
 0x298   :  { %s3529_s17 = sshll.u32 %s4358_s25, 4  ;;  %s3530_s17 = int_to_ptr.vmem [resolvable:$true] %s3529_s17 }
 0x29b   :  { %3987 = vrot.lane.b32.xlu0 %v5461_v5, %s4354_s3 }
 0x2b7   :  { %v2147_v7 = vpop.xlane.xlu0 %2146 }
 0x2b8   :  { %v2193_v17 = vsub.f32 %v1929_v2, %v2147_v7 }
 0x2ba   :  { %v2209_v51 = vmul.f32 1.442695, %v2193_v17 }
 0x2bc   :  { %4001 = vpow2.f32 %v2209_v51 }
 0x2bf   :  { %v2150_v14 = vpop.xlane.xlu1 %2149 }
 0x2c0   :  { %v2194_v60 = vsub.f32 %v1931_v41, %v2150_v14 }
 0x2c2   :  { %v5467_v18 = vpop.eup %4001  ;;  %v2211_v6 = vmul.f32 1.442695, %v2194_v60 }
 0x2c3   :  { %v2241_v34 = vsel %vm2144_vm2, %v5467_v18, 0.0 }
 0x2c4   :  { %4003 = vpow2.f32 %v2211_v6  ;;  %2242 = vadd.xlane.f32.xlu1 %v2241_v34 }
 0x2c7   :  { %v2171_v32 = vpop.xlane.xlu2 %2170  ;;  %v5477_v40 = vpop.xlane.xlu1 %2176 }
 0x2c8   :  { %v2201_v19 = vsub.f32 %v5409_v22, %v2171_v32 }
 0x2ca   :  { %v5471_v54 = vpop.eup %4003  ;;  %v2225_v1 = vmul.f32 1.442695, %v2201_v19 }
 0x2cb   :  { %v2244_v33 = vsel %vm2144_vm2, %v5471_v54, 0.0 }
 0x2cc   :  { %2245 = vadd.xlane.f32.xlu0 %v2244_v33 }
 0x2cf   :  { %v5475_v63 = vpop.xlane.xlu0 %2173  ;;  %v2153_v43 = vpop.xlane.xlu2 %2152 }
 0x2d0   :  { %v2195_v4 = vsub.f32 %v1959_v25, %v2153_v43  ;;  %v2183_v49 = vpop.xlane.xlu1 %2182  ;;  %v2202_v34 = vsub.f32 %v5420_v26, %v5475_v63 }
 0x2d2   :  { %v2213_v23 = vmul.f32 1.442695, %v2195_v4  ;;  %v2227_v43 = vmul.f32 1.442695, %v2202_v34 }
 0x2d4   :  { %4005 = vpow2.f32 %v2213_v23 }
 0x2d7   :  { %v2156_v59 = vpop.xlane.xlu0 %2155  ;;  %v2180_v12 = vpop.xlane.xlu2 %2179 }
 0x2d8   :  { %v2196_v56 = vsub.f32 %v1961_v20, %v2156_v59  ;;  %v2204_v22 = vsub.f32 %v5426_v28, %v2180_v12 }
 0x2da   :  { %v2215_v0 = vmul.f32 1.442695, %v2196_v56  ;;  %v5479_v30 = vpop.eup %4005  ;;  %v2231_v17 = vmul.f32 1.442695, %v2204_v22 }
 0x2db   :  { %v2247_v35 = vsel %vm2144_vm2, %v5479_v30, 0.0 }
 0x2dc   :  { %4007 = vpow2.f32 %v2215_v0  ;;  %2248 = vadd.xlane.f32.xlu2 %v2247_v35  ;;  %v2203_v0 = vsub.f32 %v5411_v13, %v5477_v40 }
 0x2df   :  { %v2159_v58 = vpop.xlane.xlu0 %2158  ;;  %v2186_v41 = vpop.xlane.xlu2 %2185 }
 0x2e0   :  { %v2197_v2 = vsub.f32 %v1989_v44, %v2159_v58  ;;  %v2206_v16 = vsub.f32 %v5431_v38, %v2186_v41 }
 0x2e2   :  { %v2217_v27 = vmul.f32 1.442695, %v2197_v2  ;;  %v5483_v42 = vpop.eup %4007  ;;  %v2162_v46 = vpop.xlane.xlu1 %2161  ;;  %v2235_v36 = vmul.f32 1.442695, %v2206_v16 }
 0x2e3   :  { %v2250_v39 = vsel %vm2144_vm2, %v5483_v42, 0.0  ;;  %v2198_v47 = vsub.f32 %v1991_v21, %v2162_v46 }
 0x2e4   :  { %4009 = vpow2.f32 %v2217_v27  ;;  %2251 = vadd.xlane.f32.xlu1 %v2250_v39 }
 0x2e5   :  { %v2219_v15 = vmul.f32 1.442695, %v2198_v47 }
 0x2e7   :  { %4011 = vpow2.f32 %v2219_v15 }
 0x2ea   :  { %v5487_v25 = vpop.eup %4009  ;;  %v2165_v55 = vpop.xlane.xlu2 %2164 }
 0x2eb   :  { %v2253_v10 = vsel %vm2144_vm2, %v5487_v25, 0.0  ;;  %v2199_v31 = vsub.f32 %v5437_v29, %v2165_v55  ;;  %v2205_v29 = vsub.f32 %v5417_v3, %v2183_v49  ;;  %v2229_v49 = vmul.f32 1.442695, %v2203_v0 }
 0x2ec   :  { %2254 = vadd.xlane.f32.xlu0 %v2253_v10 }
 0x2ed   :  { %v5492_v20 = vpop.eup %4011  ;;  %v2221_v53 = vmul.f32 1.442695, %v2199_v31  ;;  %v2233_v9 = vmul.f32 1.442695, %v2205_v29 }
 0x2ee   :  { %v2256_v44 = vsel %vm2144_vm2, %v5492_v20, 0.0 }
 0x2ef   :  { %4013 = vpow2.f32 %v2221_v53  ;;  %2257 = vadd.xlane.f32.xlu1 %v2256_v44 }
 0x2f0   :  { %4015 = vpow2.f32 %v2235_v36 }
 0x2f2   :  { %v2168_v8 = vpop.xlane.xlu2 %2167 }
 0x2f3   :  { %v2200_v21 = vsub.f32 %v5441_v24, %v2168_v8 }
 0x2f5   :  { %v5499_v61 = vpop.eup %4013  ;;  %v2223_v52 = vmul.f32 1.442695, %v2200_v21 }
 0x2f6   :  { %v2259_v38 = vsel %vm2144_vm2, %v5499_v61, 0.0  ;;  %v5504_v57 = vpop.eup %4015 }
 0x2f7   :  { %4017 = vpow2.f32 %v2223_v52  ;;  %2260 = vadd.xlane.f32.xlu2 %v2259_v38  ;;  %v2280_v3 = vsel %vm2144_vm2, %v5504_v57, 0.0 }
 0x2f8   :  { %4019 = vpow2.f32 %v2225_v1 }
 0x2f9   :  { %4021 = vpow2.f32 %v2233_v9 }
 0x2fa   :  { %4023 = vpow2.f32 %v2231_v17  ;;  %v5551_v16 = vpop.permute.xlu2 %3992 }
 0x2fd   :  { %v5506_v7 = vpop.eup %4017 }
 0x2fe   :  { %v2262_v24 = vsel %vm2144_vm2, %v5506_v7, 0.0  ;;  %v5513_v51 = vpop.eup %4019 }
 0x2ff   :  { %2281 = vadd.xlane.f32.xlu2 %v2280_v3  ;;  %2263 = vadd.xlane.f32.xlu0 %v2262_v24  ;;  %v5515_v60 = vpop.eup %4021  ;;  %v2265_v32 = vsel %vm2144_vm2, %v5513_v51, 0.0 }
 0x300   :  { %v2277_v33 = vsel %vm2144_vm2, %v5515_v60, 0.0  ;;  %v5526_v4 = vpop.eup %4023 }
 0x301   :  { %v2274_v26 = vsel %vm2144_vm2, %v5526_v4, 0.0 }
 0x302   :  { %v2192_v14 = vpop.xlane.xlu1 %2191 }
 0x303   :  { %v2208_v6 = vsub.f32 %v5449_v50, %v2192_v14 }
 0x305   :  { %v2239_v28 = vmul.f32 1.442695, %v2208_v6 }
 0x307   :  { %4025 = vpow2.f32 %v2239_v28  ;;  %2266 = vadd.xlane.f32.xlu2 %v2265_v32  ;;  %2278 = vadd.xlane.f32.xlu0 %v2277_v33 }
 0x308   :  { %3997 = vrot.lane.b32.xlu1 %v5461_v5, %s4353_s1  ;;  %4027 = vpow2.f32 %v2227_v43  ;;  %v2189_v5 = vpop.xlane.xlu0 %2188 }
 0x309   :  { %v2207_v56 = vsub.f32 %v5445_v11, %v2189_v5 }
 0x30b   :  { %v2237_v12 = vmul.f32 1.442695, %v2207_v56 }
 0x30d   :  { %v5528_v50 = vpop.eup %4025  ;;  %4029 = vpow2.f32 %v2237_v12 }
 0x30e   :  { %v2286_v63 = vsel %vm2144_vm2, %v5528_v50, 0.0  ;;  %v5534_v23 = vpop.eup %4027  ;;  %4031 = vpow2.f32 %v2229_v49 }
 0x30f   :  { %2275 = vadd.xlane.f32.xlu2 %v2274_v26  ;;  %2287 = vadd.xlane.f32.xlu0 %v2286_v63  ;;  %v2268_v59 = vsel %vm2144_vm2, %v5534_v23, 0.0 }
 0x310   :  { %v5547_v27 = vpop.permute.xlu0 %3987 }
 0x313   :  { %v5541_v35 = vpop.eup %4029 }
 0x314   :  { %v2283_v58 = vsel %vm2144_vm2, %v5541_v35, 0.0  ;;  %v5545_v2 = vpop.eup %4031 }
 0x315   :  { %v2271_v11 = vsel %vm2144_vm2, %v5545_v2, 0.0 }
 0x317   :  { %2269 = vadd.xlane.f32.xlu0 %v2268_v59 }
 0x332   :  { %2284 = vadd.xlane.f32.xlu1 %v2283_v58 }
 0x337   :  { %v2243_v41 = vpop.xlane.xlu1 %2242 }
 0x338   :  { %4033 = vrcp.f32 %v2243_v41  ;;  %v2300_v15 = vand.u32 2147483648, %v2243_v41  ;;  %vm2294_vm4 = vweird.f32 %v2243_v41  ;;  %v2298_v55 = vand.u32 2147483647, %v2243_v41 }
 0x33a   :  { %2272 = vadd.xlane.f32.xlu1 %v2271_v11  ;;  %v2301_v36 = vor.u32 1.1754944e-38, %v2300_v15  ;;  %vm2299_vm6 = vcmp.eq.f32.partialorder %v2298_v55, 8.507059e+37 }
 0x33e   :  { %v4034_v13 = vpop.eup %4033 }
 0x33f   :  { %v2290_v40 = vmul.f32 %v4034_v13, %v2243_v41  ;;  %v2246_v39 = vpop.xlane.xlu0 %2245  ;;  %vm2295_vm3 = vweird.f32 %v4034_v13 }
 0x340   :  { %4035 = vrcp.f32 %v2246_v39  ;;  %vm2296_vm5 = vmor %vm2294_vm4, %vm2295_vm3  ;;  %v2314_v19 = vand.u32 2147483648, %v2246_v39  ;;  %v2312_v52 = vand.u32 2147483647, %v2246_v39  ;;  %vm2308_vm8 = vweird.f32 %v2246_v39 }
 0x341   :  { %v2291_v46 = vsub.f32 1.0, %v2290_v40 }
 0x342   :  { %v2315_v9 = vor.u32 1.1754944e-38, %v2314_v19  ;;  %vm2313_vm10 = vcmp.eq.f32.partialorder %v2312_v52, 8.507059e+37 }
 0x343   :  { %v2292_v47 = vmul.f32 %v4034_v13, %v2291_v46 }
 0x345   :  { %v2293_v10 = vadd.f32 %v4034_v13, %v2292_v47 }
 0x346   :  { %v4036_v31 = vpop.eup %4035 }
 0x347   :  { %v2297_v53 = vsel %vm2296_vm5, %v4034_v13, %v2293_v10  ;;  %v2304_v44 = vmul.f32 %v4036_v31, %v2246_v39  ;;  %vm2309_vm7 = vweird.f32 %v4036_v31 }
 0x348   :  { %v2302_v21 = vsel %vm2299_vm6, %v2301_v36, %v2297_v53  ;;  %vm2310_vm9 = vmor %vm2308_vm8, %vm2309_vm7 }
 0x349   :  { %v2305_v8 = vsub.f32 1.0, %v2304_v44  ;;  %v2513_v38 = vmul.f32 %v5467_v18, %v2302_v21 }
 0x34b   :  { %v2306_v29 = vmul.f32 %v4036_v31, %v2305_v8  ;;  %v2529_v17 = vpack.c.bf16 %v2513_v38, %v2513_v38  ;;  %v3995_v38 = vunpack.i.h.bf16 %v5551_v16 }
 0x34d   :  { %v2307_v1 = vadd.f32 %v4036_v31, %v2306_v29  ;;  %v2547_v34 = vunpack.c.l.b16 %v2529_v17 }
 0x34f   :  { %v2311_v22 = vsel %vm2310_vm9, %v4036_v31, %v2307_v1  ;;  %v2249_v3 = vpop.xlane.xlu2 %2248 }
 0x350   :  { %v2316_v24 = vsel %vm2313_vm10, %v2315_v9, %v2311_v22  ;;  %4037 = vrcp.f32 %v2249_v3  ;;  %v2328_v59 = vand.u32 2147483648, %v2249_v3  ;;  %vm2322_vm12 = vweird.f32 %v2249_v3 }
 0x351   :  { %v2514_v14 = vmul.f32 %v5471_v54, %v2316_v24  ;;  %v2326_v56 = vand.u32 2147483647, %v2249_v3  ;;  %v3994_v9 = vunpack.i.l.bf16 %v5551_v16 }
 0x352   :  { %v2329_v58 = vor.u32 1.1754944e-38, %v2328_v59 }
 0x353   :  { %v2530_v6 = vpack.c.bf16 %v2514_v14, %v2514_v14  ;;  %vm2327_vm14 = vcmp.eq.f32.partialorder %v2326_v56, 8.507059e+37  ;;  %v1561_v14 = vrot.slane %v5454_v48, 4 }
 0x355   :  { %v2548_v28 = vunpack.c.l.b16 %v2530_v6  ;;  %v1615_v6 = vrot.slane %v3995_v38, 4  ;;  %v1562_v16 = vsel %vm455_vm0, %v3994_v9, %v1561_v14 }
 0x356   :  { %v4038_v32 = vpop.eup %4037 }
 0x357   :  { %v2318_v33 = vmul.f32 %v4038_v32, %v2249_v3  ;;  %v2252_v43 = vpop.xlane.xlu1 %2251  ;;  %v2549_v26 = vpack.c.b16 %v2548_v28, %v2547_v34  ;;  %vm2323_vm11 = vweird.f32 %v4038_v32 }
 0x358   :  { %4039 = vrcp.f32 %v2252_v43  ;;  %vm2324_vm13 = vmor %vm2322_vm12, %vm2323_vm11  ;;  %v2342_v13 = vand.u32 2147483648, %v2252_v43  ;;  %v2340_v39 = vand.u32 2147483647, %v2252_v43  ;;  %vm2336_vm3 = vweird.f32 %v2252_v43 }
 0x359   :  { %v2319_v18 = vsub.f32 1.0, %v2318_v33  ;;  %3652 = vmatmul.msk.bf16.vlgmr.msra.gmra.mxu0 %vm2144_vm2, %v2549_v26 }
 0x35a   :  { %v2343_v55 = vor.u32 1.1754944e-38, %v2342_v13  ;;  %vm2341_vm5 = vcmp.eq.f32.partialorder %v2340_v39, 8.507059e+37 }
 0x35b   :  { %v2320_v63 = vmul.f32 %v4038_v32, %v2319_v18 }
 0x35d   :  { %v2321_v5 = vadd.f32 %v4038_v32, %v2320_v63 }
 0x35e   :  { %v4040_v12 = vpop.eup %4039 }
 0x35f   :  { %v2325_v54 = vsel %vm2324_vm13, %v4038_v32, %v2321_v5  ;;  %v2332_v0 = vmul.f32 %v4040_v12, %v2252_v43  ;;  %v2255_v49 = vpop.xlane.xlu0 %2254  ;;  %vm2337_vm15 = vweird.f32 %v4040_v12  ;;  %v1559_v32 = vrot.slane %v3994_v9, 4 }
 0x360   :  { %4041 = vrcp.f32 %v2255_v49  ;;  %v2330_v11 = vsel %vm2327_vm14, %v2329_v58, %v2325_v54  ;;  %vm2338_vm4 = vmor %vm2336_vm3, %vm2337_vm15  ;;  %v2356_v33 = vand.u32 2147483648, %v2255_v49  ;;  %vm2350_vm7 = vweird.f32 %v2255_v49 }
 0x361   :  { %v2333_v41 = vsub.f32 1.0, %v2332_v0  ;;  %v2515_v47 = vmul.f32 %v5479_v30, %v2330_v11  ;;  %v2354_v26 = vand.u32 2147483647, %v2255_v49  ;;  %v5599_v58 = vperm.slane %v1562_v16, %v4503_v37 }
 0x362   :  { %v5556_v46 = vpop.xlane.xlu1 %2257 }
 0x363   :  { %v2334_v40 = vmul.f32 %v4040_v12, %v2333_v41  ;;  %4043 = vrcp.f32 %v5556_v46  ;;  %v2531_v36 = vpack.c.bf16 %v2515_v47, %v2515_v47  ;;  %v2357_v41 = vor.u32 1.1754944e-38, %v2356_v33 }
 0x364   :  { %vm2355_vm9 = vcmp.eq.f32.partialorder %v2354_v26, 8.507059e+37  ;;  %vm2364_vm11 = vweird.f32 %v5556_v46  ;;  %v2368_v47 = vand.u32 2147483647, %v5556_v46 }
 0x365   :  { %v2335_v15 = vadd.f32 %v4040_v12, %v2334_v40  ;;  %v2575_v22 = vunpack.c.l.b16 %v2531_v36  ;;  %v2370_v40 = vand.u32 2147483648, %v5556_v46 }
 0x366   :  { %v4042_v10 = vpop.eup %4041  ;;  %vm2369_vm13 = vcmp.eq.f32.partialorder %v2368_v47, 8.507059e+37 }
 0x367   :  { %v2339_v31 = vsel %vm2338_vm4, %v4040_v12, %v2335_v15  ;;  %v2346_v53 = vmul.f32 %v4042_v10, %v2255_v49  ;;  %vm2351_vm6 = vweird.f32 %v4042_v10  ;;  %v1616_v12 = vsel %vm455_vm0, %v1615_v6, %v5457_v45 }
 0x368   :  { %v2344_v44 = vsel %vm2341_vm5, %v2343_v55, %v2339_v31  ;;  %vm5578_vm8 = vmor %vm2350_vm7, %vm2351_vm6  ;;  %v1560_v49 = vsel %vm455_vm0, %v1559_v32, %v5454_v48  ;;  %v3990_v31 = vunpack.i.h.bf16 %v5547_v27 }
 0x369   :  { %v2516_v8 = vmul.f32 %v5483_v42, %v2344_v44  ;;  %v2347_v21 = vsub.f32 1.0, %v2346_v53  ;;  %v5561_v19 = vpop.eup %4043  ;;  %v1617_v42 = vrot.slane %v5457_v45, 4  ;;  %v5605_v45 = vperm.slane %v1616_v12, %v4503_v37 }
 0x36a   :  { %v2360_v52 = vmul.f32 %v5561_v19, %v5556_v46  ;;  %v5565_v30 = vpop.xlane.xlu2 %2260  ;;  %vm2365_vm10 = vweird.f32 %v5561_v19  ;;  %v5609_v48 = vperm.slane %v1560_v49, %v4503_v37  ;;  %v3989_v53 = vunpack.i.l.bf16 %v5547_v27 }
 0x36b   :  { %v2532_v29 = vpack.c.bf16 %v2516_v8, %v2516_v8  ;;  %v2348_v1 = vmul.f32 %v4042_v10, %v2347_v21  ;;  %4045 = vrcp.f32 %v5565_v30  ;;  %v1618_v28 = vsel %vm455_vm0, %v3995_v38, %v1617_v42  ;;  %vm5614_vm12 = vmor %vm2364_vm11, %vm2365_vm10 }
 0x36c   :  { %v2361_v24 = vsub.f32 1.0, %v2360_v52  ;;  %v5594_v0 = vperm.slane %v1618_v28, %v4503_v37  ;;  %v1641_v46 = vrot.slane %v5605_v45, 4  ;;  %v1597_v8 = vrot.slane %v5599_v58, 4 }
 0x36d   :  { %v2576_v3 = vunpack.c.l.b16 %v2532_v29  ;;  %v2349_v34 = vadd.f32 %v4042_v10, %v2348_v1  ;;  %v2371_v21 = vor.u32 1.1754944e-38, %v2370_v40  ;;  %v1585_v9 = vrot.slane %v5609_v48, 4 }
 0x36e   :  { %v2362_v18 = vmul.f32 %v5561_v19, %v2361_v24  ;;  %v1653_v15 = vrot.slane %v5594_v0, 4  ;;  %v5647_v14 = vrot.slane %v3989_v53, 4  ;;  %vm2378_vm14 = vweird.f32 %v5565_v30 }
 0x36f   :  { %v2577_v17 = vpack.c.b16 %v2576_v3, %v2575_v22  ;;  %v2353_v54 = vsel %vm5578_vm8, %v4042_v10, %v2349_v34 }
 0x370   :  { %v2363_v11 = vadd.f32 %v5561_v19, %v2362_v18  ;;  %v2358_v13 = vsel %vm2355_vm9, %v2357_v41, %v2353_v54 }
 0x371   :  { %3653 = vmatmul.msk.bf16.vlgmr.msra.gmra.mxu1 %vm2144_vm2, %v2577_v17  ;;  %v5574_v43 = vpop.eup %4045  ;;  %v2517_v44 = vmul.f32 %v5487_v25, %v2358_v13  ;;  %v2382_v25 = vand.u32 2147483647, %v5565_v30  ;;  %v1629_v17 = vrot.slane %v3990_v31, 4 }
 0x372   :  { %v2374_v59 = vmul.f32 %v5574_v43, %v5565_v30  ;;  %v5584_v5 = vpop.xlane.xlu2 %2281  ;;  %v5586_v56 = vpop.xlane.xlu0 %2263  ;;  %v2367_v36 = vsel %vm5614_vm12, %v5561_v19, %v2363_v11  ;;  %v2384_v19 = vand.u32 2147483648, %v5565_v30  ;;  %vm2379_vm15 = vweird.f32 %v5574_v43 }
 0x373   :  { %4047 = vrcp.f32 %v5584_v5  ;;  %v2372_v22 = vsel %vm2369_vm13, %v2371_v21, %v2367_v36  ;;  %v2533_v6 = vpack.c.bf16 %v2517_v44, %v2517_v44  ;;  %vm5654_vm3 = vcmp.eq.f32.partialorder %v2382_v25, 8.507059e+37  ;;  %vm5664_vm4 = vmor %vm2378_vm14, %vm2379_vm15 }
 0x374   :  { %4049 = vrcp.f32 %v5586_v56  ;;  %v2375_v39 = vsub.f32 1.0, %v2374_v59  ;;  %v2518_v32 = vmul.f32 %v5492_v20, %v2372_v22  ;;  %v2385_v16 = vor.u32 1.1754944e-38, %v2384_v19 }
 0x375   :  { %v2480_v63 = vand.u32 2147483647, %v5584_v5  ;;  %v2482_v59 = vand.u32 2147483648, %v5584_v5  ;;  %v5662_v30 = vunpack.c.l.b16 %v2533_v6  ;;  %v2396_v20 = vand.u32 2147483647, %v5586_v56 }
 0x376   :  { %v2376_v29 = vmul.f32 %v5574_v43, %v2375_v39  ;;  %v2398_v39 = vand.u32 2147483648, %v5586_v56  ;;  %v2534_v10 = vpack.c.bf16 %v2518_v32, %v2518_v32  ;;  %vm2476_vm6 = vweird.f32 %v5584_v5 }
 0x377   :  { %vm2392_vm7 = vweird.f32 %v5586_v56  ;;  %vm5694_vm9 = vcmp.eq.f32.partialorder %v2396_v20, 8.507059e+37  ;;  %vm5717_vm11 = vcmp.eq.f32.partialorder %v2480_v63, 8.507059e+37 }
 0x378   :  { %v2377_v34 = vadd.f32 %v5574_v43, %v2376_v29 }
 0x379   :  { %v5618_v55 = vpop.eup %4047 }
 0x37a   :  { %v5629_v52 = vpop.xlane.xlu2 %2266  ;;  %v5631_v38 = vpop.xlane.xlu0 %2278  ;;  %v2472_v3 = vmul.f32 %v5618_v55, %v5584_v5  ;;  %v2381_v13 = vsel %vm5664_vm4, %v5574_v43, %v2377_v34  ;;  %v2483_v43 = vor.u32 1.1754944e-38, %v2482_v59  ;;  %vm2477_vm10 = vweird.f32 %v5618_v55 }
 0x37b   :  { %v5633_v1 = vpop.eup %4049  ;;  %4051 = vrcp.f32 %v5629_v52  ;;  %v5643_v42 = vpop.permute.xlu1 %3997  ;;  %v2386_v19 = vsel %vm5654_vm3, %v2385_v16, %v2381_v13  ;;  %vm5740_vm12 = vmor %vm2476_vm6, %vm2477_vm10  ;;  %vm2462_vm13 = vweird.f32 %v5631_v38  ;;  %vm2406_vm14 = vweird.f32 %v5629_v52 }
 0x37c   :  { %v2388_v24 = vmul.f32 %v5633_v1, %v5586_v56  ;;  %4053 = vrcp.f32 %v5631_v38  ;;  %v4000_v26 = vunpack.i.h.bf16 %v5643_v42  ;;  %v2473_v18 = vsub.f32 1.0, %v2472_v3 }
 0x37d   :  { %vm2393_vm5 = vweird.f32 %v5633_v1  ;;  %v3999_v25 = vunpack.i.l.bf16 %v5643_v42  ;;  %v5713_v16 = vmul.f32 %v5499_v61, %v2386_v19  ;;  %v2604_v61 = vunpack.c.l.b16 %v2534_v10 }
 0x37e   :  { %v2389_v28 = vsub.f32 1.0, %v2388_v24  ;;  %v1627_v49 = vrot.slane %v4000_v26, 4  ;;  %v1630_v41 = vsel %vm455_vm0, %v4000_v26, %v1629_v17  ;;  %v2474_v21 = vmul.f32 %v5618_v55, %v2473_v18  ;;  %vm5690_vm8 = vmor %vm2392_vm7, %vm2393_vm5 }
 0x37f   :  { %v1638_v36 = vperm.slane %v1630_v41, %v4503_v37  ;;  %v2399_v17 = vor.u32 1.1754944e-38, %v2398_v39  ;;  %v1571_v26 = vrot.slane %v3999_v25, 4  ;;  %v2535_v13 = vpack.c.bf16 %v5713_v16, %v5713_v16 }
 0x380   :  { %v2390_v12 = vmul.f32 %v5633_v1, %v2389_v28  ;;  %v1628_v44 = vsel %vm455_vm0, %v1627_v49, %v3990_v31  ;;  %v2410_v39 = vand.u32 2147483647, %v5629_v52  ;;  %v2412_v10 = vand.u32 2147483648, %v5629_v52 }
 0x381   :  { %v5670_v11 = vpop.eup %4051  ;;  %v1634_v31 = vperm.slane %v1628_v44, %v4503_v37  ;;  %v1651_v3 = vrot.slane %v1638_v36, 4  ;;  %v1654_v33 = vsel %vm455_vm0, %v1638_v36, %v1653_v15 }
 0x382   :  { %v2391_v40 = vadd.f32 %v5633_v1, %v2390_v12  ;;  %v5678_v47 = vpop.eup %4053  ;;  %v2402_v42 = vmul.f32 %v5670_v11, %v5629_v52  ;;  %v1662_v15 = vperm.slane %v1654_v33, %v4526_v62  ;;  %vm2407_vm3 = vweird.f32 %v5670_v11 }
 0x383   :  { %v2458_v29 = vmul.f32 %v5678_v47, %v5631_v38  ;;  %v1639_v34 = vrot.slane %v1634_v31, 4  ;;  %v1642_v28 = vsel %vm455_vm0, %v1634_v31, %v1641_v46  ;;  %v1652_v32 = vsel %vm455_vm0, %v1651_v3, %v5594_v0  ;;  %vm5818_vm7 = vmor %vm2406_vm14, %vm2407_vm3 }
 0x384   :  { %v2395_v24 = vsel %vm5690_vm8, %v5633_v1, %v2391_v40  ;;  %v2475_v1 = vadd.f32 %v5618_v55, %v2474_v21  ;;  %v1650_v59 = vperm.slane %v1642_v28, %v4526_v62  ;;  %v1658_v0 = vperm.slane %v1652_v32, %v4526_v62 }
 0x385   :  { %v2459_v6 = vsub.f32 1.0, %v2458_v29  ;;  %v1640_v46 = vsel %vm455_vm0, %v1639_v34, %v5605_v45  ;;  %v2400_v12 = vsel %vm5694_vm9, %v2399_v17, %v2395_v24  ;;  %v2403_v54 = vsub.f32 1.0, %v2402_v42 }
 0x386   :  { %v5729_v20 = vperm.slane %v1640_v46, %v4526_v62  ;;  %v5732_v49 = vrot.slane %v1650_v59, 4  ;;  %v1667_v41 = vrot.slane %v1658_v0, 4  ;;  %v1669_v45 = vrot.slane %v1662_v15, 4 }
 0x387   :  { %v2460_v63 = vmul.f32 %v5678_v47, %v2459_v6  ;;  %v2479_v44 = vsel %vm5740_vm12, %v5618_v55, %v2475_v1  ;;  %v2520_v36 = vmul.f32 %v5506_v7, %v2400_v12  ;;  %v1572_v21 = vsel %vm455_vm0, %v1571_v26, %v3989_v53  ;;  %v5765_v55 = vpop.xlane.xlu0 %2287 }
 0x388   :  { %v1670_v5 = vsel %vm455_vm0, 0.0, %v1669_v45  ;;  %v2404_v29 = vmul.f32 %v5670_v11, %v2403_v54  ;;  %v1668_v19 = vsel %vm455_vm0, 0.0, %v1667_v41  ;;  %v5761_v22 = vsel %vm455_vm0, %v5732_v49, %v5729_v20 }
 0x389   :  { %v1574_v7 = vsel %vm455_vm0, %v3999_v25, %v5647_v14  ;;  %v2461_v56 = vadd.f32 %v5678_v47, %v2460_v63  ;;  %vm2463_vm15 = vweird.f32 %v5678_v47  ;;  %v1844_v27 = vsel %vm455_vm0, %v1669_v45, %v1658_v0 }
 0x38a   :  { %v1849_v53 = vrot.slane %v1670_v5, 4  ;;  %v2413_v31 = vor.u32 1.1754944e-38, %v2412_v10  ;;  %v2466_v3 = vand.u32 2147483647, %v5631_v38  ;;  %v2468_v24 = vand.u32 2147483648, %v5631_v38  ;;  %vm5790_vm5 = vmor %vm2462_vm13, %vm2463_vm15 }
 0x38b   :  { %v1578_v17 = vperm.slane %v1572_v21, %v4503_v37  ;;  %v1582_v25 = vperm.slane %v1574_v7, %v4503_v37  ;;  %v2605_v42 = vpack.c.b16 %v2604_v61, %v5662_v30  ;;  %v2484_v6 = vsel %vm5717_vm11, %v2483_v43, %v2479_v44 }
 0x38c   :  { %v5775_v14 = vsel %vm455_vm0, %v1849_v53, %v1668_v19  ;;  %v2536_v34 = vpack.c.bf16 %v2520_v36, %v2520_v36  ;;  %v2405_v28 = vadd.f32 %v5670_v11, %v2404_v29  ;;  %vm5782_vm4 = vcmp.eq.f32.partialorder %v2410_v39, 8.507059e+37 }
 0x38d   :  { %v1583_v1 = vrot.slane %v1578_v17, 4  ;;  %v2465_v30 = vsel %vm5790_vm5, %v5678_v47, %v2461_v56  ;;  %v1586_v43 = vsel %vm455_vm0, %v1578_v17, %v1585_v9  ;;  %v1595_v26 = vrot.slane %v1582_v25, 4  ;;  %3654 = vmatmul.msk.bf16.vlgmr.msra.gmra.mxu2 %vm2144_vm2, %v2605_v42  ;;  %v5808_v47 = vpop.xlane.xlu2 %2275 }
 0x38e   :  { %v1598_v18 = vsel %vm455_vm0, %v1582_v25, %v1597_v8  ;;  %v2469_v38 = vor.u32 1.1754944e-38, %v2468_v24  ;;  %v1594_v59 = vperm.slane %v1586_v43, %v4526_v62  ;;  %v2526_v15 = vmul.f32 %v5504_v57, %v2484_v6 }
 0x38f   :  { %v1584_v46 = vsel %vm455_vm0, %v1583_v1, %v5609_v48  ;;  %v1606_v0 = vperm.slane %v1598_v18, %v4526_v62  ;;  %vm2467_vm6 = vcmp.eq.f32.partialorder %v2466_v3, 8.507059e+37  ;;  %v1596_v8 = vsel %vm455_vm0, %v1595_v26, %v5599_v58  ;;  %v5830_v10 = vpop.xlane.xlu0 %2269 }
 0x390   :  { %v1590_v9 = vperm.slane %v1584_v46, %v4526_v62  ;;  %v2470_v61 = vsel %vm2467_vm6, %v2469_v38, %v2465_v30  ;;  %v1602_v12 = vperm.slane %v1596_v8, %v4526_v62  ;;  %v1609_v54 = vrot.slane %v1594_v59, 4 }
 0x391   :  { %v1613_v63 = vrot.slane %v1606_v0, 4  ;;  %v2632_v57 = vunpack.c.l.b16 %v2536_v34  ;;  %v2409_v41 = vsel %vm5818_vm7, %v5670_v11, %v2405_v28  ;;  %4055 = vrcp.f32 %v5808_v47 }
 0x392   :  { %v1607_v45 = vrot.slane %v1590_v9, 4  ;;  %v1610_v58 = vsel %vm455_vm0, 0.0, %v1609_v54  ;;  %v1611_v52 = vrot.slane %v1602_v12, 4  ;;  %v1779_v39 = vsel %vm455_vm0, %v1609_v54, %v1590_v9 }
 0x393   :  { %v1614_v40 = vsel %vm455_vm0, 0.0, %v1613_v63  ;;  %v2525_v44 = vmul.f32 %v5515_v60, %v2470_v61  ;;  %v1663_v36 = vrot.slane %v5729_v20, 4  ;;  %v1666_v5 = vsel %vm455_vm0, 0.0, %v5732_v49 }
 0x394   :  { %v1790_v11 = vsel %vm455_vm0, %v1613_v63, %v1602_v12  ;;  %v1612_v21 = vsel %vm455_vm0, 0.0, %v1611_v52  ;;  %v1795_v19 = vrot.slane %v1614_v40, 4  ;;  %4057 = vrcp.f32 %v5765_v55 }
 0x395   :  { %v5839_v29 = vperm.slane %v1790_v11, %v4503_v37  ;;  %v2414_v7 = vsel %vm5782_vm4, %v2413_v31, %v2409_v41  ;;  %v1783_v60 = vperm.slane %v1779_v39, %v4503_v37  ;;  %v1784_v56 = vrot.slane %v1610_v58, 4 }
 0x396   :  { %4059 = vrcp.f32 %v5830_v10  ;;  %v5847_v20 = vperm.slane %v1844_v27, %v4503_v37  ;;  %v1608_v49 = vsel %vm455_vm0, 0.0, %v1607_v45  ;;  %v1796_v53 = vsel %vm455_vm0, %v1795_v19, %v1612_v21 }
 0x397   :  { %v1815_v3 = vrot.slane %v5839_v29, 4  ;;  %v5852_v24 = vpop.eup %4055  ;;  %v2631_v31 = vunpack.c.l.b16 %v2535_v13  ;;  %v5859_v17 = vperm.slane %v5761_v22, %v4503_v37  ;;  %v1838_v25 = vrot.slane %v1666_v5, 4 }
 0x398   :  { %v1800_v27 = vperm.slane %v1796_v53, %v4503_v37  ;;  %v2542_v42 = vpack.c.bf16 %v2526_v15, %v2526_v15  ;;  %v5863_v6 = vmul.f32 %v5513_v51, %v2414_v7  ;;  %v2541_v34 = vpack.c.bf16 %v2525_v44, %v2525_v44 }
 0x399   :  { %v1664_v28 = vsel %vm455_vm0, 0.0, %v1663_v36  ;;  %v2633_v32 = vpack.c.b16 %v2632_v57, %v2631_v31  ;;  %v1785_v33 = vsel %vm455_vm0, %v1784_v56, %v1608_v49  ;;  %v1803_v1 = vrot.slane %v1783_v60, 4 }
 0x39a   :  { %v1816_v16 = vsel %vm455_vm0, %v1800_v27, %v1815_v3  ;;  %v5868_v13 = vpop.eup %4057  ;;  %v1854_v22 = vperm.slane %v5775_v14, %v4503_v37  ;;  %v1869_v30 = vrot.slane %v5847_v20, 4  ;;  %v2444_v51 = vmul.f32 %v5852_v24, %v5808_v47 }
 0x39b   :  { %3655 = vmatmul.msk.bf16.vlgmr.msrb.gmra.mxu3 %vm2144_vm2, %v2633_v32  ;;  %v1789_v26 = vperm.slane %v1785_v33, %v4503_v37  ;;  %v1824_v18 = vperm.slane %v1816_v16, %v4526_v62  ;;  %v1839_v38 = vsel %vm455_vm0, %v1838_v25, %v1664_v28  ;;  %v1857_v46 = vrot.slane %v5859_v17, 4 }
 0x39c   :  { %v4060_v43 = vpop.eup %4059  ;;  %v5880_v59 = vunpack.c.l.b16 %v2542_v42  ;;  %v2537_v14 = vpack.c.bf16 %v5863_v6, %v5863_v6  ;;  %v5884_v0 = vunpack.c.l.b16 %v2541_v34  ;;  %v2500_v9 = vmul.f32 %v5868_v13, %v5765_v55 }
 0x39d   :  { %v2416_v15 = vmul.f32 %v4060_v43, %v5830_v10  ;;  %v1804_v8 = vsel %vm455_vm0, %v1789_v26, %v1803_v1  ;;  %v1829_v48 = vrot.slane %v1824_v18, 4  ;;  %v1843_v61 = vperm.slane %v1839_v38, %v4503_v37 }
 0x39e   :  { %v2424_v54 = vand.u32 2147483647, %v5830_v10  ;;  %v2426_v63 = vand.u32 2147483648, %v5830_v10  ;;  %v1812_v57 = vperm.slane %v1804_v8, %v4526_v62  ;;  %v2445_v41 = vsub.f32 1.0, %v2444_v51 }
 0x39f   :  { %v2417_v12 = vsub.f32 1.0, %v2416_v15  ;;  %v1858_v45 = vsel %vm455_vm0, %v1843_v61, %v1857_v46  ;;  %v1870_v58 = vsel %vm455_vm0, %v1854_v22, %v1869_v30  ;;  %v1801_v52 = vrot.slane %v1789_v26, 4 }
 0x3a0   :  { %vm2420_vm8 = vweird.f32 %v5830_v10  ;;  %vm2421_vm9 = vweird.f32 %v4060_v43  ;;  %v1830_v39 = vsel %vm455_vm0, %v1829_v48, %v1812_v57  ;;  %v1866_v37 = vperm.slane %v1858_v45, %v4526_v62 }
 0x3a1   :  { %v2418_v40 = vmul.f32 %v4060_v43, %v2417_v12  ;;  %v1878_v44 = vperm.slane %v1870_v58, %v4526_v62  ;;  %v1899_v36 = vpack.c.bf16 %v1830_v39, %v1830_v39  ;;  %v1802_v5 = vsel %vm455_vm0, %v1801_v52, %v1783_v60  ;;  %vm2422_vm11 = vmor %vm2420_vm8, %vm2421_vm9 }
 0x3a2   :  { %v2501_v11 = vsub.f32 1.0, %v2500_v9  ;;  %vm2425_vm10 = vcmp.eq.f32.partialorder %v2424_v54, 8.507059e+37  ;;  %v2427_v19 = vor.u32 1.1754944e-38, %v2426_v63  ;;  %v1808_v56 = vperm.slane %v1802_v5, %v4526_v62 }
 0x3a3   :  { %v2419_v21 = vadd.f32 %v4060_v43, %v2418_v40  ;;  %v1883_v7 = vrot.slane %v1878_v44, 4  ;;  %v1813_v49 = vrot.slane %v1800_v27, 4  ;;  %v1855_v10 = vrot.slane %v1843_v61, 4 }
 0x3a4   :  { %v2720_v31 = vunpack.c.l.b16 %v1899_v36  ;;  %v1867_v25 = vrot.slane %v1854_v22, 4  ;;  %v1831_v42 = vrot.slane %v1812_v57, 4  ;;  %v2446_v30 = vmul.f32 %v5852_v24, %v2445_v41 }
 0x3a5   :  { %v5902_v53 = vpop.xlane.xlu1 %2284  ;;  %v2423_v3 = vsel %vm2422_vm11, %v4060_v43, %v2419_v21  ;;  %v1884_v28 = vsel %vm455_vm0, %v1883_v7, %v1866_v37  ;;  %v1814_v60 = vsel %vm455_vm0, %v1813_v49, %v5839_v29  ;;  %v1856_v32 = vsel %vm455_vm0, %v1855_v10, %v5859_v17 }
 0x3a6   :  { %v2428_v34 = vsel %vm2425_vm10, %v2427_v19, %v2423_v3  ;;  %v1900_v1 = vpack.c.bf16 %v1884_v28, %v1884_v28  ;;  %v1820_v27 = vperm.slane %v1814_v60, %v4526_v62  ;;  %v1862_v16 = vperm.slane %v1856_v32, %v4526_v62 }
 0x3a7   :  { %v2522_v33 = vmul.f32 %v5534_v23, %v2428_v34  ;;  %v1868_v22 = vsel %vm455_vm0, %v1867_v25, %v5847_v20  ;;  %v1832_v51 = vsel %vm455_vm0, %v1824_v18, %v1831_v42  ;;  %v1885_v43 = vrot.slane %v1866_v37, 4 }
 0x3a8   :  { %v2502_v29 = vmul.f32 %v5868_v13, %v2501_v11  ;;  %v2721_v26 = vunpack.c.l.b16 %v1900_v1  ;;  %v1825_v38 = vrot.slane %v1820_v27, 4  ;;  %v1874_v17 = vperm.slane %v1868_v22, %v4526_v62 }
 0x3a9   :  { %v1886_v23 = vsel %vm455_vm0, %v1878_v44, %v1885_v43  ;;  %v1901_v46 = vpack.c.bf16 %v1832_v51, %v1832_v51  ;;  %v1827_v15 = vrot.slane %v1808_v56, 4  ;;  %v1881_v9 = vrot.slane %v1862_v16, 4 }
 0x3aa   :  { %v2538_v8 = vpack.c.bf16 %v2522_v33, %v2522_v33  ;;  %v2722_v48 = vpack.c.b16 %v2721_v26, %v2720_v31  ;;  %v1826_v61 = vsel %vm455_vm0, %v1825_v38, %v1808_v56  ;;  %v1879_v12 = vrot.slane %v1874_v17, 4 }
 0x3ab   :  { %v1895_v20 = vpack.c.bf16 %v1826_v61, %v1826_v61  ;;  %v1902_v54 = vpack.c.bf16 %v1886_v23, %v1886_v23  ;;  %v2748_v18 = vunpack.c.l.b16 %v1901_v46  ;;  %v1828_v63 = vsel %vm455_vm0, %v1820_v27, %v1827_v15  ;;  %v3852_v15 = vld [vmem:[#allocation10] sm:$0xff] }
 0x3ac   :  { %2734 = vmatpush.bf16.msrb.mxu2 %v2722_v48  ;;  %v1880_v57 = vsel %vm455_vm0, %v1879_v12, %v1862_v16  ;;  %v2717_v62 = vpack.c.b16 %v5880_v59, %v5884_v0  ;;  %v1882_v41 = vsel %vm455_vm0, %v1874_v17, %v1881_v9  ;;  %v1897_v45 = vpack.c.bf16 %v1828_v63, %v1828_v63  ;;  %v3853_v17 = vld [vmem:[#allocation10 + $0x8] sm:$0xff] }
 0x3ad   :  { %v1896_v58 = vpack.c.bf16 %v1880_v57, %v1880_v57  ;;  %v2664_v52 = vunpack.c.l.b16 %v1895_v20  ;;  %v2749_v40 = vunpack.c.l.b16 %v1902_v54  ;;  %v1898_v39 = vpack.c.bf16 %v1882_v41, %v1882_v41  ;;  %v5925_v37 = vpop.xlane.xlu1 %2272 }
 0x3ae   :  { %v2660_v44 = vunpack.c.l.b16 %v2538_v8  ;;  %v2692_v36 = vunpack.c.l.b16 %v1897_v45  ;;  %4061 = vrcp.f32 %v5902_v53  ;;  %v2659_v5 = vunpack.c.l.b16 %v2537_v14 }
 0x3af   :  { %v2665_v11 = vunpack.c.l.b16 %v1896_v58  ;;  %v2750_v21 = vpack.c.b16 %v2749_v40, %v2748_v18  ;;  %3658 = vmatmul.msk.bf16.vlgmr.msrb.gmra.mxu2 %vm2144_vm2, %v2717_v62  ;;  %v2693_v59 = vunpack.c.l.b16 %v1898_v39  ;;  %vm2449_vm0 = vweird.f32 %v5852_v24  ;;  %v3855_v58 = vld [vmem:[#allocation10 + $0x18] sm:$0xff]  ;;  %v3854_v40 = vld [vmem:[#allocation10 + $0x10] sm:$0xff] }
 0x3b0   :  { %v2503_v0 = vadd.f32 %v5868_v13, %v2502_v29  ;;  %vm2505_vm12 = vweird.f32 %v5868_v13  ;;  %4063 = vrcp.f32 %v5925_v37  ;;  %v2447_v19 = vadd.f32 %v5852_v24, %v2446_v30 }
 0x3b1   :  { %v2510_v7 = vand.u32 2147483648, %v5765_v55  ;;  %v2666_v56 = vpack.c.b16 %v2665_v11, %v2664_v52  ;;  %2762 = vmatpush.bf16.msra.mxu3 %v2750_v21  ;;  %v2694_v6 = vpack.c.b16 %v2693_v59, %v2692_v36  ;;  %v2454_v14 = vand.u32 2147483648, %v5808_v47 }
 0x3b2   :  { %vm2504_vm13 = vweird.f32 %v5765_v55  ;;  %v2508_v49 = vand.u32 2147483647, %v5765_v55  ;;  %v2661_v10 = vpack.c.b16 %v2660_v44, %v2659_v5  ;;  %vm2448_vm14 = vweird.f32 %v5808_v47 }
 0x3b3   :  { %v2452_v3 = vand.u32 2147483647, %v5808_v47  ;;  %vm2506_vm15 = vmor %vm2504_vm13, %vm2505_vm12  ;;  %2678 = vmatpush.bf16.msrb.mxu0 %v2666_v56  ;;  %2706 = vmatpush.bf16.msrb.mxu1 %v2694_v6  ;;  %v2511_v34 = vor.u32 1.1754944e-38, %v2510_v7  ;;  %v2455_v60 = vor.u32 1.1754944e-38, %v2454_v14  ;;  %v2496_v27 = vand.u32 2147483648, %v5902_v53  ;;  %v3857_v56 = vld [vmem:[#allocation10 + $0x28] sm:$0xff] }
 0x3b4   :  { %v4062_v31 = vpop.eup %4061  ;;  %vm2450_vm3 = vmor %vm2448_vm14, %vm2449_vm0  ;;  %v2507_v25 = vsel %vm2506_vm15, %v5868_v13, %v2503_v0  ;;  %vm2509_vm4 = vcmp.eq.f32.partialorder %v2508_v49, 8.507059e+37  ;;  %vm2490_vm7 = vweird.f32 %v5902_v53  ;;  %v2440_v22 = vand.u32 2147483648, %v5925_v37  ;;  %2927 = vmatpush.bf16.msra.mxu2 %v3857_v56  ;;  %v3856_v6 = vld [vmem:[#allocation10 + $0x20] sm:$0xff]  ;;  %v3859_v14 = vld [vmem:[#allocation10 + $0x38] sm:$0xff] }
 0x3b5   :  { %v2451_v42 = vsel %vm2450_vm3, %v5852_v24, %v2447_v19  ;;  %v2486_v28 = vmul.f32 %v4062_v31, %v5902_v53  ;;  %vm2453_vm5 = vcmp.eq.f32.partialorder %v2452_v3, 8.507059e+37  ;;  %v2512_v47 = vsel %vm2509_vm4, %v2511_v34, %v2507_v25  ;;  %2983 = vmatpush.bf16.msrb.mxu3 %v3859_v14  ;;  %v3858_v49 = vld [vmem:[#allocation10 + $0x30] sm:$0xff]  ;;  %v4085_v14 = vld [vmem:[#allocation2 + $0x8] sm:$0xff] }
 0x3b6   :  { %v4064_v55 = vpop.eup %4063  ;;  %3656 = vmatmul.msk.bf16.vlgmr.msrb.gmra.mxu0 %vm2144_vm2, %v2661_v10  ;;  %v2456_v1 = vsel %vm2453_vm5, %v2455_v60, %v2451_v42  ;;  %vm2491_vm6 = vweird.f32 %v4062_v31  ;;  %v2494_v24 = vand.u32 2147483647, %v5902_v53  ;;  %v2528_v30 = vmul.f32 %v5528_v50, %v2512_v47 }
 0x3b7   :  { %v2487_v32 = vsub.f32 1.0, %v2486_v28  ;;  %v2430_v33 = vmul.f32 %v4064_v55, %v5925_v37  ;;  %vm2435_vm8 = vweird.f32 %v4064_v55  ;;  %v2438_v29 = vand.u32 2147483647, %v5925_v37  ;;  %vm2492_vm9 = vmor %vm2490_vm7, %vm2491_vm6  ;;  %2875 = vmatpush.bf16.msra.mxu1 %v3853_v17  ;;  %2828 = vmatpush.bf16.msra.mxu0 %v3855_v58 }
 0x3b8   :  { %v2524_v26 = vmul.f32 %v5526_v4, %v2456_v1  ;;  %v2497_v38 = vor.u32 1.1754944e-38, %v2496_v27  ;;  %vm2495_vm10 = vcmp.eq.f32.partialorder %v2494_v24, 8.507059e+37  ;;  %vm2434_vm11 = vweird.f32 %v5925_v37  ;;  %2928 = vmatpush.bf16.msra.mxu2 %v3856_v6 }
 0x3b9   :  { %v2488_v16 = vmul.f32 %v4062_v31, %v2487_v32  ;;  %v2431_v13 = vsub.f32 1.0, %v2430_v33  ;;  %vm2436_vm0 = vmor %vm2434_vm11, %vm2435_vm8  ;;  %v2441_v53 = vor.u32 1.1754944e-38, %v2440_v22  ;;  %v2544_v9 = vpack.c.bf16 %v2528_v30, %v2528_v30  ;;  %2984 = vmatpush.bf16.msrb.mxu3 %v3858_v49 }
 0x3ba   :  { %vm2439_vm12 = vcmp.eq.f32.partialorder %v2438_v29, 8.507059e+37  ;;  %v2540_v4 = vpack.c.bf16 %v2524_v26, %v2524_v26 }
 0x3bb   :  { %v2489_v51 = vadd.f32 %v4062_v31, %v2488_v16  ;;  %v2432_v43 = vmul.f32 %v4064_v55, %v2431_v13  ;;  %2876 = vmatpush.bf16.msra.mxu1 %v3852_v15  ;;  %v2744_v54 = vunpack.c.l.b16 %v2544_v9  ;;  %2829 = vmatpush.bf16.msra.mxu0 %v3854_v40  ;;  %v5970_v40 = vld [vmem:[#allocation16] sm:$0xff] }
 0x3bc   :  { %v2688_v57 = vunpack.c.l.b16 %v2540_v4 }
 0x3bd   :  { %v2493_v23 = vsel %vm2492_vm9, %v4062_v31, %v2489_v51  ;;  %v2433_v46 = vadd.f32 %v4064_v55, %v2432_v43 }
 0x3be   :  { %v2498_v50 = vsel %vm2495_vm10, %v2497_v38, %v2493_v23 }
 0x3bf   :  { %v2527_v8 = vmul.f32 %v5541_v35, %v2498_v50  ;;  %v2437_v48 = vsel %vm2436_vm0, %v4064_v55, %v2433_v46 }
 0x3c0   :  { %v2442_v61 = vsel %vm2439_vm12, %v2441_v53, %v2437_v48 }
 0x3c1   :  { %v2543_v12 = vpack.c.bf16 %v2527_v8, %v2527_v8  ;;  %v2523_v20 = vmul.f32 %v5545_v2, %v2442_v61 }
 0x3c3   :  { %v2743_v18 = vunpack.c.l.b16 %v2543_v12  ;;  %v2539_v63 = vpack.c.bf16 %v2523_v20, %v2523_v20 }
 0x3c5   :  { %v2687_v62 = vunpack.c.l.b16 %v2539_v63  ;;  %v2745_v41 = vpack.c.b16 %v2744_v54, %v2743_v18 }
 0x3c7   :  { %3659 = vmatmul.msk.bf16.vlgmr.msra.gmra.mxu3 %vm2144_vm2, %v2745_v41  ;;  %v2689_v45 = vpack.c.b16 %v2688_v57, %v2687_v62 }
 0x3c9   :  { %3657 = vmatmul.msk.bf16.vlgmr.msrb.gmra.mxu1 %vm2144_vm2, %v2689_v45 }
 0x3d6   :  { %v2568_v35 = vpop.f32.mrf.mxu0 }
 0x3d7   :  { %v2769_v52 = vpack.c.bf16 %v2568_v35, %v2568_v35 }
 0x3d9   :  { %v2845_v2 = vunpack.c.l.b16 %v2769_v52 }
 0x3de   :  { %v2570_v39 = vpop.f32.mrf.mxu0 }
 0x3df   :  { %v2770_v37 = vpack.c.bf16 %v2570_v39, %v2570_v39  ;;  %v3000_v39 = vperm.slane %v5970_v40, 1 }
 0x3e1   :  { %v2846_v44 = vunpack.c.l.b16 %v2770_v37 }
 0x3e3   :  { %v2849_v36 = vpack.c.b16 %v2846_v44, %v2845_v2 }
 0x3e5   :  { %3678 = vmatmul.msk.bf16.vlgmr.msra.gmra.mxu1 %vm1913_vm1, %v2849_v36 }
 0x3ee   :  { %v2596_v5 = vpop.f32.mrf.mxu1 }
 0x3ef   :  { %v2771_v11 = vpack.c.bf16 %v2596_v5, %v2596_v5 }
 0x3f1   :  { %v2798_v0 = vunpack.c.l.b16 %v2771_v11 }
 0x3f6   :  { %v2598_v21 = vpop.f32.mrf.mxu1 }
 0x3f7   :  { %v2772_v59 = vpack.c.bf16 %v2598_v21, %v2598_v21 }
 0x3f9   :  { %v2799_v19 = vunpack.c.l.b16 %v2772_v59  ;;  %v4084_v59 = vld [vmem:[#allocation2] sm:$0xff] }
 0x3fb   :  { %v2802_v7 = vpack.c.b16 %v2799_v19, %v2798_v0 }
 0x3fd   :  { %3668 = vmatmul.msk.bf16.vlgmr.msra.gmra.mxu0 %vm1913_vm1, %v2802_v7 }
 0x410   :  { %v2624_v10 = vpop.f32.mrf.mxu2 }
 0x411   :  { %v2773_v3 = vpack.c.bf16 %v2624_v10, %v2624_v10 }
 0x413   :  { %v2897_v42 = vunpack.c.l.b16 %v2773_v3 }
 0x418   :  { %v2626_v31 = vpop.f32.mrf.mxu2 }
 0x419   :  { %v2774_v25 = vpack.c.bf16 %v2626_v31, %v2626_v31 }
 0x41b   :  { %v2898_v34 = vunpack.c.l.b16 %v2774_v25 }
 0x41d   :  { %v2901_v28 = vpack.c.b16 %v2898_v34, %v2897_v42 }
 0x41e   :  { %v2652_v55 = vpop.f32.mrf.mxu3 }
 0x41f   :  { %3688 = vmatmul.msk.bf16.vlgmr.msra.gmra.mxu2 %vm1913_vm1, %v2901_v28  ;;  %v2775_v60 = vpack.c.bf16 %v2652_v55, %v2652_v55 }
 0x421   :  { %v2953_v33 = vunpack.c.l.b16 %v2775_v60 }
 0x426   :  { %v2654_v47 = vpop.f32.mrf.mxu3 }
 0x427   :  { %v2776_v32 = vpack.c.bf16 %v2654_v47, %v2654_v47 }
 0x429   :  { %v2954_v1 = vunpack.c.l.b16 %v2776_v32 }
 0x42b   :  { %v2957_v27 = vpack.c.b16 %v2954_v1, %v2953_v33  ;;  %v4086_v1 = vld [vmem:[#allocation2 + $0x10] sm:$0xff] }
 0x42d   :  { %3698 = vmatmul.msk.bf16.vlgmr.msrb.gmra.mxu3 %vm1913_vm1, %v2957_v27 }
 0x432   :  { %v2736_v16 = vpop.f32.mrf.mxu2 }
 0x433   :  { %v2680_v24 = vpop.f32.mrf.mxu0  ;;  %v2781_v13 = vpack.c.bf16 %v2736_v16, %v2736_v16 }
 0x434   :  { %v2777_v30 = vpack.c.bf16 %v2680_v24, %v2680_v24 }
 0x435   :  { %v2899_v26 = vunpack.c.l.b16 %v2781_v13 }
 0x436   :  { %v2847_v17 = vunpack.c.l.b16 %v2777_v30 }
 0x43a   :  { %v2738_v22 = vpop.f32.mrf.mxu2 }
 0x43b   :  { %v2782_v51 = vpack.c.bf16 %v2738_v22, %v2738_v22  ;;  %v2682_v43 = vpop.f32.mrf.mxu0  ;;  %v4087_v22 = vld [vmem:[#allocation2 + $0x18] sm:$0xff] }
 0x43c   :  { %v2778_v29 = vpack.c.bf16 %v2682_v43, %v2682_v43  ;;  %v4357_v43 = vmov 128.0  }
 0x43d   :  { %v2900_v38 = vunpack.c.l.b16 %v2782_v51  ;;  %4065 = vrcp.f32 %v4357_v43 }
 0x43e   :  { %v2848_v23 = vunpack.c.l.b16 %v2778_v29 }
 0x43f   :  { %v2902_v46 = vpack.c.b16 %v2900_v38, %v2899_v26 }
 0x440   :  { %v2850_v50 = vpack.c.b16 %v2848_v23, %v2847_v17 }
 0x441   :  { %3689 = vmatmul.msk.bf16.gmra.mxu2 %vm1913_vm1, %v2902_v46 }
 0x442   :  { %3679 = vmatmul.msk.bf16.gmra.mxu1 %vm1913_vm1, %v2850_v50 }
 0x443   :  { %v4066_v29 = vpop.eup %4065 }
 0x444   :  { %v3018_v26 = vmul.f32 128.0, %v4066_v29 }
 0x446   :  { %v2708_v53 = vpop.f32.mrf.mxu1  ;;  %v3019_v38 = vsub.f32 1.0, %v3018_v26 }
 0x447   :  { %v2779_v9 = vpack.c.bf16 %v2708_v53, %v2708_v53 }
 0x448   :  { %v3020_v17 = vmul.f32 %v4066_v29, %v3019_v38 }
 0x449   :  { %v2800_v4 = vunpack.c.l.b16 %v2779_v9 }
 0x44a   :  { %v2764_v15 = vpop.f32.mrf.mxu3  ;;  %v3021_v23 = vadd.f32 %v4066_v29, %v3020_v17  ;;  %v3710_v17 = vld [vmem:[#allocation11 + $0x10] sm:$0xf] }
 0x44b   :  { %v2783_v61 = vpack.c.bf16 %v2764_v15, %v2764_v15 }
 0x44d   :  { %v2955_v63 = vunpack.c.l.b16 %v2783_v61 }
 0x44e   :  { %v2710_v8 = vpop.f32.mrf.mxu1 }
 0x44f   :  { %v2780_v48 = vpack.c.bf16 %v2710_v8, %v2710_v8 }
 0x451   :  { %v2801_v12 = vunpack.c.l.b16 %v2780_v48 }
 0x452   :  { %v2766_v20 = vpop.f32.mrf.mxu3 }
 0x453   :  { %v2784_v54 = vpack.c.bf16 %v2766_v20, %v2766_v20  ;;  %v2803_v18 = vpack.c.b16 %v2801_v12, %v2800_v4 }
 0x455   :  { %v2956_v57 = vunpack.c.l.b16 %v2784_v54  ;;  %3669 = vmatmul.msk.bf16.gmra.mxu0 %vm1913_vm1, %v2803_v18 }
 0x457   :  { %v2958_v62 = vpack.c.b16 %v2956_v57, %v2955_v63 }
 0x459   :  { %3699 = vmatmul.msk.bf16.gmra.mxu3 %vm1913_vm1, %v2958_v62  ;;  %vm3022_vm1 = vweird.f32 %v4066_v29 }
 0x45a   :  { %v5973_v46 = vsel %vm3022_vm1, %v4066_v29, %v3021_v23  ;;  %v3863_v23 = vld [vmem:[#allocation11 + $0x14] sm:$0xf0] }
 0x462   :  { %v2878_v45 = vpop.f32.mrf.mxu1 }
 0x46a   :  { %v2880_v5 = vpop.f32.mrf.mxu1 }
 0x47a   :  { %v2831_v41 = vpop.f32.mrf.mxu0 }
 0x47b   :  { %v2879_v58 = vadd.f32 %v2878_v45, %v2831_v41  ;;  %v3758_v45 = vld [vmem:[#allocation11 + $0x70] sm:$0xf] }
 0x482   :  { %v2833_v44 = vpop.f32.mrf.mxu0 }
 0x483   :  { %v2881_v21 = vadd.f32 %v2880_v5, %v2833_v44  ;;  %v3873_v44 = vld [vmem:[#allocation11 + $0x64] sm:$0xf0] }
 0x4a2   :  { %v2930_v35 = vpop.f32.mrf.mxu2 }
 0x4a3   :  { %v2940_v52 = vadd.f32 %v2930_v35, %v2879_v58  ;;  %v3875_v35 = vld [vmem:[#allocation11 + $0x74] sm:$0xf0]  ;;  %v3874_v58 = vld [vmem:[#allocation11 + $0x74] sm:$0xf] }
 0x4aa   :  { %v2932_v11 = vpop.f32.mrf.mxu2 }
 0x4ab   :  { %v2941_v19 = vadd.f32 %v2932_v11, %v2881_v21  ;;  %v3752_v11 = vld [vmem:[#allocation11 + $0x68] sm:$0xf0] }
 0x4b0   :  { %v2986_v37 = vpop.f32.mrf.mxu3 }
 0x4b1   :  { %v2996_v2 = vadd.f32 %v2986_v37, %v2940_v52  ;;  %v3759_v52 = vor.u32 %v3875_v35, %v3758_v45 }
 0x4b3   :  { %v3001_v36 = vadd.f32 %v3000_v39, %v2996_v2  ;;  %3210 = vmatpush.bf16.msrb.mxu0 %v3759_v52  ;;  %v3750_v2 = vld [vmem:[#allocation11 + $0x60] sm:$0xf] }
 0x4b4   :  { %v3751_v5 = vor.u32 %v3873_v44, %v3750_v2 }
 0x4b5   :  { %v3005_v0 = vadd.f32 %v4084_v59, %v3001_v36  ;;  %v3872_v36 = vld [vmem:[#allocation11 + $0x64] sm:$0xf]  ;;  %v3742_v59 = vld [vmem:[#allocation11 + $0x50] sm:$0xf] }
 0x4b6   :  { %v3755_v21 = vor.u32 %v3872_v36, %v3752_v11 }
 0x4b7   :  { %3009 = vadd.xlane.f32.xlu0 %v3005_v0  ;;  %3211 = vmatpush.bf16.msrb.mxu0 %v3751_v5  ;;  %v3096_v5 = vperm.slane %v5970_v40, 3 }
 0x4b8   :  { %v2988_v7 = vpop.f32.mrf.mxu3 }
 0x4b9   :  { %v2997_v56 = vadd.f32 %v2988_v7, %v2941_v19  ;;  %v3870_v19 = vld [vmem:[#allocation11 + $0x54] sm:$0xf] }
 0x4bb   :  { %v3002_v6 = vadd.f32 %v3000_v39, %v2997_v56 }
 0x4bd   :  { %v3006_v49 = vadd.f32 %v4085_v14, %v3002_v6  ;;  %v3744_v6 = vld [vmem:[#allocation11 + $0x58] sm:$0xf0] }
 0x4bf   :  { %3011 = vadd.xlane.f32.xlu1 %v3006_v49  ;;  %v2883_v10 = vpop.f32.mrf.mxu1 }
 0x4c4   :  { %v2935_v25 = vpop.f32.mrf.mxu2 }
 0x4c7   :  { %v2885_v28 = vpop.f32.mrf.mxu1 }
 0x4cc   :  { %v2937_v33 = vpop.f32.mrf.mxu2 }
 0x4d2   :  { %v2836_v3 = vpop.f32.mrf.mxu0 }
 0x4d3   :  { %v2884_v31 = vadd.f32 %v2883_v10, %v2836_v3  ;;  %v3734_v10 = vld [vmem:[#allocation11 + $0x40] sm:$0xf]  ;;  %v3869_v3 = vld [vmem:[#allocation11 + $0x44] sm:$0xf0] }
 0x4d5   :  { %v2942_v42 = vadd.f32 %v2935_v25, %v2884_v31  ;;  %v3868_v31 = vld [vmem:[#allocation11 + $0x44] sm:$0xf]  ;;  %v3736_v25 = vld [vmem:[#allocation11 + $0x48] sm:$0xf0] }
 0x4da   :  { %v2838_v34 = vpop.f32.mrf.mxu0 }
 0x4db   :  { %v2886_v47 = vadd.f32 %v2885_v28, %v2838_v34  ;;  %v3735_v34 = vor.u32 %v3869_v3, %v3734_v10  ;;  %v3739_v28 = vor.u32 %v3868_v31, %v3736_v25  ;;  %v3883_v3 = vld [vmem:[#allocation14 + $0x38] sm:$0xff] }
 0x4dc   :  { %v2991_v55 = vpop.f32.mrf.mxu3  ;;  %3389 = vmatpush.bf16.msrb.mxu2 %v3883_v3 }
 0x4dd   :  { %v2998_v60 = vadd.f32 %v2991_v55, %v2942_v42  ;;  %v2943_v16 = vadd.f32 %v2937_v33, %v2886_v47  ;;  %v3726_v55 = vld [vmem:[#allocation11 + $0x30] sm:$0xf]  ;;  %v3866_v47 = vld [vmem:[#allocation11 + $0x34] sm:$0xf] }
 0x4df   :  { %v3003_v32 = vadd.f32 %v3000_v39, %v2998_v60  ;;  %v3867_v60 = vld [vmem:[#allocation11 + $0x34] sm:$0xf0] }
 0x4e1   :  { %v3007_v27 = vadd.f32 %v4086_v1, %v3003_v32  ;;  %v3728_v32 = vld [vmem:[#allocation11 + $0x38] sm:$0xf0]  ;;  %v3727_v1 = vor.u32 %v3867_v60, %v3726_v55 }
 0x4e3   :  { %3013 = vadd.xlane.f32.xlu2 %v3007_v27 }
 0x4e4   :  { %v2993_v24 = vpop.f32.mrf.mxu3 }
 0x4e5   :  { %v2999_v13 = vadd.f32 %v2993_v24, %v2943_v16  ;;  %v3731_v16 = vor.u32 %v3866_v47, %v3728_v32  ;;  %v3718_v24 = vld [vmem:[#allocation11 + $0x20] sm:$0xf]  ;;  %v3881_v47 = vld [vmem:[#allocation14 + $0x28] sm:$0xff] }
 0x4e6   :  { %v3889_v32 = vld [vmem:[#allocation14 + $0x68] sm:$0xff] }
 0x4e7   :  { %v3004_v30 = vadd.f32 %v3000_v39, %v2999_v13  ;;  %v3760_v39 = vld [vmem:[#allocation11 + $0x78] sm:$0xf0]  ;;  %v3865_v13 = vld [vmem:[#allocation11 + $0x24] sm:$0xf0] }
 0x4e8   :  { %v3763_v37 = vor.u32 %v3874_v58, %v3760_v39  ;;  %v3719_v26 = vor.u32 %v3865_v13, %v3718_v24 }
 0x4e9   :  { %v3008_v51 = vadd.f32 %v4087_v22, %v3004_v30  ;;  %v3864_v30 = vld [vmem:[#allocation11 + $0x24] sm:$0xf]  ;;  %v3720_v22 = vld [vmem:[#allocation11 + $0x28] sm:$0xf0] }
 0x4ea   :  { %3229 = vmatpush.bf16.msrb.mxu1 %v3763_v37  ;;  %v3723_v38 = vor.u32 %v3864_v30, %v3720_v22 }
 0x4eb   :  { %3015 = vadd.xlane.f32.xlu0 %v3008_v51 }
 0x4ee   :  { %3230 = vmatpush.bf16.msrb.mxu1 %v3755_v21 }
 0x52a   :  { %v3010_v50 = vpop.xlane.xlu0 %3009 }
 0x52b   :  { %v3024_v53 = vmul.f32 %v5973_v46, %v3010_v50 }
 0x52d   :  { %v5976_v15 = vsub.f32 %v3005_v0, %v3024_v53  ;;  %v3871_v0 = vld [vmem:[#allocation11 + $0x54] sm:$0xf0]  ;;  %v3862_v53 = vld [vmem:[#allocation11 + $0x14] sm:$0xf] }
 0x52e   :  { %v3743_v56 = vor.u32 %v3871_v0, %v3742_v59 }
 0x52f   :  { %v3032_v9 = vmul.f32 %v5976_v15, %v5976_v15 }
 0x530   :  { %3212 = vmatpush.bf16.msrb.mxu0 %v3743_v56 }
 0x531   :  { %3036 = vadd.xlane.f32.xlu1 %v3032_v9  ;;  %v3712_v9 = vld [vmem:[#allocation11 + $0x18] sm:$0xf0] }
 0x532   :  { %v3012_v8 = vpop.xlane.xlu1 %3011 }
 0x533   :  { %v3025_v48 = vmul.f32 %v5973_v46, %v3012_v8 }
 0x534   :  { %3213 = vmatpush.bf16.msrb.mxu0 %v3735_v34  ;;  %v3890_v34 = vld [vmem:[#allocation14 + $0x70] sm:$0xff] }
 0x535   :  { %v5981_v61 = vsub.f32 %v3006_v49, %v3025_v48  ;;  %v3747_v49 = vor.u32 %v3870_v19, %v3744_v6  ;;  %v3711_v48 = vor.u32 %v3863_v23, %v3710_v17  ;;  %v3101_v19 = vperm.slane %v5970_v40, 4 }
 0x537   :  { %v3033_v4 = vmul.f32 %v5981_v61, %v5981_v61  ;;  %3231 = vmatpush.bf16.msrb.mxu1 %v3747_v49 }
 0x538   :  { %3214 = vmatpush.bf16.msrb.mxu0 %v3727_v1 }
 0x539   :  { %3038 = vadd.xlane.f32.xlu2 %v3033_v4  ;;  %v3715_v4 = vor.u32 %v3862_v53, %v3712_v9 }
 0x53b   :  { %3232 = vmatpush.bf16.msrb.mxu1 %v3739_v28 }
 0x53c   :  { %3215 = vmatpush.bf16.msrb.mxu0 %v3719_v26 }
 0x53f   :  { %3233 = vmatpush.bf16.msrb.mxu1 %v3731_v16  ;;  %v3888_v16 = vld [vmem:[#allocation14 + $0x60] sm:$0xff] }
 0x540   :  { %3216 = vmatpush.bf16.msrb.mxu0 %v3711_v48 }
 0x543   :  { %3234 = vmatpush.bf16.msrb.mxu1 %v3723_v38 }
 0x547   :  { %3235 = vmatpush.bf16.msrb.mxu1 %v3715_v4 }
 0x556   :  { %v3014_v12 = vpop.xlane.xlu2 %3013 }
 0x557   :  { %v3026_v20 = vmul.f32 %v5973_v46, %v3014_v12  ;;  %v3702_v12 = vld [vmem:[#allocation11] sm:$0xf] }
 0x559   :  { %v5986_v54 = vsub.f32 %v3007_v27, %v3026_v20  ;;  %v3861_v20 = vld [vmem:[#allocation11 + $0x4] sm:$0xf0] }
 0x55a   :  { %v3703_v58 = vor.u32 %v3861_v20, %v3702_v12  ;;  %v3879_v12 = vld [vmem:[#allocation14 + $0x18] sm:$0xff] }
 0x55b   :  { %v3034_v18 = vmul.f32 %v5986_v54, %v5986_v54  ;;  %v3887_v20 = vld [vmem:[#allocation14 + $0x58] sm:$0xff] }
 0x55c   :  { %3217 = vmatpush.bf16.msrb.mxu0 %v3703_v58 }
 0x55d   :  { %3040 = vadd.xlane.f32.xlu0 %v3034_v18 }
 0x55e   :  { %v3016_v63 = vpop.xlane.xlu0 %3015 }
 0x55f   :  { %v3027_v57 = vmul.f32 %v5973_v46, %v3016_v63  ;;  %v3860_v63 = vld [vmem:[#allocation11 + $0x4] sm:$0xf] }
 0x561   :  { %v5991_v62 = vsub.f32 %v3008_v51, %v3027_v57  ;;  %v3704_v57 = vld [vmem:[#allocation11 + $0x8] sm:$0xf0] }
 0x562   :  { %v3707_v52 = vor.u32 %v3860_v63, %v3704_v57  ;;  %v3885_v63 = vld [vmem:[#allocation14 + $0x48] sm:$0xff]  ;;  %v3876_v57 = vld [vmem:[#allocation14] sm:$0xff] }
 0x563   :  { %v3035_v41 = vmul.f32 %v5991_v62, %v5991_v62 }
 0x564   :  { %3236 = vmatpush.bf16.msrb.mxu1 %v3707_v52 }
 0x565   :  { %3042 = vadd.xlane.f32.xlu1 %v3035_v41 }
 0x5a4   :  { %v3037_v7 = vpop.xlane.xlu1 %3036 }
 0x5a5   :  { %v3044_v14 = vmul.f32 %v3037_v7, %v5973_v46 }
 0x5a7   :  { %v3048_v42 = vadd.f32 1e-05, %v3044_v14 }
 0x5a9   :  { %4067 = vrsqrt.f32 %v3048_v42  ;;  %vm3058_vm13 = vweird.f32 %v3048_v42 }
 0x5ac   :  { %v3039_v33 = vpop.xlane.xlu2 %3038 }
 0x5ad   :  { %v3045_v27 = vmul.f32 %v3039_v33, %v5973_v46 }
 0x5af   :  { %v4068_v51 = vpop.eup %4067  ;;  %v3049_v43 = vadd.f32 1e-05, %v3045_v27  ;;  %v3880_v27 = vld [vmem:[#allocation14 + $0x20] sm:$0xff] }
 0x5b0   :  { %v3053_v29 = vmul.f32 %v4068_v51, %v3048_v42  ;;  %vm3059_vm2 = vweird.f32 %v4068_v51  ;;  %v3882_v42 = vld [vmem:[#allocation14 + $0x30] sm:$0xff] }
 0x5b1   :  { %4069 = vrsqrt.f32 %v3049_v43  ;;  %vm3060_vm14 = vmor %vm3058_vm13, %vm3059_vm2  ;;  %vm3068_vm3 = vweird.f32 %v3049_v43  ;;  %3390 = vmatpush.bf16.msrb.mxu2 %v3882_v42 }
 0x5b2   :  { %v3054_v50 = vmul.f32 %v4068_v51, %v3053_v29 }
 0x5b4   :  { %v3055_v8 = vmul.f32 0.5, %v3054_v50 }
 0x5b5   :  { %3391 = vmatpush.bf16.msrb.mxu2 %v3881_v47 }
 0x5b6   :  { %v3056_v18 = vsub.f32 1.5, %v3055_v8 }
 0x5b7   :  { %v4070_v41 = vpop.eup %4069 }
 0x5b8   :  { %v3057_v45 = vmul.f32 %v4068_v51, %v3056_v18  ;;  %v3063_v35 = vmul.f32 %v4070_v41, %v3049_v43  ;;  %vm3069_vm15 = vweird.f32 %v4070_v41  ;;  %v3886_v18 = vld [vmem:[#allocation14 + $0x50] sm:$0xff] }
 0x5b9   :  { %vm3070_vm4 = vmor %vm3068_vm3, %vm3069_vm15  ;;  %3392 = vmatpush.bf16.msrb.mxu2 %v3880_v27 }
 0x5ba   :  { %v3064_v39 = vmul.f32 %v4070_v41, %v3063_v35  ;;  %v3061_v37 = vsel %vm3060_vm14, %v4068_v51, %v3057_v45  ;;  %v3124_v45 = vld [vmem:[#allocation13] sm:$0x3] }
 0x5bb   :  { %v3092_v36 = vmul.f32 %v3061_v37, %v5976_v15  ;;  %v3126_v52 = vperm.slane %v3124_v45, 0 }
 0x5bc   :  { %v3065_v2 = vmul.f32 0.5, %v3064_v39  ;;  %v3127_v39 = vperm.slane %v3124_v45, 1 }
 0x5bd   :  { %v3097_v0 = vmul.f32 %v3096_v5, %v3092_v36  ;;  %3393 = vmatpush.bf16.msrb.mxu2 %v3879_v12 }
 0x5be   :  { %v3066_v44 = vsub.f32 1.5, %v3065_v2 }
 0x5bf   :  { %v6001_v56 = vadd.f32 %v3101_v19, %v3097_v0 }
 0x5c0   :  { %v3067_v11 = vmul.f32 %v4070_v41, %v3066_v44 }
 0x5c2   :  { %v3071_v21 = vsel %vm3070_vm4, %v4070_v41, %v3067_v11  ;;  %v3884_v41 = vld [vmem:[#allocation14 + $0x40] sm:$0xff] }
 0x5c3   :  { %v3093_v59 = vmul.f32 %v3071_v21, %v5981_v61  ;;  %v3891_v61 = vld [vmem:[#allocation14 + $0x78] sm:$0xff] }
 0x5c4   :  { %3408 = vmatpush.bf16.msra.mxu3 %v3891_v61 }
 0x5c5   :  { %v3098_v7 = vmul.f32 %v3096_v5, %v3093_v59 }
 0x5c7   :  { %v6003_v6 = vadd.f32 %v3101_v19, %v3098_v7 }
 0x5c8   :  { %3409 = vmatpush.bf16.msra.mxu3 %v3890_v34 }
 0x5c9   :  { %v3106_v14 = vpack.c.bf16 %v6003_v6, %v6001_v56 }
 0x5cb   :  { %3218 = vmatmul.bf16.vlgmr.msrb.gmra.mxu0 %v3106_v14  ;;  %3237 = vmatmul.bf16.vlgmr.msrb.gmra.mxu1 %v3106_v14 }
 0x5cc   :  { %3410 = vmatpush.bf16.msra.mxu3 %v3889_v32 }
 0x5d0   :  { %v3041_v15 = vpop.xlane.xlu0 %3040  ;;  %3411 = vmatpush.bf16.msra.mxu3 %v3888_v16 }
 0x5d1   :  { %v3046_v49 = vmul.f32 %v3041_v15, %v5973_v46 }
 0x5d3   :  { %v3050_v10 = vadd.f32 1e-05, %v3046_v49 }
 0x5d4   :  { %3412 = vmatpush.bf16.msra.mxu3 %v3887_v20 }
 0x5d5   :  { %4071 = vrsqrt.f32 %v3050_v10  ;;  %vm3078_vm6 = vweird.f32 %v3050_v10 }
 0x5d8   :  { %v3043_v31 = vpop.xlane.xlu1 %3042  ;;  %3413 = vmatpush.bf16.msra.mxu3 %v3886_v18 }
 0x5d9   :  { %v3047_v25 = vmul.f32 %v3043_v31, %v5973_v46 }
 0x5db   :  { %v4072_v28 = vpop.eup %4071  ;;  %v3051_v55 = vadd.f32 1e-05, %v3047_v25 }
 0x5dc   :  { %v3073_v60 = vmul.f32 %v4072_v28, %v3050_v10  ;;  %vm3079_vm5 = vweird.f32 %v4072_v28  ;;  %3414 = vmatpush.bf16.msra.mxu3 %v3885_v63 }
 0x5dd   :  { %4073 = vrsqrt.f32 %v3051_v55  ;;  %vm3080_vm7 = vmor %vm3078_vm6, %vm3079_vm5  ;;  %vm3088_vm9 = vweird.f32 %v3051_v55 }
 0x5de   :  { %v3074_v33 = vmul.f32 %v4072_v28, %v3073_v60 }
 0x5e0   :  { %v3075_v1 = vmul.f32 0.5, %v3074_v33  ;;  %3415 = vmatpush.bf16.msra.mxu3 %v3884_v41  ;;  %v3292_v33 = vperm.slane %v5970_v40, 2 }
 0x5e2   :  { %v3076_v24 = vsub.f32 1.5, %v3075_v1 }
 0x5e3   :  { %v4074_v13 = vpop.eup %4073 }
 0x5e4   :  { %v3077_v30 = vmul.f32 %v4072_v28, %v3076_v24  ;;  %v3083_v22 = vmul.f32 %v4074_v13, %v3051_v55  ;;  %vm3089_vm8 = vweird.f32 %v4074_v13 }
 0x5e5   :  { %vm3090_vm10 = vmor %vm3088_vm9, %vm3089_vm8 }
 0x5e6   :  { %v3084_v51 = vmul.f32 %v4074_v13, %v3083_v22  ;;  %v3081_v29 = vsel %vm3080_vm7, %v4072_v28, %v3077_v30 }
 0x5e7   :  { %v3094_v38 = vmul.f32 %v3081_v29, %v5986_v54  ;;  %v3878_v54 = vld [vmem:[#allocation14 + $0x10] sm:$0xff] }
 0x5e8   :  { %v3085_v43 = vmul.f32 0.5, %v3084_v51  ;;  %3394 = vmatpush.bf16.msrb.mxu2 %v3878_v54 }
 0x5e9   :  { %v3099_v53 = vmul.f32 %v3096_v5, %v3094_v38 }
 0x5ea   :  { %v3086_v26 = vsub.f32 1.5, %v3085_v43 }
 0x5eb   :  { %v6011_v8 = vadd.f32 %v3101_v19, %v3099_v53 }
 0x5ec   :  { %v3087_v17 = vmul.f32 %v4074_v13, %v3086_v26 }
 0x5ee   :  { %v3091_v23 = vsel %vm3090_vm10, %v4074_v13, %v3087_v17 }
 0x5ef   :  { %v3095_v50 = vmul.f32 %v3091_v23, %v5991_v62  ;;  %v3877_v62 = vld [vmem:[#allocation14 + $0x8] sm:$0xff] }
 0x5f0   :  { %3395 = vmatpush.bf16.msrb.mxu2 %v3877_v62 }
 0x5f1   :  { %v3100_v9 = vmul.f32 %v3096_v5, %v3095_v50 }
 0x5f3   :  { %v6013_v48 = vadd.f32 %v3101_v19, %v3100_v9 }
 0x5f4   :  { %3396 = vmatpush.bf16.msrb.mxu2 %v3876_v57 }
 0x5f5   :  { %v3107_v4 = vpack.c.bf16 %v6013_v48, %v6011_v8 }
 0x5f7   :  { %3223 = vmatmul.bf16.gmra.mxu0 %v3107_v4  ;;  %3242 = vmatmul.bf16.gmra.mxu1 %v3107_v4 }
 0x648   :  { %v3219_v35 = vpop.f32.mrf.mxu0  ;;  %v3238_v58 = vpop.f32.mrf.mxu1 }
 0x649   :  { %v3220_v37 = vadd.f32 %v3219_v35, %v3126_v52  ;;  %v3239_v2 = vadd.f32 %v3238_v58, %v3127_v39 }
 0x64b   :  { %v3248_v21 = vmax.f32 %v3220_v37, 0.0  ;;  %v3249_v59 = vmax.f32 %v3239_v2, 0.0 }
 0x650   :  { %v3221_v44 = vpop.f32.mrf.mxu0  ;;  %v3240_v36 = vpop.f32.mrf.mxu1 }
 0x651   :  { %v3222_v5 = vadd.f32 %v3221_v44, %v3126_v52  ;;  %v3241_v11 = vadd.f32 %v3240_v36, %v3127_v39 }
 0x653   :  { %v3250_v0 = vmax.f32 %v3222_v5, 0.0  ;;  %v3251_v19 = vmax.f32 %v3241_v11, 0.0 }
 0x655   :  { %v3256_v7 = vpack.c.bf16 %v3250_v0, %v3248_v21  ;;  %v3257_v14 = vpack.c.bf16 %v3251_v19, %v3249_v59 }
 0x657   :  { %3397 = vmatmul.bf16.vlgmr.msrb.gmra.mxu2 %v3256_v7  ;;  %3416 = vmatmul.bf16.vlgmr.msra.gmra.mxu3 %v3257_v14 }
 0x674   :  { %v3224_v15 = vpop.f32.mrf.mxu0  ;;  %v3243_v49 = vpop.f32.mrf.mxu1 }
 0x675   :  { %v3225_v10 = vadd.f32 %v3224_v15, %v3126_v52  ;;  %v3244_v3 = vadd.f32 %v3243_v49, %v3127_v39 }
 0x677   :  { %v3252_v34 = vmax.f32 %v3225_v10, 0.0  ;;  %v3253_v28 = vmax.f32 %v3244_v3, 0.0  ;;  %v3511_v3 = vperm.slane %v5970_v40, 5 }
 0x67c   :  { %v3226_v61 = vpop.f32.mrf.mxu0  ;;  %v3245_v31 = vpop.f32.mrf.mxu1 }
 0x67d   :  { %v3227_v25 = vadd.f32 %v3226_v61, %v3126_v52  ;;  %v3246_v42 = vadd.f32 %v3245_v31, %v3127_v39 }
 0x67f   :  { %v3254_v55 = vmax.f32 %v3227_v25, 0.0  ;;  %v3255_v60 = vmax.f32 %v3246_v42, 0.0  ;;  %v3516_v42 = vperm.slane %v5970_v40, 6 }
 0x681   :  { %v3258_v47 = vpack.c.bf16 %v3254_v55, %v3252_v34  ;;  %v3259_v32 = vpack.c.bf16 %v3255_v60, %v3253_v28 }
 0x683   :  { %3402 = vmatmul.bf16.gmra.mxu2 %v3258_v47  ;;  %3421 = vmatmul.bf16.gmra.mxu3 %v3259_v32 }
 0x6da   :  { %v3398_v1 = vpop.f32.mrf.mxu2  ;;  %v3417_v27 = vpop.f32.mrf.mxu3 }
 0x6db   :  { %v3399_v16 = vadd.f32 %v3398_v1, %v3292_v33 }
 0x6dd   :  { %v3418_v24 = vadd.f32 %v3417_v27, %v3399_v16 }
 0x6df   :  { %v3427_v13 = vadd.f32 %v3418_v24, %v6001_v56 }
 0x6e1   :  { %3431 = vadd.xlane.f32.xlu2 %v3427_v13 }
 0x6e2   :  { %v3400_v30 = vpop.f32.mrf.mxu2  ;;  %v3419_v51 = vpop.f32.mrf.mxu3 }
 0x6e3   :  { %v3401_v22 = vadd.f32 %v3400_v30, %v3292_v33 }
 0x6e5   :  { %v3420_v43 = vadd.f32 %v3419_v51, %v3401_v22 }
 0x6e7   :  { %v3428_v29 = vadd.f32 %v3420_v43, %v6003_v6 }
 0x6e9   :  { %3433 = vadd.xlane.f32.xlu0 %v3428_v29 }
 0x706   :  { %v3403_v26 = vpop.f32.mrf.mxu2  ;;  %v3422_v38 = vpop.f32.mrf.mxu3 }
 0x707   :  { %v3404_v17 = vadd.f32 %v3403_v26, %v3292_v33 }
 0x709   :  { %v3423_v23 = vadd.f32 %v3422_v38, %v3404_v17 }
 0x70b   :  { %v3429_v50 = vadd.f32 %v3423_v23, %v6011_v8 }
 0x70d   :  { %3435 = vadd.xlane.f32.xlu1 %v3429_v50 }
 0x70e   :  { %v3405_v53 = vpop.f32.mrf.mxu2  ;;  %v3424_v4 = vpop.f32.mrf.mxu3 }
 0x70f   :  { %v3406_v9 = vadd.f32 %v3405_v53, %v3292_v33 }
 0x711   :  { %v3425_v12 = vadd.f32 %v3424_v4, %v3406_v9 }
 0x713   :  { %v3430_v56 = vadd.f32 %v3425_v12, %v6013_v48 }
 0x715   :  { %3437 = vadd.xlane.f32.xlu2 %v3430_v56 }
 0x754   :  { %v3432_v20 = vpop.xlane.xlu2 %3431 }
 0x755   :  { %v3439_v54 = vmul.f32 %v3432_v20, %v5973_v46 }
 0x757   :  { %v3443_v18 = vsub.f32 %v3427_v13, %v3439_v54 }
 0x759   :  { %v3447_v6 = vmul.f32 %v3443_v18, %v3443_v18 }
 0x75b   :  { %3451 = vadd.xlane.f32.xlu0 %v3447_v6 }
 0x75c   :  { %v3434_v62 = vpop.xlane.xlu0 %3433 }
 0x75d   :  { %v3440_v63 = vmul.f32 %v3434_v62, %v5973_v46 }
 0x75f   :  { %v3444_v57 = vsub.f32 %v3428_v29, %v3440_v63 }
 0x761   :  { %v3448_v41 = vmul.f32 %v3444_v57, %v3444_v57 }
 0x763   :  { %3453 = vadd.xlane.f32.xlu1 %v3448_v41 }
 0x780   :  { %v3436_v8 = vpop.xlane.xlu1 %3435 }
 0x781   :  { %v3441_v45 = vmul.f32 %v3436_v8, %v5973_v46 }
 0x783   :  { %v6025_v35 = vsub.f32 %v3429_v50, %v3441_v45 }
 0x785   :  { %v3449_v48 = vmul.f32 %v6025_v35, %v6025_v35 }
 0x787   :  { %3455 = vadd.xlane.f32.xlu2 %v3449_v48 }
 0x788   :  { %v3438_v58 = vpop.xlane.xlu2 %3437 }
 0x789   :  { %v3442_v52 = vmul.f32 %v3438_v58, %v5973_v46 }
 0x78b   :  { %v6030_v39 = vsub.f32 %v3430_v56, %v3442_v52 }
 0x78d   :  { %v3450_v37 = vmul.f32 %v6030_v39, %v6030_v39 }
 0x78f   :  { %3457 = vadd.xlane.f32.xlu0 %v3450_v37 }
 0x7ce   :  { %v3452_v2 = vpop.xlane.xlu0 %3451 }
 0x7cf   :  { %v3459_v44 = vmul.f32 %v3452_v2, %v5973_v46 }
 0x7d1   :  { %v3463_v36 = vadd.f32 1e-05, %v3459_v44 }
 0x7d3   :  { %4075 = vrsqrt.f32 %v3463_v36  ;;  %vm3473_vm0 = vweird.f32 %v3463_v36 }
 0x7d6   :  { %v3454_v5 = vpop.xlane.xlu1 %3453 }
 0x7d7   :  { %v3460_v11 = vmul.f32 %v3454_v5, %v5973_v46 }
 0x7d9   :  { %v4076_v21 = vpop.eup %4075  ;;  %v3464_v59 = vadd.f32 1e-05, %v3460_v11 }
 0x7da   :  { %v3468_v0 = vmul.f32 %v4076_v21, %v3463_v36  ;;  %vm3474_vm11 = vweird.f32 %v4076_v21 }
 0x7db   :  { %4077 = vrsqrt.f32 %v3464_v59  ;;  %vm3475_vm12 = vmor %vm3473_vm0, %vm3474_vm11  ;;  %vm3483_vm2 = vweird.f32 %v3464_v59 }
 0x7dc   :  { %v3469_v19 = vmul.f32 %v4076_v21, %v3468_v0 }
 0x7de   :  { %v3470_v7 = vmul.f32 0.5, %v3469_v19 }
 0x7e0   :  { %v3471_v14 = vsub.f32 1.5, %v3470_v7 }
 0x7e1   :  { %v4078_v15 = vpop.eup %4077 }
 0x7e2   :  { %v3472_v49 = vmul.f32 %v4076_v21, %v3471_v14  ;;  %v3478_v10 = vmul.f32 %v4078_v15, %v3464_v59  ;;  %vm3484_vm1 = vweird.f32 %v4078_v15 }
 0x7e3   :  { %vm3485_vm13 = vmor %vm3483_vm2, %vm3484_vm1 }
 0x7e4   :  { %v3476_v61 = vsel %vm3475_vm12, %v4076_v21, %v3472_v49  ;;  %v3479_v31 = vmul.f32 %v4078_v15, %v3478_v10 }
 0x7e5   :  { %v3507_v25 = vmul.f32 %v3476_v61, %v3443_v18 }
 0x7e6   :  { %v3480_v34 = vmul.f32 0.5, %v3479_v31 }
 0x7e7   :  { %v3512_v28 = vmul.f32 %v3511_v3, %v3507_v25 }
 0x7e8   :  { %v3481_v55 = vsub.f32 1.5, %v3480_v34 }
 0x7e9   :  { %v3517_v60 = vadd.f32 %v3516_v42, %v3512_v28 }
 0x7ea   :  { %v3482_v47 = vmul.f32 %v4078_v15, %v3481_v55 }
 0x7eb   :  { %3521 = vst [vmem:[#allocation17] sm:$0xff] %v3517_v60 }
 0x7ec   :  { %v3486_v32 = vsel %vm3485_vm13, %v4078_v15, %v3482_v47 }
 0x7ed   :  { %v3508_v33 = vmul.f32 %v3486_v32, %v3444_v57 }
 0x7ef   :  { %v3513_v1 = vmul.f32 %v3511_v3, %v3508_v33 }
 0x7f1   :  { %v3518_v27 = vadd.f32 %v3516_v42, %v3513_v1 }
 0x7f3   :  { %3522 = vst [vmem:[#allocation17 + $0x8] sm:$0xff] %v3518_v27 }
 0x7fa   :  { %v3456_v16 = vpop.xlane.xlu2 %3455 }
 0x7fb   :  { %v3461_v24 = vmul.f32 %v3456_v16, %v5973_v46 }
 0x7fd   :  { %v3465_v13 = vadd.f32 1e-05, %v3461_v24 }
 0x7ff   :  { %4079 = vrsqrt.f32 %v3465_v13  ;;  %vm3493_vm15 = vweird.f32 %v3465_v13 }
 0x802   :  { %v3458_v40 = vpop.xlane.xlu0 %3457 }
 0x803   :  { %v3462_v30 = vmul.f32 %v3458_v40, %v5973_v46 }
 0x805   :  { %v4080_v22 = vpop.eup %4079  ;;  %v3466_v51 = vadd.f32 1e-05, %v3462_v30 }
 0x806   :  { %v3488_v43 = vmul.f32 %v4080_v22, %v3465_v13  ;;  %vm3494_vm14 = vweird.f32 %v4080_v22 }
 0x807   :  { %4081 = vrsqrt.f32 %v3466_v51  ;;  %vm3495_vm3 = vmor %vm3493_vm15, %vm3494_vm14  ;;  %vm3503_vm5 = vweird.f32 %v3466_v51 }
 0x808   :  { %v3489_v29 = vmul.f32 %v4080_v22, %v3488_v43 }
 0x80a   :  { %v3490_v26 = vmul.f32 0.5, %v3489_v29 }
 0x80c   :  { %v3491_v38 = vsub.f32 1.5, %v3490_v26 }
 0x80d   :  { %v4082_v17 = vpop.eup %4081 }
 0x80e   :  { %v3492_v23 = vmul.f32 %v4080_v22, %v3491_v38  ;;  %v3498_v50 = vmul.f32 %v4082_v17, %v3466_v51  ;;  %vm3504_vm4 = vweird.f32 %v4082_v17 }
 0x80f   :  { %vm3505_vm6 = vmor %vm3503_vm5, %vm3504_vm4 }
 0x810   :  { %v3496_v53 = vsel %vm3495_vm3, %v4080_v22, %v3492_v23  ;;  %v3499_v9 = vmul.f32 %v4082_v17, %v3498_v50 }
 0x811   :  { %v3509_v4 = vmul.f32 %v3496_v53, %v6025_v35 }
 0x812   :  { %v3500_v12 = vmul.f32 0.5, %v3499_v9 }
 0x813   :  { %v3514_v56 = vmul.f32 %v3511_v3, %v3509_v4 }
 0x814   :  { %v3501_v46 = vsub.f32 1.5, %v3500_v12 }
 0x815   :  { %v3519_v20 = vadd.f32 %v3516_v42, %v3514_v56 }
 0x816   :  { %v3502_v54 = vmul.f32 %v4082_v17, %v3501_v46 }
 0x817   :  { %3523 = vst [vmem:[#allocation17 + $0x10] sm:$0xff] %v3519_v20 }
 0x818   :  { %v3506_v18 = vsel %vm3505_vm6, %v4082_v17, %v3502_v54 }
 0x819   :  { %v3510_v6 = vmul.f32 %v3506_v18, %v6030_v39 }
 0x81b   :  { %v3515_v62 = vmul.f32 %v3511_v3, %v3510_v6 }
 0x81d   :  { %v3520_v63 = vadd.f32 %v3516_v42, %v3515_v62 }
 0x81f   :  { %3524 = vst [vmem:[#allocation17 + $0x18] sm:$0xff] %v3520_v63 }
 0x820   :  { %3537 = dma.vmem_to_hbm [thread:$0]  %s3530_s17, 512, %s3532_s8, [#allocation4], %s4341_s21, %s4341_s21, %s4342_s22  }
 0x821   :  { %4338 = dma.done.wait [#allocation4], 512  }
 0x822   :  { %4339 = vsyncadd [#allocation4], 4294966784 }
 0x823   :  { %3542 = vsyncpa [#allocation3], 1 }
 0x824   :  { %3543 = vsyncpa [#allocation6], 1 }
 0x825   :  { %3544 = vsyncpa [#allocation9], 1 }
 0x826   :  { %3545 = vsyncpa [#allocation12], 1 }
 0x827   :  { %3546 = vsyncpa [#allocation15], 1 }
 0x828   :  { %3547 = vsyncpa [#allocation4], 1 }

</bundles_post_ra>
